<compile_context>
chip_gen: v6e
topology: v6e:2x2x1
jax: 0.10.0
libtpu: 0.0.40
codegen_flags: <defaults>
</compile_context>

<pallas_src>
import math
import jax
import jax.numpy as jnp
from jax.experimental import pallas as pl
from jax.experimental.pallas import tpu as pltpu

D_MODEL = 64
N_HEAD = 8
HEAD_DIM = D_MODEL // N_HEAD
DIM_FF = 2048          # PyTorch nn.TransformerEncoderLayer default
LN_EPS = 1e-5


def _pick_btile(B):
    """Largest sublane-friendly tile (multiple of 8, <=128) dividing B; prefer >=2 grid
    tiles so both v7x TensorCores get work.  Falls back to the whole batch."""
    single = None
    for t in (128, 64, 32, 16, 8):
        if B % t == 0:
            if B // t >= 2:
                return t
            if single is None:
                single = t
    return single if single is not None else B


def _resident_spec(x):
    """Full-array block whose index never changes -> weight stays resident in VMEM."""
    nd = x.ndim
    return pl.BlockSpec(x.shape, lambda i, _nd=nd: (0,) * _nd)


def _build_kernel(B_TILE, N, N_PAD, S):
    """One fused kernel per batch tile: input MLPs -> token slab -> encoder layer -> tail."""
    BS = B_TILE * S

    def kernel(
        ego_ref, fut_ref, his_ref, traf_ref, act_ref,
        ego_w1, ego_b1, ego_w2, ego_b2,
        fut_w1, fut_b1, fut_w2, fut_b2,
        his_w1, his_b1, his_w2, his_b2,
        trf_w1, trf_b1, trf_w2, trf_b2,
        cls_ref,
        q_w, q_b, k_w, k_b, v_w, v_b,
        outp_w, outp_b,
        ln1_g, ln1_b, ln2_g, ln2_b,
        ff_w1, ff_b1, ff_w2, ff_b2,
        tail_w1, tail_b1, tail_w2, tail_b2,
        out_ref, attn_ref,
        tok_ref,
    ):
        f32 = jnp.float32
        bf16 = jnp.bfloat16
        relu = lambda t: jnp.maximum(t, 0.0)
        mm = lambda a, b: jnp.dot(a, b, preferred_element_type=f32)

        def mlp2(x, w1, b1, w2, b2):
            h = relu(mm(x, w1[...]) + b1[...])
            return mm(h, w2[...]) + b2[...]

        # ---- per-type input embeddings: flat lane-dense 2D matmuls --------------------
        # (positional embedding is already folded into the *_b2 biases on the host)
        ego_ebd = mlp2(ego_ref[...], ego_w1, ego_b1, ego_w2, ego_b2)     # (Bt, D)
        fut_ebd = mlp2(fut_ref[...], fut_w1, fut_b1, fut_w2, fut_b2)     # (Bt, D)
        his_ebd = mlp2(his_ref[...], his_w1, his_b1, his_w2, his_b2)     # (Bt, D)
        trf_ebd = mlp2(traf_ref[...], trf_w1, trf_b1, trf_w2, trf_b2)    # (Bt*N_PAD, D)

        # ---- token slab assembly: constant number of block stores into VMEM scratch ---
        tok_ref[:, 0:1, :] = jnp.broadcast_to(cls_ref[...], (B_TILE, 1, D_MODEL))
        tok_ref[:, 1:2, :] = ego_ebd.reshape(B_TILE, 1, D_MODEL)
        tok_ref[:, 2:3, :] = fut_ebd.reshape(B_TILE, 1, D_MODEL)
        tok_ref[:, 3:4, :] = his_ebd.reshape(B_TILE, 1, D_MODEL)
        # N_PAD is a multiple of 8 -> this regroup is sublane-tile aligned; the zero-padded
        # traffic rows are dropped by the [:, 0:N, :] slice and never enter the slab.
        trf3 = trf_ebd.reshape(B_TILE, N_PAD, D_MODEL)
        tok_ref[:, 4:, :] = trf3[:, 0:N, :]

        x2 = tok_ref[...].reshape(BS, D_MODEL)                            # (Bt*S, D)

        # ---- lane-dense Q/K/V projections (1/sqrt(hd) folded into q_w/q_b host-side) --
        q3 = (mm(x2, q_w[...]) + q_b[...]).reshape(B_TILE, S, D_MODEL)
        k3 = (mm(x2, k_w[...]) + k_b[...]).reshape(B_TILE, S, D_MODEL)
        v3 = (mm(x2, v_w[...]) + v_b[...]).reshape(B_TILE, S, D_MODEL)

        # ---- multi-head self-attention: static 8-head loop, batched over the batch dim;
        #      per-head contexts concatenated back into one lane-dense slab (no scratch
        #      round trip, no masked 8-lane stores), then a single output projection. -----
        attn_acc = jnp.zeros((B_TILE, S, S), f32)
        ctx_parts = []
        for h in range(N_HEAD):
            sl = slice(h * HEAD_DIM, (h + 1) * HEAD_DIM)
            qh, kh, vh = q3[:, :, sl], k3[:, :, sl], v3[:, :, sl]
            sc = jax.lax.dot_general(qh, kh, (((2,), (2,)), ((0,), (0,))),
                                     preferred_element_type=f32)          # (Bt, S, S)
            sc = sc - jnp.max(sc, axis=-1, keepdims=True)
            e = jnp.exp(sc)
            p = e / jnp.sum(e, axis=-1, keepdims=True)   # exact divide: weights are returned
            attn_acc = attn_acc + p
            ctx_parts.append(jax.lax.dot_general(
                p, vh, (((2,), (1,)), ((0,), (0,))), preferred_element_type=f32))
        attn_ref[...] = attn_acc * (1.0 / N_HEAD)         # head-averaged weights, one store
        ctx2 = jnp.concatenate(ctx_parts, axis=-1).reshape(BS, D_MODEL)

        sa = mm(ctx2, outp_w[...]) + outp_b[...]                          # (Bt*S, D)

        def layer_norm(t, g, bta):
            mu = jnp.mean(t, axis=-1, keepdims=True)
            var = jnp.mean((t - mu) ** 2, axis=-1, keepdims=True)
            return (t - mu) * jax.lax.rsqrt(var + LN_EPS) * g[...] + bta[...]

        x1 = layer_norm(x2 + sa, ln1_g, ln1_b)
        # FFN (the FLOP hot spot): bf16 operands on the MXU with f32 accumulation.
        hdd = relu(jnp.dot(x1.astype(bf16), ff_w1[...], preferred_element_type=f32)
                   + ff_b1[...])
        ff = jnp.dot(hdd.astype(bf16), ff_w2[...], preferred_element_type=f32) + ff_b2[...]
        x2o = layer_norm(x1 + ff, ln2_g, ln2_b)            # encoder memory, rows (b, s)

        # ---- mlp_tail(memory + ego_action) on every token row (lane-dense 2D matmuls);
        #      the host keeps only the cls rows (row b*S == memory[0]).  The extra rows
        #      are negligible work and avoid an unaligned row-gather inside the kernel.
        mlp_in = x2o + act_ref[...]                         # (Bt*S, D) + (Bt*S, 1)
        th = jax.nn.sigmoid(mm(mlp_in, tail_w1[...]) + tail_b1[...])
        out = mm(th, tail_w2[...]) + tail_b2[...]
        out_ref[...] = jnp.minimum(out, 80.0)

    return kernel


def init_params(key):
    d = D_MODEL
    keys = iter(jax.random.split(key, 64))

    def xav(shape):
        fan_in, fan_out = shape
        bound = math.sqrt(6.0 / (fan_in + fan_out))
        return jax.random.uniform(next(keys), shape, jnp.float32, -bound, bound)

    def bias(fan_in, n):
        bound = 1.0 / math.sqrt(fan_in)
        return jax.random.uniform(next(keys), (1, n), jnp.float32, -bound, bound)

    p = {}

    def mlp(name, din, dhid, dout):
        p[name] = (xav((din, dhid)), bias(din, dhid), xav((dhid, dout)), bias(dhid, dout))

    mlp("ego", 5, d // 2, d)
    mlp("future", 300, d, d)
    mlp("history", 30, d // 2, d)
    mlp("traff", 5, d // 2, d)
    p["cls"] = xav((1, d))
    p["qkv_w"] = xav((d, 3 * d)); p["qkv_b"] = bias(d, 3 * d)
    p["outp_w"] = xav((d, d));    p["outp_b"] = bias(d, d)
    p["ln1_g"] = jnp.ones((1, d), jnp.float32); p["ln1_b"] = jnp.zeros((1, d), jnp.float32)
    p["ln2_g"] = jnp.ones((1, d), jnp.float32); p["ln2_b"] = jnp.zeros((1, d), jnp.float32)
    p["ff_w1"] = xav((d, DIM_FF)); p["ff_b1"] = bias(d, DIM_FF)
    p["ff_w2"] = xav((DIM_FF, d)); p["ff_b2"] = bias(DIM_FF, d)
    p["tail"] = (xav((d, d // 2)), bias(d, d // 2), xav((d // 2, 1)), bias(d // 2, 1))
    return p


def forward(params, ego_veh_data, ego_future_track_data, ego_history_track_data,
            traffic_veh_data, ego_action_data):
    B = ego_veh_data.shape[0]
    N = traffic_veh_data.shape[1]
    S = N + 4
    N_PAD = max(8, ((N + 7) // 8) * 8)     # sublane-aligned traffic row count per batch
    B_TILE = _pick_btile(B)
    num_tiles = B // B_TILE
    f32 = jnp.float32

    # ---- host-side layout glue (pure reshapes / pads / broadcasts, no compute) ----
    ego2 = ego_veh_data.astype(f32).reshape(B, 5)
    fut2 = ego_future_track_data.astype(f32).reshape(B, 300)
    his2 = ego_history_track_data.astype(f32).reshape(B, 30)
    traf_pad = jnp.pad(traffic_veh_data.astype(f32), ((0, 0), (0, N_PAD - N), (0, 0)))
    traf2 = traf_pad.reshape(B * N_PAD, 5)
    act_rep = jnp.broadcast_to(ego_action_data.astype(f32).reshape(B, 1, 1),
                               (B, S, 1)).reshape(B * S, 1)

    # ---- parameter folding (in production this would be done once at load time) ----
    scale = 1.0 / math.sqrt(HEAD_DIM)
    qkv_w, qkv_b = params["qkv_w"], params["qkv_b"]
    q_w = qkv_w[:, 0:D_MODEL] * scale;          q_b = qkv_b[:, 0:D_MODEL] * scale
    k_w = qkv_w[:, D_MODEL:2 * D_MODEL];        k_b = qkv_b[:, D_MODEL:2 * D_MODEL]
    v_w = qkv_w[:, 2 * D_MODEL:3 * D_MODEL];    v_b = qkv_b[:, 2 * D_MODEL:3 * D_MODEL]
    ego_w1, ego_b1, ego_w2, ego_b2 = params["ego"];     ego_b2 = ego_b2 + 0.02   # pos ebd
    fut_w1, fut_b1, fut_w2, fut_b2 = params["future"];  fut_b2 = fut_b2 + 0.04
    his_w1, his_b1, his_w2, his_b2 = params["history"]; his_b2 = his_b2 + 0.06
    trf_w1, trf_b1, trf_w2, trf_b2 = params["traff"];   trf_b2 = trf_b2 + 0.08
    ff_w1 = params["ff_w1"].astype(jnp.bfloat16)
    ff_w2 = params["ff_w2"].astype(jnp.bfloat16)

    weights = [
        ego_w1, ego_b1, ego_w2, ego_b2,
        fut_w1, fut_b1, fut_w2, fut_b2,
        his_w1, his_b1, his_w2, his_b2,
        trf_w1, trf_b1, trf_w2, trf_b2,
        params["cls"],
        q_w, q_b, k_w, k_b, v_w, v_b,
        params["outp_w"], params["outp_b"],
        params["ln1_g"], params["ln1_b"], params["ln2_g"], params["ln2_b"],
        ff_w1, params["ff_b1"], ff_w2, params["ff_b2"],
        *params["tail"],
    ]
    data = [ego2, fut2, his2, traf2, act_rep]

    data_specs = [
        pl.BlockSpec((B_TILE, 5), lambda i: (i, 0)),
        pl.BlockSpec((B_TILE, 300), lambda i: (i, 0)),
        pl.BlockSpec((B_TILE, 30), lambda i: (i, 0)),
        pl.BlockSpec((B_TILE * N_PAD, 5), lambda i: (i, 0)),
        pl.BlockSpec((B_TILE * S, 1), lambda i: (i, 0)),
    ]
    weight_specs = [_resident_spec(w) for w in weights]

    out_full, attn = pl.pallas_call(
        _build_kernel(B_TILE, N, N_PAD, S),
        grid=(num_tiles,),
        in_specs=data_specs + weight_specs,
        out_specs=(pl.BlockSpec((B_TILE * S, 1), lambda i: (i, 0)),
                   pl.BlockSpec((B_TILE, S, S), lambda i: (i, 0, 0))),
        out_shape=(jax.ShapeDtypeStruct((B * S, 1), jnp.float32),
                   jax.ShapeDtypeStruct((B, S, S), jnp.float32)),
        scratch_shapes=[pltpu.VMEM((B_TILE, S, D_MODEL), jnp.float32)],   # token slab
        compiler_params=pltpu.CompilerParams(
            dimension_semantics=("parallel",),
            vmem_limit_bytes=48 * 1024 * 1024),
    )(*data, *weights)

    out = out_full.reshape(B, S)[:, 0:1]   # keep memory[0] (cls) rows -> (B, 1)
    # eval-mode return: (clipped scalar per batch, list of per-layer attention weights)
    return out, [attn]


if __name__ == "__main__":
    key = jax.random.PRNGKey(0)
    pk, k1, k2, k3, k4, k5 = jax.random.split(key, 6)
    params = init_params(pk)

    B, N = 2, 4
    ego_veh_data = jax.random.normal(k1, (B, 5), jnp.float32)
    ego_future_track_data = jax.random.normal(k2, (B, 100, 3), jnp.float32)   # -> (B, 300)
    ego_history_track_data = jax.random.normal(k3, (B, 10, 3), jnp.float32)   # -> (B, 30)
    traffic_veh_data = jax.random.normal(k4, (B, N, 5), jnp.float32)
    ego_action_data = jax.random.normal(k5, (B,), jnp.float32)

    out, attn_list = forward(params, ego_veh_data, ego_future_track_data,
                             ego_history_track_data, traffic_veh_data, ego_action_data)
    jax.block_until_ready(out)
    jax.block_until_ready(attn_list[0])

    assert out.shape == (B, 1)
    assert attn_list[0].shape == (B, N + 4, N + 4)
    assert bool(jnp.all(out <= 80.0))
    assert bool(jnp.all(jnp.isfinite(out)))
    print("KERNEL_OK")
</pallas_src>

<mosaic_0001>
module attributes {stable_mosaic.version = 11 : i64} {
  func.func @kernel(%arg0: i32, %arg1: memref<2x5xf32, #tpu.memory_space<vmem>>, %arg2: memref<2x300xf32, #tpu.memory_space<vmem>>, %arg3: memref<2x30xf32, #tpu.memory_space<vmem>>, %arg4: memref<16x5xf32, #tpu.memory_space<vmem>>, %arg5: memref<16x1xf32, #tpu.memory_space<vmem>>, %arg6: memref<5x32xf32, #tpu.memory_space<vmem>>, %arg7: memref<1x32xf32, #tpu.memory_space<vmem>>, %arg8: memref<32x64xf32, #tpu.memory_space<vmem>>, %arg9: memref<1x64xf32, #tpu.memory_space<vmem>>, %arg10: memref<300x64xf32, #tpu.memory_space<vmem>>, %arg11: memref<1x64xf32, #tpu.memory_space<vmem>>, %arg12: memref<64x64xf32, #tpu.memory_space<vmem>>, %arg13: memref<1x64xf32, #tpu.memory_space<vmem>>, %arg14: memref<30x32xf32, #tpu.memory_space<vmem>>, %arg15: memref<1x32xf32, #tpu.memory_space<vmem>>, %arg16: memref<32x64xf32, #tpu.memory_space<vmem>>, %arg17: memref<1x64xf32, #tpu.memory_space<vmem>>, %arg18: memref<5x32xf32, #tpu.memory_space<vmem>>, %arg19: memref<1x32xf32, #tpu.memory_space<vmem>>, %arg20: memref<32x64xf32, #tpu.memory_space<vmem>>, %arg21: memref<1x64xf32, #tpu.memory_space<vmem>>, %arg22: memref<1x64xf32, #tpu.memory_space<vmem>>, %arg23: memref<64x64xf32, #tpu.memory_space<vmem>>, %arg24: memref<1x64xf32, #tpu.memory_space<vmem>>, %arg25: memref<64x64xf32, #tpu.memory_space<vmem>>, %arg26: memref<1x64xf32, #tpu.memory_space<vmem>>, %arg27: memref<64x64xf32, #tpu.memory_space<vmem>>, %arg28: memref<1x64xf32, #tpu.memory_space<vmem>>, %arg29: memref<64x64xf32, #tpu.memory_space<vmem>>, %arg30: memref<1x64xf32, #tpu.memory_space<vmem>>, %arg31: memref<1x64xf32, #tpu.memory_space<vmem>>, %arg32: memref<1x64xf32, #tpu.memory_space<vmem>>, %arg33: memref<1x64xf32, #tpu.memory_space<vmem>>, %arg34: memref<1x64xf32, #tpu.memory_space<vmem>>, %arg35: memref<64x2048xbf16, #tpu.memory_space<vmem>>, %arg36: memref<1x2048xf32, #tpu.memory_space<vmem>>, %arg37: memref<2048x64xbf16, #tpu.memory_space<vmem>>, %arg38: memref<1x64xf32, #tpu.memory_space<vmem>>, %arg39: memref<64x32xf32, #tpu.memory_space<vmem>>, %arg40: memref<1x32xf32, #tpu.memory_space<vmem>>, %arg41: memref<32x1xf32, #tpu.memory_space<vmem>>, %arg42: memref<1x1xf32, #tpu.memory_space<vmem>>, %arg43: memref<16x1xf32, #tpu.memory_space<vmem>>, %arg44: memref<2x8x8xf32, #tpu.memory_space<vmem>>, %arg45: memref<2x8x64xf32, #tpu.memory_space<vmem>>) attributes {dimension_semantics = [#tpu.dimension_semantics<parallel>], iteration_bounds = array<i64: 1>, scalar_prefetch = 0 : i64, scratch_operands = 1 : i64, tpu.core_type = #tpu.core_type<tc>, window_params = [{transform_indices = @transform_0, window_bounds = array<i64: 2, 5>}, {transform_indices = @transform_1, window_bounds = array<i64: 2, 300>}, {transform_indices = @transform_2, window_bounds = array<i64: 2, 30>}, {transform_indices = @transform_3, window_bounds = array<i64: 16, 5>}, {transform_indices = @transform_4, window_bounds = array<i64: 16, 1>}, {pipeline_mode = #tpu.pipeline_mode<synchronous>, transform_indices = @transform_5, window_bounds = array<i64: 5, 32>}, {pipeline_mode = #tpu.pipeline_mode<synchronous>, transform_indices = @transform_6, window_bounds = array<i64: 1, 32>}, {pipeline_mode = #tpu.pipeline_mode<synchronous>, transform_indices = @transform_7, window_bounds = array<i64: 32, 64>}, {pipeline_mode = #tpu.pipeline_mode<synchronous>, transform_indices = @transform_8, window_bounds = array<i64: 1, 64>}, {pipeline_mode = #tpu.pipeline_mode<synchronous>, transform_indices = @transform_9, window_bounds = array<i64: 300, 64>}, {pipeline_mode = #tpu.pipeline_mode<synchronous>, transform_indices = @transform_10, window_bounds = array<i64: 1, 64>}, {pipeline_mode = #tpu.pipeline_mode<synchronous>, transform_indices = @transform_11, window_bounds = array<i64: 64, 64>}, {pipeline_mode = #tpu.pipeline_mode<synchronous>, transform_indices = @transform_12, window_bounds = array<i64: 1, 64>}, {pipeline_mode = #tpu.pipeline_mode<synchronous>, transform_indices = @transform_13, window_bounds = array<i64: 30, 32>}, {pipeline_mode = #tpu.pipeline_mode<synchronous>, transform_indices = @transform_14, window_bounds = array<i64: 1, 32>}, {pipeline_mode = #tpu.pipeline_mode<synchronous>, transform_indices = @transform_15, window_bounds = array<i64: 32, 64>}, {pipeline_mode = #tpu.pipeline_mode<synchronous>, transform_indices = @transform_16, window_bounds = array<i64: 1, 64>}, {pipeline_mode = #tpu.pipeline_mode<synchronous>, transform_indices = @transform_17, window_bounds = array<i64: 5, 32>}, {pipeline_mode = #tpu.pipeline_mode<synchronous>, transform_indices = @transform_18, window_bounds = array<i64: 1, 32>}, {pipeline_mode = #tpu.pipeline_mode<synchronous>, transform_indices = @transform_19, window_bounds = array<i64: 32, 64>}, {pipeline_mode = #tpu.pipeline_mode<synchronous>, transform_indices = @transform_20, window_bounds = array<i64: 1, 64>}, {pipeline_mode = #tpu.pipeline_mode<synchronous>, transform_indices = @transform_21, window_bounds = array<i64: 1, 64>}, {pipeline_mode = #tpu.pipeline_mode<synchronous>, transform_indices = @transform_22, window_bounds = array<i64: 64, 64>}, {pipeline_mode = #tpu.pipeline_mode<synchronous>, transform_indices = @transform_23, window_bounds = array<i64: 1, 64>}, {pipeline_mode = #tpu.pipeline_mode<synchronous>, transform_indices = @transform_24, window_bounds = array<i64: 64, 64>}, {pipeline_mode = #tpu.pipeline_mode<synchronous>, transform_indices = @transform_25, window_bounds = array<i64: 1, 64>}, {pipeline_mode = #tpu.pipeline_mode<synchronous>, transform_indices = @transform_26, window_bounds = array<i64: 64, 64>}, {pipeline_mode = #tpu.pipeline_mode<synchronous>, transform_indices = @transform_27, window_bounds = array<i64: 1, 64>}, {pipeline_mode = #tpu.pipeline_mode<synchronous>, transform_indices = @transform_28, window_bounds = array<i64: 64, 64>}, {pipeline_mode = #tpu.pipeline_mode<synchronous>, transform_indices = @transform_29, window_bounds = array<i64: 1, 64>}, {pipeline_mode = #tpu.pipeline_mode<synchronous>, transform_indices = @transform_30, window_bounds = array<i64: 1, 64>}, {pipeline_mode = #tpu.pipeline_mode<synchronous>, transform_indices = @transform_31, window_bounds = array<i64: 1, 64>}, {pipeline_mode = #tpu.pipeline_mode<synchronous>, transform_indices = @transform_32, window_bounds = array<i64: 1, 64>}, {pipeline_mode = #tpu.pipeline_mode<synchronous>, transform_indices = @transform_33, window_bounds = array<i64: 1, 64>}, {pipeline_mode = #tpu.pipeline_mode<synchronous>, transform_indices = @transform_34, window_bounds = array<i64: 64, 2048>}, {pipeline_mode = #tpu.pipeline_mode<synchronous>, transform_indices = @transform_35, window_bounds = array<i64: 1, 2048>}, {pipeline_mode = #tpu.pipeline_mode<synchronous>, transform_indices = @transform_36, window_bounds = array<i64: 2048, 64>}, {pipeline_mode = #tpu.pipeline_mode<synchronous>, transform_indices = @transform_37, window_bounds = array<i64: 1, 64>}, {pipeline_mode = #tpu.pipeline_mode<synchronous>, transform_indices = @transform_38, window_bounds = array<i64: 64, 32>}, {pipeline_mode = #tpu.pipeline_mode<synchronous>, transform_indices = @transform_39, window_bounds = array<i64: 1, 32>}, {pipeline_mode = #tpu.pipeline_mode<synchronous>, transform_indices = @transform_40, window_bounds = array<i64: 32, 1>}, {pipeline_mode = #tpu.pipeline_mode<synchronous>, transform_indices = @transform_41, window_bounds = array<i64: 1, 1>}, {transform_indices = @transform_42, window_bounds = array<i64: 16, 1>}, {transform_indices = @transform_43, window_bounds = array<i64: 2, 8, 8>}]} {
    %c0 = arith.constant 0 : index
    %c0_0 = arith.constant 0 : index
    %0 = vector.load %arg1[%c0, %c0_0] : memref<2x5xf32, #tpu.memory_space<vmem>>, vector<2x5xf32>
    %c0_1 = arith.constant 0 : index
    %c0_2 = arith.constant 0 : index
    %1 = vector.load %arg6[%c0_1, %c0_2] : memref<5x32xf32, #tpu.memory_space<vmem>>, vector<5x32xf32>
    %cst = arith.constant dense<0.000000e+00> : vector<2x32xf32>
    %2 = tpu.matmul %0, %1, %cst {dimension_numbers = #tpu.dot_dimension_numbers<[1], [0], [0], [1], [0, 0, 1, 1], [], []>} : vector<2x5xf32>, vector<5x32xf32>, vector<2x32xf32> -> vector<2x32xf32>
    %c0_3 = arith.constant 0 : index
    %c0_4 = arith.constant 0 : index
    %3 = vector.load %arg7[%c0_3, %c0_4] : memref<1x32xf32, #tpu.memory_space<vmem>>, vector<1x32xf32>
    %4 = vector.broadcast %3 : vector<1x32xf32> to vector<2x32xf32>
    %5 = arith.addf %2, %4 : vector<2x32xf32>
    %cst_5 = arith.constant 0.000000e+00 : f32
    %6 = vector.broadcast %cst_5 : f32 to vector<2x32xf32>
    %7 = arith.maximumf %5, %6 : vector<2x32xf32>
    %c0_6 = arith.constant 0 : index
    %c0_7 = arith.constant 0 : index
    %8 = vector.load %arg8[%c0_6, %c0_7] : memref<32x64xf32, #tpu.memory_space<vmem>>, vector<32x64xf32>
    %cst_8 = arith.constant dense<0.000000e+00> : vector<2x64xf32>
    %9 = tpu.matmul %7, %8, %cst_8 {dimension_numbers = #tpu.dot_dimension_numbers<[1], [0], [0], [1], [0, 0, 1, 1], [], []>} : vector<2x32xf32>, vector<32x64xf32>, vector<2x64xf32> -> vector<2x64xf32>
    %c0_9 = arith.constant 0 : index
    %c0_10 = arith.constant 0 : index
    %10 = vector.load %arg9[%c0_9, %c0_10] : memref<1x64xf32, #tpu.memory_space<vmem>>, vector<1x64xf32>
    %11 = vector.broadcast %10 : vector<1x64xf32> to vector<2x64xf32>
    %12 = arith.addf %9, %11 : vector<2x64xf32>
    %c0_11 = arith.constant 0 : index
    %c0_12 = arith.constant 0 : index
    %13 = vector.load %arg2[%c0_11, %c0_12] : memref<2x300xf32, #tpu.memory_space<vmem>>, vector<2x300xf32>
    %c0_13 = arith.constant 0 : index
    %c0_14 = arith.constant 0 : index
    %14 = vector.load %arg10[%c0_13, %c0_14] : memref<300x64xf32, #tpu.memory_space<vmem>>, vector<300x64xf32>
    %cst_15 = arith.constant dense<0.000000e+00> : vector<2x64xf32>
    %15 = tpu.matmul %13, %14, %cst_15 {dimension_numbers = #tpu.dot_dimension_numbers<[1], [0], [0], [1], [0, 0, 1, 1], [], []>} : vector<2x300xf32>, vector<300x64xf32>, vector<2x64xf32> -> vector<2x64xf32>
    %c0_16 = arith.constant 0 : index
    %c0_17 = arith.constant 0 : index
    %16 = vector.load %arg11[%c0_16, %c0_17] : memref<1x64xf32, #tpu.memory_space<vmem>>, vector<1x64xf32>
    %17 = vector.broadcast %16 : vector<1x64xf32> to vector<2x64xf32>
    %18 = arith.addf %15, %17 : vector<2x64xf32>
    %cst_18 = arith.constant 0.000000e+00 : f32
    %19 = vector.broadcast %cst_18 : f32 to vector<2x64xf32>
    %20 = arith.maximumf %18, %19 : vector<2x64xf32>
    %c0_19 = arith.constant 0 : index
    %c0_20 = arith.constant 0 : index
    %21 = vector.load %arg12[%c0_19, %c0_20] : memref<64x64xf32, #tpu.memory_space<vmem>>, vector<64x64xf32>
    %cst_21 = arith.constant dense<0.000000e+00> : vector<2x64xf32>
    %22 = tpu.matmul %20, %21, %cst_21 {dimension_numbers = #tpu.dot_dimension_numbers<[1], [0], [0], [1], [0, 0, 1, 1], [], []>} : vector<2x64xf32>, vector<64x64xf32>, vector<2x64xf32> -> vector<2x64xf32>
    %c0_22 = arith.constant 0 : index
    %c0_23 = arith.constant 0 : index
    %23 = vector.load %arg13[%c0_22, %c0_23] : memref<1x64xf32, #tpu.memory_space<vmem>>, vector<1x64xf32>
    %24 = vector.broadcast %23 : vector<1x64xf32> to vector<2x64xf32>
    %25 = arith.addf %22, %24 : vector<2x64xf32>
    %c0_24 = arith.constant 0 : index
    %c0_25 = arith.constant 0 : index
    %26 = vector.load %arg3[%c0_24, %c0_25] : memref<2x30xf32, #tpu.memory_space<vmem>>, vector<2x30xf32>
    %c0_26 = arith.constant 0 : index
    %c0_27 = arith.constant 0 : index
    %27 = vector.load %arg14[%c0_26, %c0_27] : memref<30x32xf32, #tpu.memory_space<vmem>>, vector<30x32xf32>
    %cst_28 = arith.constant dense<0.000000e+00> : vector<2x32xf32>
    %28 = tpu.matmul %26, %27, %cst_28 {dimension_numbers = #tpu.dot_dimension_numbers<[1], [0], [0], [1], [0, 0, 1, 1], [], []>} : vector<2x30xf32>, vector<30x32xf32>, vector<2x32xf32> -> vector<2x32xf32>
    %c0_29 = arith.constant 0 : index
    %c0_30 = arith.constant 0 : index
    %29 = vector.load %arg15[%c0_29, %c0_30] : memref<1x32xf32, #tpu.memory_space<vmem>>, vector<1x32xf32>
    %30 = vector.broadcast %29 : vector<1x32xf32> to vector<2x32xf32>
    %31 = arith.addf %28, %30 : vector<2x32xf32>
    %cst_31 = arith.constant 0.000000e+00 : f32
    %32 = vector.broadcast %cst_31 : f32 to vector<2x32xf32>
    %33 = arith.maximumf %31, %32 : vector<2x32xf32>
    %c0_32 = arith.constant 0 : index
    %c0_33 = arith.constant 0 : index
    %34 = vector.load %arg16[%c0_32, %c0_33] : memref<32x64xf32, #tpu.memory_space<vmem>>, vector<32x64xf32>
    %cst_34 = arith.constant dense<0.000000e+00> : vector<2x64xf32>
    %35 = tpu.matmul %33, %34, %cst_34 {dimension_numbers = #tpu.dot_dimension_numbers<[1], [0], [0], [1], [0, 0, 1, 1], [], []>} : vector<2x32xf32>, vector<32x64xf32>, vector<2x64xf32> -> vector<2x64xf32>
    %c0_35 = arith.constant 0 : index
    %c0_36 = arith.constant 0 : index
    %36 = vector.load %arg17[%c0_35, %c0_36] : memref<1x64xf32, #tpu.memory_space<vmem>>, vector<1x64xf32>
    %37 = vector.broadcast %36 : vector<1x64xf32> to vector<2x64xf32>
    %38 = arith.addf %35, %37 : vector<2x64xf32>
    %c0_37 = arith.constant 0 : index
    %c0_38 = arith.constant 0 : index
    %39 = vector.load %arg4[%c0_37, %c0_38] : memref<16x5xf32, #tpu.memory_space<vmem>>, vector<16x5xf32>
    %c0_39 = arith.constant 0 : index
    %c0_40 = arith.constant 0 : index
    %40 = vector.load %arg18[%c0_39, %c0_40] : memref<5x32xf32, #tpu.memory_space<vmem>>, vector<5x32xf32>
    %cst_41 = arith.constant dense<0.000000e+00> : vector<16x32xf32>
    %41 = tpu.matmul %39, %40, %cst_41 {dimension_numbers = #tpu.dot_dimension_numbers<[1], [0], [0], [1], [0, 0, 1, 1], [], []>} : vector<16x5xf32>, vector<5x32xf32>, vector<16x32xf32> -> vector<16x32xf32>
    %c0_42 = arith.constant 0 : index
    %c0_43 = arith.constant 0 : index
    %42 = vector.load %arg19[%c0_42, %c0_43] : memref<1x32xf32, #tpu.memory_space<vmem>>, vector<1x32xf32>
    %43 = vector.broadcast %42 : vector<1x32xf32> to vector<16x32xf32>
    %44 = arith.addf %41, %43 : vector<16x32xf32>
    %cst_44 = arith.constant 0.000000e+00 : f32
    %45 = vector.broadcast %cst_44 : f32 to vector<16x32xf32>
    %46 = arith.maximumf %44, %45 : vector<16x32xf32>
    %c0_45 = arith.constant 0 : index
    %c0_46 = arith.constant 0 : index
    %47 = vector.load %arg20[%c0_45, %c0_46] : memref<32x64xf32, #tpu.memory_space<vmem>>, vector<32x64xf32>
    %cst_47 = arith.constant dense<0.000000e+00> : vector<16x64xf32>
    %48 = tpu.matmul %46, %47, %cst_47 {dimension_numbers = #tpu.dot_dimension_numbers<[1], [0], [0], [1], [0, 0, 1, 1], [], []>} : vector<16x32xf32>, vector<32x64xf32>, vector<16x64xf32> -> vector<16x64xf32>
    %c0_48 = arith.constant 0 : index
    %c0_49 = arith.constant 0 : index
    %49 = vector.load %arg21[%c0_48, %c0_49] : memref<1x64xf32, #tpu.memory_space<vmem>>, vector<1x64xf32>
    %50 = vector.broadcast %49 : vector<1x64xf32> to vector<16x64xf32>
    %51 = arith.addf %48, %50 : vector<16x64xf32>
    %c0_50 = arith.constant 0 : index
    %c0_51 = arith.constant 0 : index
    %52 = vector.load %arg22[%c0_50, %c0_51] : memref<1x64xf32, #tpu.memory_space<vmem>>, vector<1x64xf32>
    %53 = vector.shape_cast %52 : vector<1x64xf32> to vector<1x1x64xf32>
    %54 = vector.broadcast %53 : vector<1x1x64xf32> to vector<2x1x64xf32>
    %c0_52 = arith.constant 0 : index
    %c0_53 = arith.constant 0 : index
    %c0_54 = arith.constant 0 : index
    %55 = vector.load %arg45[%c0_52, %c0_53, %c0_54] : memref<2x8x64xf32, #tpu.memory_space<vmem>>, vector<2x1x64xf32>
    tpu.vector_store %arg45[%c0_52, %c0_53, %c0_54], %54 {strides = array<i32>} : memref<2x8x64xf32, #tpu.memory_space<vmem>>, vector<2x1x64xf32>,
    %56 = vector.shape_cast %12 : vector<2x64xf32> to vector<2x1x64xf32>
    %c0_55 = arith.constant 0 : index
    %c1 = arith.constant 1 : index
    %c0_56 = arith.constant 0 : index
    %57 = vector.load %arg45[%c0_55, %c1, %c0_56] : memref<2x8x64xf32, #tpu.memory_space<vmem>>, vector<2x1x64xf32>
    tpu.vector_store %arg45[%c0_55, %c1, %c0_56], %56 {strides = array<i32>} : memref<2x8x64xf32, #tpu.memory_space<vmem>>, vector<2x1x64xf32>,
    %58 = vector.shape_cast %25 : vector<2x64xf32> to vector<2x1x64xf32>
    %c0_57 = arith.constant 0 : index
    %c2 = arith.constant 2 : index
    %c0_58 = arith.constant 0 : index
    %59 = vector.load %arg45[%c0_57, %c2, %c0_58] : memref<2x8x64xf32, #tpu.memory_space<vmem>>, vector<2x1x64xf32>
    tpu.vector_store %arg45[%c0_57, %c2, %c0_58], %58 {strides = array<i32>} : memref<2x8x64xf32, #tpu.memory_space<vmem>>, vector<2x1x64xf32>,
    %60 = vector.shape_cast %38 : vector<2x64xf32> to vector<2x1x64xf32>
    %c0_59 = arith.constant 0 : index
    %c3 = arith.constant 3 : index
    %c0_60 = arith.constant 0 : index
    %61 = vector.load %arg45[%c0_59, %c3, %c0_60] : memref<2x8x64xf32, #tpu.memory_space<vmem>>, vector<2x1x64xf32>
    tpu.vector_store %arg45[%c0_59, %c3, %c0_60], %60 {strides = array<i32>} : memref<2x8x64xf32, #tpu.memory_space<vmem>>, vector<2x1x64xf32>,
    %62 = vector.shape_cast %51 : vector<16x64xf32> to vector<2x8x64xf32>
    %63 = vector.extract_strided_slice %62 {offsets = [0, 0, 0], sizes = [2, 4, 64], strides = [1, 1, 1]} : vector<2x8x64xf32> to vector<2x4x64xf32>
    %c0_61 = arith.constant 0 : index
    %c4 = arith.constant 4 : index
    %c0_62 = arith.constant 0 : index
    %64 = vector.load %arg45[%c0_61, %c4, %c0_62] : memref<2x8x64xf32, #tpu.memory_space<vmem>>, vector<2x4x64xf32>
    tpu.vector_store %arg45[%c0_61, %c4, %c0_62], %63 {strides = array<i32>} : memref<2x8x64xf32, #tpu.memory_space<vmem>>, vector<2x4x64xf32>,
    %c0_63 = arith.constant 0 : index
    %c0_64 = arith.constant 0 : index
    %c0_65 = arith.constant 0 : index
    %65 = vector.load %arg45[%c0_63, %c0_64, %c0_65] : memref<2x8x64xf32, #tpu.memory_space<vmem>>, vector<2x8x64xf32>
    %66 = vector.shape_cast %65 : vector<2x8x64xf32> to vector<16x64xf32>
    %c0_66 = arith.constant 0 : index
    %c0_67 = arith.constant 0 : index
    %67 = vector.load %arg23[%c0_66, %c0_67] : memref<64x64xf32, #tpu.memory_space<vmem>>, vector<64x64xf32>
    %cst_68 = arith.constant dense<0.000000e+00> : vector<16x64xf32>
    %68 = tpu.matmul %66, %67, %cst_68 {dimension_numbers = #tpu.dot_dimension_numbers<[1], [0], [0], [1], [0, 0, 1, 1], [], []>} : vector<16x64xf32>, vector<64x64xf32>, vector<16x64xf32> -> vector<16x64xf32>
    %c0_69 = arith.constant 0 : index
    %c0_70 = arith.constant 0 : index
    %69 = vector.load %arg24[%c0_69, %c0_70] : memref<1x64xf32, #tpu.memory_space<vmem>>, vector<1x64xf32>
    %70 = vector.broadcast %69 : vector<1x64xf32> to vector<16x64xf32>
    %71 = arith.addf %68, %70 : vector<16x64xf32>
    %72 = vector.shape_cast %71 : vector<16x64xf32> to vector<2x8x64xf32>
    %c0_71 = arith.constant 0 : index
    %c0_72 = arith.constant 0 : index
    %73 = vector.load %arg25[%c0_71, %c0_72] : memref<64x64xf32, #tpu.memory_space<vmem>>, vector<64x64xf32>
    %cst_73 = arith.constant dense<0.000000e+00> : vector<16x64xf32>
    %74 = tpu.matmul %66, %73, %cst_73 {dimension_numbers = #tpu.dot_dimension_numbers<[1], [0], [0], [1], [0, 0, 1, 1], [], []>} : vector<16x64xf32>, vector<64x64xf32>, vector<16x64xf32> -> vector<16x64xf32>
    %c0_74 = arith.constant 0 : index
    %c0_75 = arith.constant 0 : index
    %75 = vector.load %arg26[%c0_74, %c0_75] : memref<1x64xf32, #tpu.memory_space<vmem>>, vector<1x64xf32>
    %76 = vector.broadcast %75 : vector<1x64xf32> to vector<16x64xf32>
    %77 = arith.addf %74, %76 : vector<16x64xf32>
    %78 = vector.shape_cast %77 : vector<16x64xf32> to vector<2x8x64xf32>
    %c0_76 = arith.constant 0 : index
    %c0_77 = arith.constant 0 : index
    %79 = vector.load %arg27[%c0_76, %c0_77] : memref<64x64xf32, #tpu.memory_space<vmem>>, vector<64x64xf32>
    %cst_78 = arith.constant dense<0.000000e+00> : vector<16x64xf32>
    %80 = tpu.matmul %66, %79, %cst_78 {dimension_numbers = #tpu.dot_dimension_numbers<[1], [0], [0], [1], [0, 0, 1, 1], [], []>} : vector<16x64xf32>, vector<64x64xf32>, vector<16x64xf32> -> vector<16x64xf32>
    %c0_79 = arith.constant 0 : index
    %c0_80 = arith.constant 0 : index
    %81 = vector.load %arg28[%c0_79, %c0_80] : memref<1x64xf32, #tpu.memory_space<vmem>>, vector<1x64xf32>
    %82 = vector.broadcast %81 : vector<1x64xf32> to vector<16x64xf32>
    %83 = arith.addf %80, %82 : vector<16x64xf32>
    %84 = vector.shape_cast %83 : vector<16x64xf32> to vector<2x8x64xf32>
    %cst_81 = arith.constant 0.000000e+00 : f32
    %85 = vector.broadcast %cst_81 : f32 to vector<2x8x8xf32>
    %86 = vector.extract_strided_slice %72 {offsets = [0, 0, 0], sizes = [2, 8, 8], strides = [1, 1, 1]} : vector<2x8x64xf32> to vector<2x8x8xf32>
    %87 = vector.extract_strided_slice %78 {offsets = [0, 0, 0], sizes = [2, 8, 8], strides = [1, 1, 1]} : vector<2x8x64xf32> to vector<2x8x8xf32>
    %88 = vector.extract_strided_slice %84 {offsets = [0, 0, 0], sizes = [2, 8, 8], strides = [1, 1, 1]} : vector<2x8x64xf32> to vector<2x8x8xf32>
    %cst_82 = arith.constant dense<0.000000e+00> : vector<2x8x8xf32>
    %89 = tpu.matmul %86, %87, %cst_82 {dimension_numbers = #tpu.dot_dimension_numbers<[2], [2], [1], [1], [0, 0, 0, 1, 1, 1], [0], [0]>} : vector<2x8x8xf32>, vector<2x8x8xf32>, vector<2x8x8xf32> -> vector<2x8x8xf32>
    %cst_83 = arith.constant dense<0xFF800000> : vector<2x8xf32>
    %90 = vector.multi_reduction <maximumf>, %89, %cst_83 [2] : vector<2x8x8xf32> to vector<2x8xf32>
    %91 = vector.shape_cast %90 : vector<2x8xf32> to vector<2x8x1xf32>
    %92 = vector.broadcast %91 : vector<2x8x1xf32> to vector<2x8x8xf32>
    %93 = arith.subf %89, %92 : vector<2x8x8xf32>
    %94 = math.exp %93 : vector<2x8x8xf32>
    %cst_84 = arith.constant dense<0.000000e+00> : vector<2x8xf32>
    %95 = vector.multi_reduction <add>, %94, %cst_84 [2] : vector<2x8x8xf32> to vector<2x8xf32>
    %96 = vector.shape_cast %95 : vector<2x8xf32> to vector<2x8x1xf32>
    %97 = vector.broadcast %96 : vector<2x8x1xf32> to vector<2x8x8xf32>
    %98 = arith.divf %94, %97 : vector<2x8x8xf32>
    %99 = arith.addf %85, %98 : vector<2x8x8xf32>
    %cst_85 = arith.constant dense<0.000000e+00> : vector<2x8x8xf32>
    %100 = tpu.matmul %98, %88, %cst_85 {dimension_numbers = #tpu.dot_dimension_numbers<[2], [1], [1], [2], [0, 0, 0, 1, 1, 2], [0], [0]>} : vector<2x8x8xf32>, vector<2x8x8xf32>, vector<2x8x8xf32> -> vector<2x8x8xf32>
    %101 = vector.extract_strided_slice %72 {offsets = [0, 0, 8], sizes = [2, 8, 8], strides = [1, 1, 1]} : vector<2x8x64xf32> to vector<2x8x8xf32>
    %102 = vector.extract_strided_slice %78 {offsets = [0, 0, 8], sizes = [2, 8, 8], strides = [1, 1, 1]} : vector<2x8x64xf32> to vector<2x8x8xf32>
    %103 = vector.extract_strided_slice %84 {offsets = [0, 0, 8], sizes = [2, 8, 8], strides = [1, 1, 1]} : vector<2x8x64xf32> to vector<2x8x8xf32>
    %cst_86 = arith.constant dense<0.000000e+00> : vector<2x8x8xf32>
    %104 = tpu.matmul %101, %102, %cst_86 {dimension_numbers = #tpu.dot_dimension_numbers<[2], [2], [1], [1], [0, 0, 0, 1, 1, 1], [0], [0]>} : vector<2x8x8xf32>, vector<2x8x8xf32>, vector<2x8x8xf32> -> vector<2x8x8xf32>
    %cst_87 = arith.constant dense<0xFF800000> : vector<2x8xf32>
    %105 = vector.multi_reduction <maximumf>, %104, %cst_87 [2] : vector<2x8x8xf32> to vector<2x8xf32>
    %106 = vector.shape_cast %105 : vector<2x8xf32> to vector<2x8x1xf32>
    %107 = vector.broadcast %106 : vector<2x8x1xf32> to vector<2x8x8xf32>
    %108 = arith.subf %104, %107 : vector<2x8x8xf32>
    %109 = math.exp %108 : vector<2x8x8xf32>
    %cst_88 = arith.constant dense<0.000000e+00> : vector<2x8xf32>
    %110 = vector.multi_reduction <add>, %109, %cst_88 [2] : vector<2x8x8xf32> to vector<2x8xf32>
    %111 = vector.shape_cast %110 : vector<2x8xf32> to vector<2x8x1xf32>
    %112 = vector.broadcast %111 : vector<2x8x1xf32> to vector<2x8x8xf32>
    %113 = arith.divf %109, %112 : vector<2x8x8xf32>
    %114 = arith.addf %99, %113 : vector<2x8x8xf32>
    %cst_89 = arith.constant dense<0.000000e+00> : vector<2x8x8xf32>
    %115 = tpu.matmul %113, %103, %cst_89 {dimension_numbers = #tpu.dot_dimension_numbers<[2], [1], [1], [2], [0, 0, 0, 1, 1, 2], [0], [0]>} : vector<2x8x8xf32>, vector<2x8x8xf32>, vector<2x8x8xf32> -> vector<2x8x8xf32>
    %116 = vector.extract_strided_slice %72 {offsets = [0, 0, 16], sizes = [2, 8, 8], strides = [1, 1, 1]} : vector<2x8x64xf32> to vector<2x8x8xf32>
    %117 = vector.extract_strided_slice %78 {offsets = [0, 0, 16], sizes = [2, 8, 8], strides = [1, 1, 1]} : vector<2x8x64xf32> to vector<2x8x8xf32>
    %118 = vector.extract_strided_slice %84 {offsets = [0, 0, 16], sizes = [2, 8, 8], strides = [1, 1, 1]} : vector<2x8x64xf32> to vector<2x8x8xf32>
    %cst_90 = arith.constant dense<0.000000e+00> : vector<2x8x8xf32>
    %119 = tpu.matmul %116, %117, %cst_90 {dimension_numbers = #tpu.dot_dimension_numbers<[2], [2], [1], [1], [0, 0, 0, 1, 1, 1], [0], [0]>} : vector<2x8x8xf32>, vector<2x8x8xf32>, vector<2x8x8xf32> -> vector<2x8x8xf32>
    %cst_91 = arith.constant dense<0xFF800000> : vector<2x8xf32>
    %120 = vector.multi_reduction <maximumf>, %119, %cst_91 [2] : vector<2x8x8xf32> to vector<2x8xf32>
    %121 = vector.shape_cast %120 : vector<2x8xf32> to vector<2x8x1xf32>
    %122 = vector.broadcast %121 : vector<2x8x1xf32> to vector<2x8x8xf32>
    %123 = arith.subf %119, %122 : vector<2x8x8xf32>
    %124 = math.exp %123 : vector<2x8x8xf32>
    %cst_92 = arith.constant dense<0.000000e+00> : vector<2x8xf32>
    %125 = vector.multi_reduction <add>, %124, %cst_92 [2] : vector<2x8x8xf32> to vector<2x8xf32>
    %126 = vector.shape_cast %125 : vector<2x8xf32> to vector<2x8x1xf32>
    %127 = vector.broadcast %126 : vector<2x8x1xf32> to vector<2x8x8xf32>
    %128 = arith.divf %124, %127 : vector<2x8x8xf32>
    %129 = arith.addf %114, %128 : vector<2x8x8xf32>
    %cst_93 = arith.constant dense<0.000000e+00> : vector<2x8x8xf32>
    %130 = tpu.matmul %128, %118, %cst_93 {dimension_numbers = #tpu.dot_dimension_numbers<[2], [1], [1], [2], [0, 0, 0, 1, 1, 2], [0], [0]>} : vector<2x8x8xf32>, vector<2x8x8xf32>, vector<2x8x8xf32> -> vector<2x8x8xf32>
    %131 = vector.extract_strided_slice %72 {offsets = [0, 0, 24], sizes = [2, 8, 8], strides = [1, 1, 1]} : vector<2x8x64xf32> to vector<2x8x8xf32>
    %132 = vector.extract_strided_slice %78 {offsets = [0, 0, 24], sizes = [2, 8, 8], strides = [1, 1, 1]} : vector<2x8x64xf32> to vector<2x8x8xf32>
    %133 = vector.extract_strided_slice %84 {offsets = [0, 0, 24], sizes = [2, 8, 8], strides = [1, 1, 1]} : vector<2x8x64xf32> to vector<2x8x8xf32>
    %cst_94 = arith.constant dense<0.000000e+00> : vector<2x8x8xf32>
    %134 = tpu.matmul %131, %132, %cst_94 {dimension_numbers = #tpu.dot_dimension_numbers<[2], [2], [1], [1], [0, 0, 0, 1, 1, 1], [0], [0]>} : vector<2x8x8xf32>, vector<2x8x8xf32>, vector<2x8x8xf32> -> vector<2x8x8xf32>
    %cst_95 = arith.constant dense<0xFF800000> : vector<2x8xf32>
    %135 = vector.multi_reduction <maximumf>, %134, %cst_95 [2] : vector<2x8x8xf32> to vector<2x8xf32>
    %136 = vector.shape_cast %135 : vector<2x8xf32> to vector<2x8x1xf32>
    %137 = vector.broadcast %136 : vector<2x8x1xf32> to vector<2x8x8xf32>
    %138 = arith.subf %134, %137 : vector<2x8x8xf32>
    %139 = math.exp %138 : vector<2x8x8xf32>
    %cst_96 = arith.constant dense<0.000000e+00> : vector<2x8xf32>
    %140 = vector.multi_reduction <add>, %139, %cst_96 [2] : vector<2x8x8xf32> to vector<2x8xf32>
    %141 = vector.shape_cast %140 : vector<2x8xf32> to vector<2x8x1xf32>
    %142 = vector.broadcast %141 : vector<2x8x1xf32> to vector<2x8x8xf32>
    %143 = arith.divf %139, %142 : vector<2x8x8xf32>
    %144 = arith.addf %129, %143 : vector<2x8x8xf32>
    %cst_97 = arith.constant dense<0.000000e+00> : vector<2x8x8xf32>
    %145 = tpu.matmul %143, %133, %cst_97 {dimension_numbers = #tpu.dot_dimension_numbers<[2], [1], [1], [2], [0, 0, 0, 1, 1, 2], [0], [0]>} : vector<2x8x8xf32>, vector<2x8x8xf32>, vector<2x8x8xf32> -> vector<2x8x8xf32>
    %146 = vector.extract_strided_slice %72 {offsets = [0, 0, 32], sizes = [2, 8, 8], strides = [1, 1, 1]} : vector<2x8x64xf32> to vector<2x8x8xf32>
    %147 = vector.extract_strided_slice %78 {offsets = [0, 0, 32], sizes = [2, 8, 8], strides = [1, 1, 1]} : vector<2x8x64xf32> to vector<2x8x8xf32>
    %148 = vector.extract_strided_slice %84 {offsets = [0, 0, 32], sizes = [2, 8, 8], strides = [1, 1, 1]} : vector<2x8x64xf32> to vector<2x8x8xf32>
    %cst_98 = arith.constant dense<0.000000e+00> : vector<2x8x8xf32>
    %149 = tpu.matmul %146, %147, %cst_98 {dimension_numbers = #tpu.dot_dimension_numbers<[2], [2], [1], [1], [0, 0, 0, 1, 1, 1], [0], [0]>} : vector<2x8x8xf32>, vector<2x8x8xf32>, vector<2x8x8xf32> -> vector<2x8x8xf32>
    %cst_99 = arith.constant dense<0xFF800000> : vector<2x8xf32>
    %150 = vector.multi_reduction <maximumf>, %149, %cst_99 [2] : vector<2x8x8xf32> to vector<2x8xf32>
    %151 = vector.shape_cast %150 : vector<2x8xf32> to vector<2x8x1xf32>
    %152 = vector.broadcast %151 : vector<2x8x1xf32> to vector<2x8x8xf32>
    %153 = arith.subf %149, %152 : vector<2x8x8xf32>
    %154 = math.exp %153 : vector<2x8x8xf32>
    %cst_100 = arith.constant dense<0.000000e+00> : vector<2x8xf32>
    %155 = vector.multi_reduction <add>, %154, %cst_100 [2] : vector<2x8x8xf32> to vector<2x8xf32>
    %156 = vector.shape_cast %155 : vector<2x8xf32> to vector<2x8x1xf32>
    %157 = vector.broadcast %156 : vector<2x8x1xf32> to vector<2x8x8xf32>
    %158 = arith.divf %154, %157 : vector<2x8x8xf32>
    %159 = arith.addf %144, %158 : vector<2x8x8xf32>
    %cst_101 = arith.constant dense<0.000000e+00> : vector<2x8x8xf32>
    %160 = tpu.matmul %158, %148, %cst_101 {dimension_numbers = #tpu.dot_dimension_numbers<[2], [1], [1], [2], [0, 0, 0, 1, 1, 2], [0], [0]>} : vector<2x8x8xf32>, vector<2x8x8xf32>, vector<2x8x8xf32> -> vector<2x8x8xf32>
    %161 = vector.extract_strided_slice %72 {offsets = [0, 0, 40], sizes = [2, 8, 8], strides = [1, 1, 1]} : vector<2x8x64xf32> to vector<2x8x8xf32>
    %162 = vector.extract_strided_slice %78 {offsets = [0, 0, 40], sizes = [2, 8, 8], strides = [1, 1, 1]} : vector<2x8x64xf32> to vector<2x8x8xf32>
    %163 = vector.extract_strided_slice %84 {offsets = [0, 0, 40], sizes = [2, 8, 8], strides = [1, 1, 1]} : vector<2x8x64xf32> to vector<2x8x8xf32>
    %cst_102 = arith.constant dense<0.000000e+00> : vector<2x8x8xf32>
    %164 = tpu.matmul %161, %162, %cst_102 {dimension_numbers = #tpu.dot_dimension_numbers<[2], [2], [1], [1], [0, 0, 0, 1, 1, 1], [0], [0]>} : vector<2x8x8xf32>, vector<2x8x8xf32>, vector<2x8x8xf32> -> vector<2x8x8xf32>
    %cst_103 = arith.constant dense<0xFF800000> : vector<2x8xf32>
    %165 = vector.multi_reduction <maximumf>, %164, %cst_103 [2] : vector<2x8x8xf32> to vector<2x8xf32>
    %166 = vector.shape_cast %165 : vector<2x8xf32> to vector<2x8x1xf32>
    %167 = vector.broadcast %166 : vector<2x8x1xf32> to vector<2x8x8xf32>
    %168 = arith.subf %164, %167 : vector<2x8x8xf32>
    %169 = math.exp %168 : vector<2x8x8xf32>
    %cst_104 = arith.constant dense<0.000000e+00> : vector<2x8xf32>
    %170 = vector.multi_reduction <add>, %169, %cst_104 [2] : vector<2x8x8xf32> to vector<2x8xf32>
    %171 = vector.shape_cast %170 : vector<2x8xf32> to vector<2x8x1xf32>
    %172 = vector.broadcast %171 : vector<2x8x1xf32> to vector<2x8x8xf32>
    %173 = arith.divf %169, %172 : vector<2x8x8xf32>
    %174 = arith.addf %159, %173 : vector<2x8x8xf32>
    %cst_105 = arith.constant dense<0.000000e+00> : vector<2x8x8xf32>
    %175 = tpu.matmul %173, %163, %cst_105 {dimension_numbers = #tpu.dot_dimension_numbers<[2], [1], [1], [2], [0, 0, 0, 1, 1, 2], [0], [0]>} : vector<2x8x8xf32>, vector<2x8x8xf32>, vector<2x8x8xf32> -> vector<2x8x8xf32>
    %176 = vector.extract_strided_slice %72 {offsets = [0, 0, 48], sizes = [2, 8, 8], strides = [1, 1, 1]} : vector<2x8x64xf32> to vector<2x8x8xf32>
    %177 = vector.extract_strided_slice %78 {offsets = [0, 0, 48], sizes = [2, 8, 8], strides = [1, 1, 1]} : vector<2x8x64xf32> to vector<2x8x8xf32>
    %178 = vector.extract_strided_slice %84 {offsets = [0, 0, 48], sizes = [2, 8, 8], strides = [1, 1, 1]} : vector<2x8x64xf32> to vector<2x8x8xf32>
    %cst_106 = arith.constant dense<0.000000e+00> : vector<2x8x8xf32>
    %179 = tpu.matmul %176, %177, %cst_106 {dimension_numbers = #tpu.dot_dimension_numbers<[2], [2], [1], [1], [0, 0, 0, 1, 1, 1], [0], [0]>} : vector<2x8x8xf32>, vector<2x8x8xf32>, vector<2x8x8xf32> -> vector<2x8x8xf32>
    %cst_107 = arith.constant dense<0xFF800000> : vector<2x8xf32>
    %180 = vector.multi_reduction <maximumf>, %179, %cst_107 [2] : vector<2x8x8xf32> to vector<2x8xf32>
    %181 = vector.shape_cast %180 : vector<2x8xf32> to vector<2x8x1xf32>
    %182 = vector.broadcast %181 : vector<2x8x1xf32> to vector<2x8x8xf32>
    %183 = arith.subf %179, %182 : vector<2x8x8xf32>
    %184 = math.exp %183 : vector<2x8x8xf32>
    %cst_108 = arith.constant dense<0.000000e+00> : vector<2x8xf32>
    %185 = vector.multi_reduction <add>, %184, %cst_108 [2] : vector<2x8x8xf32> to vector<2x8xf32>
    %186 = vector.shape_cast %185 : vector<2x8xf32> to vector<2x8x1xf32>
    %187 = vector.broadcast %186 : vector<2x8x1xf32> to vector<2x8x8xf32>
    %188 = arith.divf %184, %187 : vector<2x8x8xf32>
    %189 = arith.addf %174, %188 : vector<2x8x8xf32>
    %cst_109 = arith.constant dense<0.000000e+00> : vector<2x8x8xf32>
    %190 = tpu.matmul %188, %178, %cst_109 {dimension_numbers = #tpu.dot_dimension_numbers<[2], [1], [1], [2], [0, 0, 0, 1, 1, 2], [0], [0]>} : vector<2x8x8xf32>, vector<2x8x8xf32>, vector<2x8x8xf32> -> vector<2x8x8xf32>
    %191 = vector.extract_strided_slice %72 {offsets = [0, 0, 56], sizes = [2, 8, 8], strides = [1, 1, 1]} : vector<2x8x64xf32> to vector<2x8x8xf32>
    %192 = vector.extract_strided_slice %78 {offsets = [0, 0, 56], sizes = [2, 8, 8], strides = [1, 1, 1]} : vector<2x8x64xf32> to vector<2x8x8xf32>
    %193 = vector.extract_strided_slice %84 {offsets = [0, 0, 56], sizes = [2, 8, 8], strides = [1, 1, 1]} : vector<2x8x64xf32> to vector<2x8x8xf32>
    %cst_110 = arith.constant dense<0.000000e+00> : vector<2x8x8xf32>
    %194 = tpu.matmul %191, %192, %cst_110 {dimension_numbers = #tpu.dot_dimension_numbers<[2], [2], [1], [1], [0, 0, 0, 1, 1, 1], [0], [0]>} : vector<2x8x8xf32>, vector<2x8x8xf32>, vector<2x8x8xf32> -> vector<2x8x8xf32>
    %cst_111 = arith.constant dense<0xFF800000> : vector<2x8xf32>
    %195 = vector.multi_reduction <maximumf>, %194, %cst_111 [2] : vector<2x8x8xf32> to vector<2x8xf32>
    %196 = vector.shape_cast %195 : vector<2x8xf32> to vector<2x8x1xf32>
    %197 = vector.broadcast %196 : vector<2x8x1xf32> to vector<2x8x8xf32>
    %198 = arith.subf %194, %197 : vector<2x8x8xf32>
    %199 = math.exp %198 : vector<2x8x8xf32>
    %cst_112 = arith.constant dense<0.000000e+00> : vector<2x8xf32>
    %200 = vector.multi_reduction <add>, %199, %cst_112 [2] : vector<2x8x8xf32> to vector<2x8xf32>
    %201 = vector.shape_cast %200 : vector<2x8xf32> to vector<2x8x1xf32>
    %202 = vector.broadcast %201 : vector<2x8x1xf32> to vector<2x8x8xf32>
    %203 = arith.divf %199, %202 : vector<2x8x8xf32>
    %204 = arith.addf %189, %203 : vector<2x8x8xf32>
    %cst_113 = arith.constant dense<0.000000e+00> : vector<2x8x8xf32>
    %205 = tpu.matmul %203, %193, %cst_113 {dimension_numbers = #tpu.dot_dimension_numbers<[2], [1], [1], [2], [0, 0, 0, 1, 1, 2], [0], [0]>} : vector<2x8x8xf32>, vector<2x8x8xf32>, vector<2x8x8xf32> -> vector<2x8x8xf32>
    %cst_114 = arith.constant 1.250000e-01 : f32
    %206 = vector.broadcast %cst_114 : f32 to vector<2x8x8xf32>
    %207 = arith.mulf %204, %206 : vector<2x8x8xf32>
    %c0_115 = arith.constant 0 : index
    %c0_116 = arith.constant 0 : index
    %c0_117 = arith.constant 0 : index
    %208 = vector.load %arg44[%c0_115, %c0_116, %c0_117] : memref<2x8x8xf32, #tpu.memory_space<vmem>>, vector<2x8x8xf32>
    tpu.vector_store %arg44[%c0_115, %c0_116, %c0_117], %207 {strides = array<i32>} : memref<2x8x8xf32, #tpu.memory_space<vmem>>, vector<2x8x8xf32>,
    %209 = tpu.concatenate %100, %115, %130, %145, %160, %175, %190, %205 in 2 : vector<2x8x8xf32>, vector<2x8x8xf32>, vector<2x8x8xf32>, vector<2x8x8xf32>, vector<2x8x8xf32>, vector<2x8x8xf32>, vector<2x8x8xf32>, vector<2x8x8xf32> -> vector<2x8x64xf32>
    %210 = vector.shape_cast %209 : vector<2x8x64xf32> to vector<16x64xf32>
    %c0_118 = arith.constant 0 : index
    %c0_119 = arith.constant 0 : index
    %211 = vector.load %arg29[%c0_118, %c0_119] : memref<64x64xf32, #tpu.memory_space<vmem>>, vector<64x64xf32>
    %cst_120 = arith.constant dense<0.000000e+00> : vector<16x64xf32>
    %212 = tpu.matmul %210, %211, %cst_120 {dimension_numbers = #tpu.dot_dimension_numbers<[1], [0], [0], [1], [0, 0, 1, 1], [], []>} : vector<16x64xf32>, vector<64x64xf32>, vector<16x64xf32> -> vector<16x64xf32>
    %c0_121 = arith.constant 0 : index
    %c0_122 = arith.constant 0 : index
    %213 = vector.load %arg30[%c0_121, %c0_122] : memref<1x64xf32, #tpu.memory_space<vmem>>, vector<1x64xf32>
    %214 = vector.broadcast %213 : vector<1x64xf32> to vector<16x64xf32>
    %215 = arith.addf %212, %214 : vector<16x64xf32>
    %216 = arith.addf %66, %215 : vector<16x64xf32>
    %cst_123 = arith.constant dense<0.000000e+00> : vector<16xf32>
    %217 = vector.multi_reduction <add>, %216, %cst_123 [1] : vector<16x64xf32> to vector<16xf32>
    %218 = vector.shape_cast %217 : vector<16xf32> to vector<16x1xf32>
    %cst_124 = arith.constant 6.400000e+01 : f32
    %219 = vector.broadcast %cst_124 : f32 to vector<16x1xf32>
    %220 = arith.divf %218, %219 : vector<16x1xf32>
    %221 = vector.broadcast %220 : vector<16x1xf32> to vector<16x64xf32>
    %222 = arith.subf %216, %221 : vector<16x64xf32>
    %223 = arith.mulf %222, %222 : vector<16x64xf32>
    %cst_125 = arith.constant dense<0.000000e+00> : vector<16xf32>
    %224 = vector.multi_reduction <add>, %223, %cst_125 [1] : vector<16x64xf32> to vector<16xf32>
    %225 = vector.shape_cast %224 : vector<16xf32> to vector<16x1xf32>
    %cst_126 = arith.constant 6.400000e+01 : f32
    %226 = vector.broadcast %cst_126 : f32 to vector<16x1xf32>
    %227 = arith.divf %225, %226 : vector<16x1xf32>
    %228 = vector.broadcast %220 : vector<16x1xf32> to vector<16x64xf32>
    %229 = arith.subf %216, %228 : vector<16x64xf32>
    %cst_127 = arith.constant 9.99999974E-6 : f32
    %230 = vector.broadcast %cst_127 : f32 to vector<16x1xf32>
    %231 = arith.addf %227, %230 : vector<16x1xf32>
    %232 = math.rsqrt %231 : vector<16x1xf32>
    %233 = vector.broadcast %232 : vector<16x1xf32> to vector<16x64xf32>
    %234 = arith.mulf %229, %233 : vector<16x64xf32>
    %c0_128 = arith.constant 0 : index
    %c0_129 = arith.constant 0 : index
    %235 = vector.load %arg31[%c0_128, %c0_129] : memref<1x64xf32, #tpu.memory_space<vmem>>, vector<1x64xf32>
    %236 = vector.broadcast %235 : vector<1x64xf32> to vector<16x64xf32>
    %237 = arith.mulf %234, %236 : vector<16x64xf32>
    %c0_130 = arith.constant 0 : index
    %c0_131 = arith.constant 0 : index
    %238 = vector.load %arg32[%c0_130, %c0_131] : memref<1x64xf32, #tpu.memory_space<vmem>>, vector<1x64xf32>
    %239 = vector.broadcast %238 : vector<1x64xf32> to vector<16x64xf32>
    %240 = arith.addf %237, %239 : vector<16x64xf32>
    %241 = arith.truncf %240 : vector<16x64xf32> to vector<16x64xbf16>
    %c0_132 = arith.constant 0 : index
    %c0_133 = arith.constant 0 : index
    %242 = vector.load %arg35[%c0_132, %c0_133] : memref<64x2048xbf16, #tpu.memory_space<vmem>>, vector<64x2048xbf16>
    %cst_134 = arith.constant dense<0.000000e+00> : vector<16x2048xf32>
    %243 = tpu.matmul %241, %242, %cst_134 {dimension_numbers = #tpu.dot_dimension_numbers<[1], [0], [0], [1], [0, 0, 1, 1], [], []>} : vector<16x64xbf16>, vector<64x2048xbf16>, vector<16x2048xf32> -> vector<16x2048xf32>
    %c0_135 = arith.constant 0 : index
    %c0_136 = arith.constant 0 : index
    %244 = vector.load %arg36[%c0_135, %c0_136] : memref<1x2048xf32, #tpu.memory_space<vmem>>, vector<1x2048xf32>
    %245 = vector.broadcast %244 : vector<1x2048xf32> to vector<16x2048xf32>
    %246 = arith.addf %243, %245 : vector<16x2048xf32>
    %cst_137 = arith.constant 0.000000e+00 : f32
    %247 = vector.broadcast %cst_137 : f32 to vector<16x2048xf32>
    %248 = arith.maximumf %246, %247 : vector<16x2048xf32>
    %249 = arith.truncf %248 : vector<16x2048xf32> to vector<16x2048xbf16>
    %c0_138 = arith.constant 0 : index
    %c0_139 = arith.constant 0 : index
    %250 = vector.load %arg37[%c0_138, %c0_139] : memref<2048x64xbf16, #tpu.memory_space<vmem>>, vector<2048x64xbf16>
    %cst_140 = arith.constant dense<0.000000e+00> : vector<16x64xf32>
    %251 = tpu.matmul %249, %250, %cst_140 {dimension_numbers = #tpu.dot_dimension_numbers<[1], [0], [0], [1], [0, 0, 1, 1], [], []>} : vector<16x2048xbf16>, vector<2048x64xbf16>, vector<16x64xf32> -> vector<16x64xf32>
    %c0_141 = arith.constant 0 : index
    %c0_142 = arith.constant 0 : index
    %252 = vector.load %arg38[%c0_141, %c0_142] : memref<1x64xf32, #tpu.memory_space<vmem>>, vector<1x64xf32>
    %253 = vector.broadcast %252 : vector<1x64xf32> to vector<16x64xf32>
    %254 = arith.addf %251, %253 : vector<16x64xf32>
    %255 = arith.addf %240, %254 : vector<16x64xf32>
    %cst_143 = arith.constant dense<0.000000e+00> : vector<16xf32>
    %256 = vector.multi_reduction <add>, %255, %cst_143 [1] : vector<16x64xf32> to vector<16xf32>
    %257 = vector.shape_cast %256 : vector<16xf32> to vector<16x1xf32>
    %cst_144 = arith.constant 6.400000e+01 : f32
    %258 = vector.broadcast %cst_144 : f32 to vector<16x1xf32>
    %259 = arith.divf %257, %258 : vector<16x1xf32>
    %260 = vector.broadcast %259 : vector<16x1xf32> to vector<16x64xf32>
    %261 = arith.subf %255, %260 : vector<16x64xf32>
    %262 = arith.mulf %261, %261 : vector<16x64xf32>
    %cst_145 = arith.constant dense<0.000000e+00> : vector<16xf32>
    %263 = vector.multi_reduction <add>, %262, %cst_145 [1] : vector<16x64xf32> to vector<16xf32>
    %264 = vector.shape_cast %263 : vector<16xf32> to vector<16x1xf32>
    %cst_146 = arith.constant 6.400000e+01 : f32
    %265 = vector.broadcast %cst_146 : f32 to vector<16x1xf32>
    %266 = arith.divf %264, %265 : vector<16x1xf32>
    %267 = vector.broadcast %259 : vector<16x1xf32> to vector<16x64xf32>
    %268 = arith.subf %255, %267 : vector<16x64xf32>
    %cst_147 = arith.constant 9.99999974E-6 : f32
    %269 = vector.broadcast %cst_147 : f32 to vector<16x1xf32>
    %270 = arith.addf %266, %269 : vector<16x1xf32>
    %271 = math.rsqrt %270 : vector<16x1xf32>
    %272 = vector.broadcast %271 : vector<16x1xf32> to vector<16x64xf32>
    %273 = arith.mulf %268, %272 : vector<16x64xf32>
    %c0_148 = arith.constant 0 : index
    %c0_149 = arith.constant 0 : index
    %274 = vector.load %arg33[%c0_148, %c0_149] : memref<1x64xf32, #tpu.memory_space<vmem>>, vector<1x64xf32>
    %275 = vector.broadcast %274 : vector<1x64xf32> to vector<16x64xf32>
    %276 = arith.mulf %273, %275 : vector<16x64xf32>
    %c0_150 = arith.constant 0 : index
    %c0_151 = arith.constant 0 : index
    %277 = vector.load %arg34[%c0_150, %c0_151] : memref<1x64xf32, #tpu.memory_space<vmem>>, vector<1x64xf32>
    %278 = vector.broadcast %277 : vector<1x64xf32> to vector<16x64xf32>
    %279 = arith.addf %276, %278 : vector<16x64xf32>
    %c0_152 = arith.constant 0 : index
    %c0_153 = arith.constant 0 : index
    %280 = vector.load %arg5[%c0_152, %c0_153] : memref<16x1xf32, #tpu.memory_space<vmem>>, vector<16x1xf32>
    %281 = vector.broadcast %280 : vector<16x1xf32> to vector<16x64xf32>
    %282 = arith.addf %279, %281 : vector<16x64xf32>
    %c0_154 = arith.constant 0 : index
    %c0_155 = arith.constant 0 : index
    %283 = vector.load %arg39[%c0_154, %c0_155] : memref<64x32xf32, #tpu.memory_space<vmem>>, vector<64x32xf32>
    %cst_156 = arith.constant dense<0.000000e+00> : vector<16x32xf32>
    %284 = tpu.matmul %282, %283, %cst_156 {dimension_numbers = #tpu.dot_dimension_numbers<[1], [0], [0], [1], [0, 0, 1, 1], [], []>} : vector<16x64xf32>, vector<64x32xf32>, vector<16x32xf32> -> vector<16x32xf32>
    %c0_157 = arith.constant 0 : index
    %c0_158 = arith.constant 0 : index
    %285 = vector.load %arg40[%c0_157, %c0_158] : memref<1x32xf32, #tpu.memory_space<vmem>>, vector<1x32xf32>
    %286 = vector.broadcast %285 : vector<1x32xf32> to vector<16x32xf32>
    %287 = arith.addf %284, %286 : vector<16x32xf32>
    %288 = arith.negf %287 : vector<16x32xf32>
    %289 = math.exp %288 : vector<16x32xf32>
    %cst_159 = arith.constant 1.000000e+00 : f32
    %290 = vector.broadcast %cst_159 : f32 to vector<16x32xf32>
    %291 = arith.addf %290, %289 : vector<16x32xf32>
    %292 = arith.divf %290, %291 : vector<16x32xf32>
    %c0_160 = arith.constant 0 : index
    %c0_161 = arith.constant 0 : index
    %293 = vector.load %arg41[%c0_160, %c0_161] : memref<32x1xf32, #tpu.memory_space<vmem>>, vector<32x1xf32>
    %cst_162 = arith.constant dense<0.000000e+00> : vector<16x1xf32>
    %294 = tpu.matmul %292, %293, %cst_162 {dimension_numbers = #tpu.dot_dimension_numbers<[1], [0], [0], [1], [0, 0, 1, 1], [], []>} : vector<16x32xf32>, vector<32x1xf32>, vector<16x1xf32> -> vector<16x1xf32>
    %c0_163 = arith.constant 0 : index
    %c0_164 = arith.constant 0 : index
    %295 = vector.load %arg42[%c0_163, %c0_164] : memref<1x1xf32, #tpu.memory_space<vmem>>, vector<1x1xf32>
    %296 = vector.broadcast %295 : vector<1x1xf32> to vector<16x1xf32>
    %297 = arith.addf %294, %296 : vector<16x1xf32>
    %cst_165 = arith.constant 8.000000e+01 : f32
    %298 = vector.broadcast %cst_165 : f32 to vector<16x1xf32>
    %299 = arith.minimumf %297, %298 : vector<16x1xf32>
    %c0_166 = arith.constant 0 : index
    %c0_167 = arith.constant 0 : index
    %300 = vector.load %arg43[%c0_166, %c0_167] : memref<16x1xf32, #tpu.memory_space<vmem>>, vector<16x1xf32>
    tpu.vector_store %arg43[%c0_166, %c0_167], %299 {strides = array<i32>} : memref<16x1xf32, #tpu.memory_space<vmem>>, vector<16x1xf32>,
    return
  }
  func.func @transform_0(%arg0: i32) -> (i32, i32) {
    %c0_i32 = arith.constant 0 : i32
    %c0_i32_0 = arith.constant 0 : i32
    return %arg0, %c0_i32 : i32, i32
  }
  func.func @transform_1(%arg0: i32) -> (i32, i32) {
    %c0_i32 = arith.constant 0 : i32
    %c0_i32_0 = arith.constant 0 : i32
    return %arg0, %c0_i32 : i32, i32
  }
  func.func @transform_2(%arg0: i32) -> (i32, i32) {
    %c0_i32 = arith.constant 0 : i32
    %c0_i32_0 = arith.constant 0 : i32
    return %arg0, %c0_i32 : i32, i32
  }
  func.func @transform_3(%arg0: i32) -> (i32, i32) {
    %c0_i32 = arith.constant 0 : i32
    %c0_i32_0 = arith.constant 0 : i32
    return %arg0, %c0_i32 : i32, i32
  }
  func.func @transform_4(%arg0: i32) -> (i32, i32) {
    %c0_i32 = arith.constant 0 : i32
    %c0_i32_0 = arith.constant 0 : i32
    return %arg0, %c0_i32 : i32, i32
  }
  func.func @transform_5(%arg0: i32) -> (i32, i32) {
    %c0_i32 = arith.constant 0 : i32
    %c0_i32_0 = arith.constant 0 : i32
    %c0_i32_1 = arith.constant 0 : i32
    return %c0_i32, %c0_i32_0 : i32, i32
  }
  func.func @transform_6(%arg0: i32) -> (i32, i32) {
    %c0_i32 = arith.constant 0 : i32
    %c0_i32_0 = arith.constant 0 : i32
    %c0_i32_1 = arith.constant 0 : i32
    return %c0_i32, %c0_i32_0 : i32, i32
  }
  func.func @transform_7(%arg0: i32) -> (i32, i32) {
    %c0_i32 = arith.constant 0 : i32
    %c0_i32_0 = arith.constant 0 : i32
    %c0_i32_1 = arith.constant 0 : i32
    return %c0_i32, %c0_i32_0 : i32, i32
  }
  func.func @transform_8(%arg0: i32) -> (i32, i32) {
    %c0_i32 = arith.constant 0 : i32
    %c0_i32_0 = arith.constant 0 : i32
    %c0_i32_1 = arith.constant 0 : i32
    return %c0_i32, %c0_i32_0 : i32, i32
  }
  func.func @transform_9(%arg0: i32) -> (i32, i32) {
    %c0_i32 = arith.constant 0 : i32
    %c0_i32_0 = arith.constant 0 : i32
    %c0_i32_1 = arith.constant 0 : i32
    return %c0_i32, %c0_i32_0 : i32, i32
  }
  func.func @transform_10(%arg0: i32) -> (i32, i32) {
    %c0_i32 = arith.constant 0 : i32
    %c0_i32_0 = arith.constant 0 : i32
    %c0_i32_1 = arith.constant 0 : i32
    return %c0_i32, %c0_i32_0 : i32, i32
  }
  func.func @transform_11(%arg0: i32) -> (i32, i32) {
    %c0_i32 = arith.constant 0 : i32
    %c0_i32_0 = arith.constant 0 : i32
    %c0_i32_1 = arith.constant 0 : i32
    return %c0_i32, %c0_i32_0 : i32, i32
  }
  func.func @transform_12(%arg0: i32) -> (i32, i32) {
    %c0_i32 = arith.constant 0 : i32
    %c0_i32_0 = arith.constant 0 : i32
    %c0_i32_1 = arith.constant 0 : i32
    return %c0_i32, %c0_i32_0 : i32, i32
  }
  func.func @transform_13(%arg0: i32) -> (i32, i32) {
    %c0_i32 = arith.constant 0 : i32
    %c0_i32_0 = arith.constant 0 : i32
    %c0_i32_1 = arith.constant 0 : i32
    return %c0_i32, %c0_i32_0 : i32, i32
  }
  func.func @transform_14(%arg0: i32) -> (i32, i32) {
    %c0_i32 = arith.constant 0 : i32
    %c0_i32_0 = arith.constant 0 : i32
    %c0_i32_1 = arith.constant 0 : i32
    return %c0_i32, %c0_i32_0 : i32, i32
  }
  func.func @transform_15(%arg0: i32) -> (i32, i32) {
    %c0_i32 = arith.constant 0 : i32
    %c0_i32_0 = arith.constant 0 : i32
    %c0_i32_1 = arith.constant 0 : i32
    return %c0_i32, %c0_i32_0 : i32, i32
  }
  func.func @transform_16(%arg0: i32) -> (i32, i32) {
    %c0_i32 = arith.constant 0 : i32
    %c0_i32_0 = arith.constant 0 : i32
    %c0_i32_1 = arith.constant 0 : i32
    return %c0_i32, %c0_i32_0 : i32, i32
  }
  func.func @transform_17(%arg0: i32) -> (i32, i32) {
    %c0_i32 = arith.constant 0 : i32
    %c0_i32_0 = arith.constant 0 : i32
    %c0_i32_1 = arith.constant 0 : i32
    return %c0_i32, %c0_i32_0 : i32, i32
  }
  func.func @transform_18(%arg0: i32) -> (i32, i32) {
    %c0_i32 = arith.constant 0 : i32
    %c0_i32_0 = arith.constant 0 : i32
    %c0_i32_1 = arith.constant 0 : i32
    return %c0_i32, %c0_i32_0 : i32, i32
  }
  func.func @transform_19(%arg0: i32) -> (i32, i32) {
    %c0_i32 = arith.constant 0 : i32
    %c0_i32_0 = arith.constant 0 : i32
    %c0_i32_1 = arith.constant 0 : i32
    return %c0_i32, %c0_i32_0 : i32, i32
  }
  func.func @transform_20(%arg0: i32) -> (i32, i32) {
    %c0_i32 = arith.constant 0 : i32
    %c0_i32_0 = arith.constant 0 : i32
    %c0_i32_1 = arith.constant 0 : i32
    return %c0_i32, %c0_i32_0 : i32, i32
  }
  func.func @transform_21(%arg0: i32) -> (i32, i32) {
    %c0_i32 = arith.constant 0 : i32
    %c0_i32_0 = arith.constant 0 : i32
    %c0_i32_1 = arith.constant 0 : i32
    return %c0_i32, %c0_i32_0 : i32, i32
  }
  func.func @transform_22(%arg0: i32) -> (i32, i32) {
    %c0_i32 = arith.constant 0 : i32
    %c0_i32_0 = arith.constant 0 : i32
    %c0_i32_1 = arith.constant 0 : i32
    return %c0_i32, %c0_i32_0 : i32, i32
  }
  func.func @transform_23(%arg0: i32) -> (i32, i32) {
    %c0_i32 = arith.constant 0 : i32
    %c0_i32_0 = arith.constant 0 : i32
    %c0_i32_1 = arith.constant 0 : i32
    return %c0_i32, %c0_i32_0 : i32, i32
  }
  func.func @transform_24(%arg0: i32) -> (i32, i32) {
    %c0_i32 = arith.constant 0 : i32
    %c0_i32_0 = arith.constant 0 : i32
    %c0_i32_1 = arith.constant 0 : i32
    return %c0_i32, %c0_i32_0 : i32, i32
  }
  func.func @transform_25(%arg0: i32) -> (i32, i32) {
    %c0_i32 = arith.constant 0 : i32
    %c0_i32_0 = arith.constant 0 : i32
    %c0_i32_1 = arith.constant 0 : i32
    return %c0_i32, %c0_i32_0 : i32, i32
  }
  func.func @transform_26(%arg0: i32) -> (i32, i32) {
    %c0_i32 = arith.constant 0 : i32
    %c0_i32_0 = arith.constant 0 : i32
    %c0_i32_1 = arith.constant 0 : i32
    return %c0_i32, %c0_i32_0 : i32, i32
  }
  func.func @transform_27(%arg0: i32) -> (i32, i32) {
    %c0_i32 = arith.constant 0 : i32
    %c0_i32_0 = arith.constant 0 : i32
    %c0_i32_1 = arith.constant 0 : i32
    return %c0_i32, %c0_i32_0 : i32, i32
  }
  func.func @transform_28(%arg0: i32) -> (i32, i32) {
    %c0_i32 = arith.constant 0 : i32
    %c0_i32_0 = arith.constant 0 : i32
    %c0_i32_1 = arith.constant 0 : i32
    return %c0_i32, %c0_i32_0 : i32, i32
  }
  func.func @transform_29(%arg0: i32) -> (i32, i32) {
    %c0_i32 = arith.constant 0 : i32
    %c0_i32_0 = arith.constant 0 : i32
    %c0_i32_1 = arith.constant 0 : i32
    return %c0_i32, %c0_i32_0 : i32, i32
  }
  func.func @transform_30(%arg0: i32) -> (i32, i32) {
    %c0_i32 = arith.constant 0 : i32
    %c0_i32_0 = arith.constant 0 : i32
    %c0_i32_1 = arith.constant 0 : i32
    return %c0_i32, %c0_i32_0 : i32, i32
  }
  func.func @transform_31(%arg0: i32) -> (i32, i32) {
    %c0_i32 = arith.constant 0 : i32
    %c0_i32_0 = arith.constant 0 : i32
    %c0_i32_1 = arith.constant 0 : i32
    return %c0_i32, %c0_i32_0 : i32, i32
  }
  func.func @transform_32(%arg0: i32) -> (i32, i32) {
    %c0_i32 = arith.constant 0 : i32
    %c0_i32_0 = arith.constant 0 : i32
    %c0_i32_1 = arith.constant 0 : i32
    return %c0_i32, %c0_i32_0 : i32, i32
  }
  func.func @transform_33(%arg0: i32) -> (i32, i32) {
    %c0_i32 = arith.constant 0 : i32
    %c0_i32_0 = arith.constant 0 : i32
    %c0_i32_1 = arith.constant 0 : i32
    return %c0_i32, %c0_i32_0 : i32, i32
  }
  func.func @transform_34(%arg0: i32) -> (i32, i32) {
    %c0_i32 = arith.constant 0 : i32
    %c0_i32_0 = arith.constant 0 : i32
    %c0_i32_1 = arith.constant 0 : i32
    return %c0_i32, %c0_i32_0 : i32, i32
  }
  func.func @transform_35(%arg0: i32) -> (i32, i32) {
    %c0_i32 = arith.constant 0 : i32
    %c0_i32_0 = arith.constant 0 : i32
    %c0_i32_1 = arith.constant 0 : i32
    return %c0_i32, %c0_i32_0 : i32, i32
  }
  func.func @transform_36(%arg0: i32) -> (i32, i32) {
    %c0_i32 = arith.constant 0 : i32
    %c0_i32_0 = arith.constant 0 : i32
    %c0_i32_1 = arith.constant 0 : i32
    return %c0_i32, %c0_i32_0 : i32, i32
  }
  func.func @transform_37(%arg0: i32) -> (i32, i32) {
    %c0_i32 = arith.constant 0 : i32
    %c0_i32_0 = arith.constant 0 : i32
    %c0_i32_1 = arith.constant 0 : i32
    return %c0_i32, %c0_i32_0 : i32, i32
  }
  func.func @transform_38(%arg0: i32) -> (i32, i32) {
    %c0_i32 = arith.constant 0 : i32
    %c0_i32_0 = arith.constant 0 : i32
    %c0_i32_1 = arith.constant 0 : i32
    return %c0_i32, %c0_i32_0 : i32, i32
  }
  func.func @transform_39(%arg0: i32) -> (i32, i32) {
    %c0_i32 = arith.constant 0 : i32
    %c0_i32_0 = arith.constant 0 : i32
    %c0_i32_1 = arith.constant 0 : i32
    return %c0_i32, %c0_i32_0 : i32, i32
  }
  func.func @transform_40(%arg0: i32) -> (i32, i32) {
    %c0_i32 = arith.constant 0 : i32
    %c0_i32_0 = arith.constant 0 : i32
    %c0_i32_1 = arith.constant 0 : i32
    return %c0_i32, %c0_i32_0 : i32, i32
  }
  func.func @transform_41(%arg0: i32) -> (i32, i32) {
    %c0_i32 = arith.constant 0 : i32
    %c0_i32_0 = arith.constant 0 : i32
    %c0_i32_1 = arith.constant 0 : i32
    return %c0_i32, %c0_i32_0 : i32, i32
  }
  func.func @transform_42(%arg0: i32) -> (i32, i32) {
    %c0_i32 = arith.constant 0 : i32
    %c0_i32_0 = arith.constant 0 : i32
    return %arg0, %c0_i32 : i32, i32
  }
  func.func @transform_43(%arg0: i32) -> (i32, i32, i32) {
    %c0_i32 = arith.constant 0 : i32
    %c0_i32_0 = arith.constant 0 : i32
    %c0_i32_1 = arith.constant 0 : i32
    return %arg0, %c0_i32, %c0_i32_0 : i32, i32, i32
  }
}

</mosaic_0001>

<bundles_post_ra>
// kernel: tpu_custom_call.1
= control target key start
LH: loop header
LB: loop body
LE: loop exit
PB: predicated region body
PF: predicated region fallthrough
CT: control target
= control target key end

     0   :  { %s8128_s6 = smov 1   ;;  %s8129_s10 = smov 2   ;;  %s9348_s0 = inlined_call_operand.smem [shape: u32[44], index: -1, kind: input, shape index: {}] }
   0x1   :  { %s8200_s5 = sld [smem:[%s9348_s0]]   ;;  %s8130_s14 = smov 3  }
   0x2   :  { %s8205_s9 = sld [smem:[%s9348_s0 + %s8128_s6]]   ;;  %s8131_s18 = smov 4  }
   0x3   :  { %s8210_s13 = sld [smem:[%s9348_s0 + %s8129_s10]]   ;;  %s8132_s22 = smov 5  }
   0x4   :  { %s8215_s17 = sld [smem:[%s9348_s0 + %s8130_s14]]   ;;  %s8133_s26 = smov 6  }
   0x5   :  { %s8220_s21 = sld [smem:[%s9348_s0 + %s8131_s18]]   ;;  %s8134_s30 = smov 7  }
   0x6   :  { %s8225_s25 = sld [smem:[%s9348_s0 + %s8132_s22]]   ;;  %s8135_s4 = smov 8  }
   0x7   :  { %s8230_s29 = sld [smem:[%s9348_s0 + %s8133_s26]]   ;;  %s8136_s10 = smov 9  }
   0x8   :  { %s8235_s3 = sld [smem:[%s9348_s0 + %s8134_s30]]   ;;  %s8137_s15 = smov 10  }
   0x9   :  { %s8240_s8 = sld [smem:[%s9348_s0 + %s8135_s4]]   ;;  %s8138_s20 = smov 11  }
   0xa   :  { %s8245_s14 = sld [smem:[%s9348_s0 + %s8136_s10]]   ;;  %s8139_s26 = smov 12  }
   0xb   :  { %9360 = sst [smem:[#allocation7_spill]] %s8220_s21  ;;  %s8140_s1 = smov 13  }
   0xc   :  { %s8250_s19 = sld [smem:[%s9348_s0 + %s8137_s15]]   ;;  %s8141_s7 = smov 14  }
   0xd   :  { %s8255_s24 = sld [smem:[%s9348_s0 + %s8138_s20]]   ;;  %s8142_s15 = smov 15  }
   0xe   :  { %s8260_s30 = sld [smem:[%s9348_s0 + %s8139_s26]]   ;;  %s8143_s22 = smov 16  }
   0xf   :  { %s8265_s6 = sld [smem:[%s9348_s0 + %s8140_s1]]   ;;  %s8144_s28 = smov 17  }
  0x10   :  { %s8270_s12 = sld [smem:[%s9348_s0 + %s8141_s7]]   ;;  %s8145_s7 = smov 18  }
  0x11   :  { %s8275_s20 = sld [smem:[%s9348_s0 + %s8142_s15]]   ;;  %s8146_s15 = smov 19  }
  0x12   :  { %s8280_s27 = sld [smem:[%s9348_s0 + %s8143_s22]]   ;;  %s8147_s22 = smov 20  }
  0x13   :  { %s8285_s4 = sld [smem:[%s9348_s0 + %s8144_s28]]   ;;  %s8148_s28 = smov 21  }
  0x14   :  { %9361 = sst [smem:[#allocation8_spill]] %s8260_s30  ;;  %s8169_s10 = smov 42  }
  0x15   :  { %s8290_s21 = sld [smem:[%s9348_s0 + %s8145_s7]]   ;;  %s8149_s7 = smov 22  }
  0x16   :  { %s8295_s30 = sld [smem:[%s9348_s0 + %s8146_s15]]   ;;  %s8150_s15 = smov 23  }
  0x17   :  { %9362 = sst [smem:[#allocation9_spill]] %s8275_s20  ;;  %s8170_s16 = smov 43  }
  0x18   :  { %9363 = sst [smem:[#allocation10_spill]] %s8280_s27 }
  0x19   :  { %s8300_s27 = sld [smem:[%s9348_s0 + %s8147_s22]]   ;;  %s8151_s22 = smov 24  }
  0x1a   :  { %s8305_s20 = sld [smem:[%s9348_s0 + %s8148_s28]]   ;;  %s8152_s28 = smov 25  }
  0x1b   :  { %9364 = sst [smem:[#allocation11_spill]] %s8290_s21 }
  0x1c   :  { %9365 = sst [smem:[#allocation12_spill]] %s8295_s30 }
  0x1d   :  { %s8310_s21 = sld [smem:[%s9348_s0 + %s8149_s7]]   ;;  %s8153_s7 = smov 26  }
  0x1e   :  { %s8315_s30 = sld [smem:[%s9348_s0 + %s8150_s15]]   ;;  %s8154_s15 = smov 27  }
  0x1f   :  { %9366 = sst [smem:[#allocation13_spill]] %s8300_s27 }
  0x20   :  { %9367 = sst [smem:[#allocation14_spill]] %s8305_s20 }
  0x21   :  { %s8320_s27 = sld [smem:[%s9348_s0 + %s8151_s22]]   ;;  %s8155_s22 = smov 28  }
  0x22   :  { %s8325_s20 = sld [smem:[%s9348_s0 + %s8152_s28]]   ;;  %s8156_s28 = smov 29  }
  0x23   :  { %9368 = sst [smem:[#allocation15_spill]] %s8310_s21 }
  0x24   :  { %9369 = sst [smem:[#allocation16_spill]] %s8315_s30 }
  0x25   :  { %s8330_s21 = sld [smem:[%s9348_s0 + %s8153_s7]]   ;;  %s8157_s7 = smov 30  }
  0x26   :  { %s8335_s30 = sld [smem:[%s9348_s0 + %s8154_s15]]   ;;  %s8158_s15 = smov 31  }
  0x27   :  { %9370 = sst [smem:[#allocation17_spill]] %s8320_s27 }
  0x28   :  { %9371 = sst [smem:[#allocation18_spill]] %s8325_s20 }
  0x29   :  { %s8340_s27 = sld [smem:[%s9348_s0 + %s8155_s22]]   ;;  %s8159_s22 = smov 32  }
  0x2a   :  { %s8345_s20 = sld [smem:[%s9348_s0 + %s8156_s28]]   ;;  %s8160_s28 = smov 33  }
  0x2b   :  { %9372 = sst [smem:[#allocation19_spill]] %s8330_s21 }
  0x2c   :  { %9373 = sst [smem:[#allocation20_spill]] %s8335_s30 }
  0x2d   :  { %s8350_s21 = sld [smem:[%s9348_s0 + %s8157_s7]]   ;;  %s8161_s7 = smov 34  }
  0x2e   :  { %s8355_s30 = sld [smem:[%s9348_s0 + %s8158_s15]]   ;;  %s8162_s15 = smov 35  }
  0x2f   :  { %9374 = sst [smem:[#allocation21_spill]] %s8340_s27 }
  0x30   :  { %9375 = sst [smem:[#allocation22_spill]] %s8345_s20 }
  0x31   :  { %s8360_s27 = sld [smem:[%s9348_s0 + %s8159_s22]]   ;;  %s8163_s22 = smov 36  }
  0x32   :  { %s8365_s20 = sld [smem:[%s9348_s0 + %s8160_s28]]   ;;  %s8164_s28 = smov 37  }
  0x33   :  { %9376 = sst [smem:[#allocation23_spill]] %s8350_s21 }
  0x34   :  { %9377 = sst [smem:[#allocation24_spill]] %s8355_s30 }
  0x35   :  { %s8370_s21 = sld [smem:[%s9348_s0 + %s8161_s7]]   ;;  %s8165_s7 = smov 38  }
  0x36   :  { %s8375_s30 = sld [smem:[%s9348_s0 + %s8162_s15]]   ;;  %s8166_s15 = smov 39  }
  0x37   :  { %9378 = sst [smem:[#allocation25_spill]] %s8360_s27 }
  0x38   :  { %9379 = sst [smem:[#allocation26_spill]] %s8365_s20 }
  0x39   :  { %s8380_s27 = sld [smem:[%s9348_s0 + %s8163_s22]]   ;;  %s8167_s22 = smov 40  }
  0x3a   :  { %s8385_s20 = sld [smem:[%s9348_s0 + %s8164_s28]]   ;;  %s8168_s28 = smov 41  }
  0x3b   :  { %9380 = sst [smem:[#allocation27_spill]] %s8370_s21 }
  0x3c   :  { %9381 = sst [smem:[#allocation28_spill]] %s8375_s30 }
  0x3d   :  { %s8390_s21 = sld [smem:[%s9348_s0 + %s8165_s7]]  }
  0x3e   :  { %s8395_s30 = sld [smem:[%s9348_s0 + %s8166_s15]]  }
  0x3f   :  { %9382 = sst [smem:[#allocation29_spill]] %s8380_s27 }
  0x40   :  { %9383 = sst [smem:[#allocation30_spill]] %s8385_s20 }
  0x41   :  { %s8400_s27 = sld [smem:[%s9348_s0 + %s8167_s22]]  }
  0x42   :  { %s6804_s20 = sld [smem:[%s9348_s0 + %s8168_s28]]  }
  0x43   :  { %9384 = sst [smem:[#allocation31_spill]] %s8390_s21 }
  0x44   :  { %9385 = sst [smem:[#allocation32_spill]] %s8395_s30 }
  0x45   :  { %s8408_s21 = sld [smem:[%s9348_s0 + %s8169_s10]]  }
  0x46   :  { %s8413_s30 = sld [smem:[%s9348_s0 + %s8170_s16]]  }
  0x48   :  { %v93_v0 = vstv %s6804_s20 }
  0x49   :  { %94 = vst [vmem:[#allocation3] sm:$0x1] %v93_v0 }
  0x4a   :  { %v182_v1 = vld [vmem:[%s8225_s25] sm:$0x1f]  ;;  %vm194_vm0 = vcmask 1044480   ;;  %vm190_vm1 = vcmask 39936   ;;  %v8171_v2 = vmov 0.0   ;;  %vm8172_vm2 = vmmov 0  }
  0x4b   :  { %7475 = vmatprep.subr.mxu0 %v8171_v2  ;;  %7477 = vmatprep.mubr.msk.f32.mxu0 %vm8172_vm2, %v8171_v2  ;;  %v181_v3 = vld [vmem:[%s8200_s5] sm:$0x3]  ;;  %v386_v4 = vld [vmem:[%s8245_s14 + $0xf8] sm:$0xff]  ;;  %v385_v6 = vld [vmem:[%s8245_s14 + $0xf0] sm:$0xff]  ;;  %v8173_v30 = vmov 1983009808   ;;  %v405_v32 = vlaneseq }
  0x4c   :  { %v370_v5 = vld [vmem:[%s8245_s14 + $0x78] sm:$0xff]  ;;  %7476 = vmatpush3.msk.msra.mxu0 %vm194_vm0, %v182_v1  ;;  %7480 = vmatprep.subr.mxu1 %v8171_v2  ;;  %v369_v7 = vld [vmem:[%s8245_s14 + $0x70] sm:$0xff]  ;;  %v384_v8 = vld [vmem:[%s8245_s14 + $0xe8] sm:$0xff]  ;;  %v403_v31 = vunpack.c.l.s4 %v8173_v30  ;;  %vm672_vm3 = vcmask 1045504   ;;  %vm668_vm4 = vcmask 244736  }
  0x4d   :  { %7478 = vmatmul.mubr.msk.f32.vlgmr.msra.gmra.mxu0 %vm190_vm1, %v181_v3  ;;  %7109 = vmatprep.subr.mxu0 %v386_v4  ;;  %v368_v9 = vld [vmem:[%s8245_s14 + $0x68] sm:$0xff]  ;;  %v383_v10 = vld [vmem:[%s8245_s14 + $0xe0] sm:$0xff]  ;;  %v382_v12 = vld [vmem:[%s8245_s14 + $0xd8] sm:$0xff]  ;;  %v8456_v37 = vshrl.u32 %v405_v32, 7 }
  0x4e   :  { %7110 = vmatpush3.msra.mxu0 %v370_v5  ;;  %7488 = vmatprep.mubr.msk.f32.mxu1 %vm8172_vm2, %v8171_v2  ;;  %v367_v11 = vld [vmem:[%s8245_s14 + $0x60] sm:$0xff]  ;;  %v366_v13 = vld [vmem:[%s8245_s14 + $0x58] sm:$0xff]  ;;  %v381_v15 = vld [vmem:[%s8245_s14 + $0xd0] sm:$0xff]  ;;  %v404_v36 = vunpack.c.0.s8 %v403_v31 }
  0x4f   :  { %7111 = vmatprep.subr.mxu0 %v385_v6  ;;  %v272_v14 = vld [vmem:[%s8235_s3 + $0x18] sm:$0xff]  ;;  %v365_v16 = vld [vmem:[%s8245_s14 + $0x50] sm:$0xff]  ;;  %v380_v18 = vld [vmem:[%s8245_s14 + $0xc8] sm:$0xff] }
  0x50   :  { %7112 = vmatpush3.msra.mxu0 %v369_v7  ;;  %7481 = vmatpush3.msra.mxu1 %v272_v14  ;;  %v271_v17 = vld [vmem:[%s8235_s3 + $0x10] sm:$0xff]  ;;  %v364_v19 = vld [vmem:[%s8245_s14 + $0x48] sm:$0xff]  ;;  %v379_v20 = vld [vmem:[%s8245_s14 + $0xc0] sm:$0xff]  ;;  %v407_v41 = vsub.s32 %v404_v36, %v8456_v37 }
  0x51   :  { %7113 = vmatprep.subr.mxu0 %v384_v8  ;;  %7482 = vmatprep.subr.mxu1 %v8171_v2  ;;  %v363_v21 = vld [vmem:[%s8245_s14 + $0x40] sm:$0xff]  ;;  %v378_v22 = vld [vmem:[%s8245_s14 + $0xb8] sm:$0xff]  ;;  %v377_v24 = vld [vmem:[%s8245_s14 + $0xb0] sm:$0xff] }
  0x52   :  { %7114 = vmatpush3.msra.mxu0 %v368_v9  ;;  %7483 = vmatpush3.msra.mxu1 %v271_v17  ;;  %v362_v23 = vld [vmem:[%s8245_s14 + $0x38] sm:$0xff]  ;;  %v361_v25 = vld [vmem:[%s8245_s14 + $0x30] sm:$0xff]  ;;  %v376_v26 = vld [vmem:[%s8245_s14 + $0xa8] sm:$0xff] }
  0x53   :  { %7115 = vmatprep.subr.mxu0 %v383_v10  ;;  %7484 = vmatprep.subr.mxu1 %v8171_v2  ;;  %v360_v27 = vld [vmem:[%s8245_s14 + $0x28] sm:$0xff]  ;;  %v375_v28 = vld [vmem:[%s8245_s14 + $0xa0] sm:$0xff]  ;;  %v374_v33 = vld [vmem:[%s8245_s14 + $0x98] sm:$0xff] }
  0x54   :  { %7116 = vmatpush3.msra.mxu0 %v367_v11  ;;  %v359_v29 = vld [vmem:[%s8245_s14 + $0x20] sm:$0xff]  ;;  %v270_v34 = vld [vmem:[%s8235_s3 + $0x8] sm:$0xff]  ;;  %v358_v35 = vld [vmem:[%s8245_s14 + $0x18] sm:$0xff] }
  0x55   :  { %7117 = vmatprep.subr.mxu0 %v382_v12  ;;  %7485 = vmatpush3.msra.mxu1 %v270_v34  ;;  %v373_v38 = vld [vmem:[%s8245_s14 + $0x90] sm:$0xff]  ;;  %v269_v39 = vld [vmem:[%s8235_s3] sm:$0xff]  ;;  %v372_v42 = vld [vmem:[%s8245_s14 + $0x88] sm:$0xff] }
  0x56   :  { %7118 = vmatpush3.msra.mxu0 %v366_v13  ;;  %7486 = vmatprep.subr.mxu1 %v8171_v2  ;;  %v357_v40 = vld [vmem:[%s8245_s14 + $0x10] sm:$0xff]  ;;  %v354_v43 = vld [vmem:[%s8205_s9] sm:$0x3f]  ;;  %v356_v44 = vld [vmem:[%s8245_s14 + $0x8] sm:$0xff] }
  0x57   :  { %7119 = vmatprep.subr.mxu0 %v381_v15  ;;  %7487 = vmatpush3.msra.mxu1 %v269_v39  ;;  %v408_v45 = vrot.slane %v354_v43, %v407_v41  ;;  %v371_v46 = vld [vmem:[%s8245_s14 + $0x80] sm:$0xff]  ;;  %v401_v49 = vcombine.high %v354_v43, %v354_v43  ;;  %v660_v51 = vld [vmem:[%s8265_s6 + $0x18] sm:$0x3f]  ;;  %v659_v52 = vld [vmem:[%s8265_s6 + $0x10] sm:$0xff] }
  0x58   :  { %7120 = vmatpush3.msra.mxu0 %v365_v16  ;;  %7491 = vmatprep.subr.mxu1 %v8171_v2  ;;  %v355_v48 = vld [vmem:[%s8245_s14] sm:$0xff]  ;;  %v658_v53 = vld [vmem:[%s8265_s6 + $0x8] sm:$0xff] }
  0x59   :  { %7121 = vmatprep.subr.mxu0 %v380_v18  ;;  %v416_v47 = vcombine.high %v408_v45, %v408_v45  ;;  %v415_v50 = vrot.slane %v401_v49, %v407_v41  ;;  %v657_v54 = vld [vmem:[%s8265_s6] sm:$0xff]  ;;  %v832_v58 = vld [vmem:[%s8215_s17 + $0x8] sm:$0xff] }
  0x5a   :  { %7122 = vmatpush3.msra.mxu0 %v364_v19  ;;  %v656_v55 = vld [vmem:[%s8210_s13] sm:$0x3] }
  0x5b   :  { %7123 = vmatprep.subr.mxu0 %v379_v20  ;;  %490 = vmatprep.mubr.f32.mxu0 %v416_v47  ;;  %v833_v56 = vld [vmem:[%s8285_s4] sm:$0x1f] }
  0x5c   :  { %7124 = vmatpush3.msra.mxu0 %v363_v21  ;;  %v831_v57 = vld [vmem:[%s8215_s17] sm:$0xff] }
  0x5d   :  { %7125 = vmatprep.subr.mxu0 %v378_v22 }
  0x5e   :  { %7126 = vmatpush3.msra.mxu0 %v362_v23 }
  0x5f   :  { %7127 = vmatprep.subr.mxu0 %v377_v24 }
  0x60   :  { %7128 = vmatpush3.msra.mxu0 %v361_v25 }
  0x61   :  { %7129 = vmatprep.subr.mxu0 %v376_v26 }
  0x62   :  { %7130 = vmatpush3.msra.mxu0 %v360_v27 }
  0x63   :  { %7131 = vmatprep.subr.mxu0 %v375_v28 }
  0x64   :  { %7132 = vmatpush3.msra.mxu0 %v359_v29 }
  0x65   :  { %7133 = vmatprep.subr.mxu0 %v374_v33 }
  0x66   :  { %7134 = vmatpush3.msra.mxu0 %v358_v35 }
  0x67   :  { %7135 = vmatprep.subr.mxu0 %v373_v38 }
  0x68   :  { %7136 = vmatpush3.msra.mxu0 %v357_v40 }
  0x69   :  { %7137 = vmatprep.subr.mxu0 %v372_v42 }
  0x6a   :  { %7138 = vmatpush3.msra.mxu0 %v356_v44 }
  0x6b   :  { %7139 = vmatprep.subr.mxu0 %v371_v46 }
  0x6c   :  { %7140 = vmatpush3.msra.mxu0 %v355_v48 }
  0x6d   :  { %491 = vmatmul.mubr.f32.vlgmr.msra.gmra.mxu0 %v408_v45  ;;  %7525 = vmatprep.subr.mxu0 %v8171_v2 }
  0x6e   :  { %7533 = vmatprep.mubr.msk.f32.mxu0 %vm8172_vm2, %v8171_v2  ;;  %7526 = vmatpush3.msk.msra.mxu0 %vm672_vm3, %v660_v51 }
  0x6f   :  { %7527 = vmatprep.subr.mxu0 %v8171_v2 }
  0x70   :  { %7528 = vmatpush3.msra.mxu0 %v659_v52 }
  0x71   :  { %7529 = vmatprep.subr.mxu0 %v8171_v2 }
  0x72   :  { %7530 = vmatpush3.msra.mxu0 %v658_v53 }
  0x73   :  { %7531 = vmatprep.subr.mxu0 %v8171_v2 }
  0x74   :  { %7532 = vmatpush3.msra.mxu0 %v657_v54 }
  0x75   :  { %7534 = vmatmul.mubr.msk.f32.vlgmr.msra.gmra.mxu0 %vm668_vm4, %v656_v55  ;;  %7547 = vmatprep.subr.msk.mxu0 %vm194_vm0, %v833_v56 }
  0x76   :  { %7548 = vmatpush3.msk.msra.mxu0 %vm194_vm0, %v833_v56  ;;  %7549 = vmatprep.mubr.msk.f32.mxu0 %vm190_vm1, %v831_v57 }
  0x79   :  { %7550 = vmatmul.mubr.msk.f32.vlgmr.msra.gmra.mxu0 %vm190_vm1, %v832_v58 }
  0x7a   :  { %95 = vsyncpa [#allocation5], 0  ;;  %v6807_v59 = vld [vmem:[%s8230_s29] ss:$0 sm:$0xff]  ;;  %vm280_vm5 = vcmask 261120   ;;  %vm422_vm6 = vcmask 1043456  }
  0x7b   :  { %v392_v0 = vld [vmem:[%s8245_s14 + $0x128] sm:$0xf]  ;;  %v391_v1 = vld [vmem:[%s8245_s14 + $0x120] sm:$0xff]  ;;  %v390_v3 = vld [vmem:[%s8245_s14 + $0x118] sm:$0xff]  ;;  %vm419_vm7 = vcmask 359424   ;;  %s9386_s0 = sld [smem:[#allocation9_spill]] }
  0x7c   :  { %v389_v4 = vld [vmem:[%s8245_s14 + $0x110] sm:$0xff]  ;;  %v388_v5 = vld [vmem:[%s8245_s14 + $0x108] sm:$0xff]  ;;  %v387_v6 = vld [vmem:[%s8245_s14 + $0x100] sm:$0xff]  ;;  %v8174_v20 = vmov 1966171168   ;;  %vm1020_vm8 = vcmask 516096  }
  0x7d   :  { %v574_v7 = vld [vmem:[%s8255_s24 + $0x38] sm:$0xff]  ;;  %v573_v8 = vld [vmem:[%s8255_s24 + $0x30] sm:$0xff]  ;;  %v572_v10 = vld [vmem:[%s8255_s24 + $0x28] sm:$0xff]  ;;  %v1025_v21 = vunpack.c.l.s4 %v8174_v20  ;;  %s9387_s5 = sld [smem:[#allocation11_spill]]  ;;  %vm582_vm9 = vcmask 523264   ;;  %vm1104_vm10 = vcmask 519168  }
  0x7e   :  { %v571_v12 = vld [vmem:[%s8255_s24 + $0x20] sm:$0xff]  ;;  %v570_v14 = vld [vmem:[%s8255_s24 + $0x18] sm:$0xff]  ;;  %v569_v15 = vld [vmem:[%s8255_s24 + $0x10] sm:$0xff]  ;;  %s9388_s9 = sld [smem:[#allocation12_spill]]  ;;  %vm1385_vm11 = vcmask 64512   ;;  %s8176_s20 = smov 112  }
  0x7f   :  { %v568_v16 = vld [vmem:[%s8255_s24 + $0x8] sm:$0xff]  ;;  %v567_v17 = vld [vmem:[%s8255_s24] sm:$0xff]  ;;  %v1026_v22 = vunpack.c.0.s8 %v1025_v21  ;;  %s9389_s13 = sld [smem:[#allocation15_spill]]  ;;  %s8177_s4 = smov 104   ;;  %vm4096_vm12 = vcmask 130048   ;;  %vm4099_vm13 = vcmask 195584  }
  0x80   :  { %v6810_v23 = vld [vmem:[%s8240_s8] ss:$0 sm:$0xff]  ;;  %s9390_s17 = sld [smem:[#allocation17_spill]]  ;;  %s8178_s22 = smov 96   ;;  %vm4104_vm14 = vcmask 326656   ;;  %vm4107_vm15 = vcmask 392192  }
  0x81   :  { %v8523_v24 = vsub.s32 %v1026_v22, %v8456_v37  ;;  %v6812_v32 = vld [vmem:[%s8250_s19] ss:$0 sm:$0xff]  ;;  %v750_v41 = vld [vmem:[%s9386_s0 + $0x18] sm:$0xff]  ;;  %v749_v45 = vld [vmem:[%s9386_s0 + $0x10] sm:$0xff]  ;;  %s9391_s25 = sld [smem:[#allocation14_spill]]  ;;  %s8179_s23 = smov 88  }
  0x82   :  { %v6817_v39 = vld [vmem:[%s8270_s12] ss:$0 sm:$0xff]  ;;  %v748_v47 = vld [vmem:[%s9386_s0 + $0x8] sm:$0xff]  ;;  %s9392_s29 = sld [smem:[#allocation19_spill]]  ;;  %s8175_s12 = smov 120   ;;  %vm4110_vm0 = vcmask 457728  }
  0x83   :  { %v6822_v42 = vld [vmem:[%s9387_s5] ss:$0 sm:$0xff]  ;;  %s9393_s3 = sld [smem:[#allocation8_spill]]  ;;  %s8180_s26 = smov 80  }
  0x84   :  { %v747_v49 = vld [vmem:[%s9386_s0] sm:$0xff]  ;;  %v930_v51 = vld [vmem:[%s9388_s9 + $0x18] sm:$0xff]  ;;  %v929_v52 = vld [vmem:[%s9388_s9 + $0x10] sm:$0xff]  ;;  %s9394_s8 = sld [smem:[#allocation10_spill]]  ;;  %s8181_s28 = smov 72  }
  0x85   :  { %v928_v53 = vld [vmem:[%s9388_s9 + $0x8] sm:$0xff]  ;;  %v927_v55 = vld [vmem:[%s9388_s9] sm:$0xff]  ;;  %v1116_v57 = vld [vmem:[%s9389_s13 + $0x38] sm:$0xff]  ;;  %s9395_s14 = sld [smem:[#allocation13_spill]]  ;;  %s8182_s1 = smov 8  }
  0x86   :  { %7563 = vmatprep.subr.mxu0 %v1116_v57  ;;  %v1212_v58 = vld [vmem:[%s9390_s17 + $0x38] sm:$0xff]  ;;  %s9396_s19 = sld [smem:[#allocation18_spill]]  ;;  %s8183_s2 = smov 16  }
  0x87   :  { %7564 = vmatpush3.msra.mxu0 %v1116_v57  ;;  %s9397_s24 = sld [smem:[#allocation16_spill]]  ;;  %s8184_s10 = smov 24  }
  0x88   :  { %s9398_s6 = sld [smem:[#allocation20_spill]]  ;;  %s8185_s7 = smov 32  }
  0x89   :  { %s8186_s11 = smov 40   ;;  %s8187_s16 = smov 48  }
  0x8a   :  { %s9399_s15 = sld [smem:[#allocation21_spill]]  ;;  %s8188_s18 = smov 56  }
  0x8b   :  { %s9400_s0 = sld [smem:[#allocation22_spill]] }
  0x8c   :  { %s9401_s5 = sld [smem:[#allocation27_spill]] }
  0x8d   :  { %s9402_s9 = sld [smem:[#allocation23_spill]] }
 0x10d   :  { %v264_v60 = vpop.f32.mrf.mxu0 }
 0x10e   :  { %v265_v61 = vadd.f32 %v6807_v59, %v264_v60  ;;  %v1115_v59 = vld [vmem:[%s9389_s13 + $0x30] sm:$0xff] }
 0x10f   :  { %v7479_v62 = vpop.f32.mrf.mxu0  ;;  %7565 = vmatprep.subr.mxu0 %v1115_v59  ;;  %v1211_v60 = vld [vmem:[%s9390_s17 + $0x30] sm:$0xff] }
 0x110   :  { %v268_v63 = vmax.f32 %v265_v61, 0.0  ;;  %7566 = vmatpush3.msra.mxu0 %v1115_v59  ;;  %v1114_v61 = vld [vmem:[%s9389_s13 + $0x28] sm:$0xff] }
 0x111   :  { %7567 = vmatprep.subr.mxu0 %v1114_v61  ;;  %v1210_v62 = vld [vmem:[%s9390_s17 + $0x28] sm:$0xff] }
 0x112   :  { %7489 = vmatmul.mubr.msk.f32.vlgmr.msra.gmra.mxu1 %vm280_vm5, %v268_v63  ;;  %7568 = vmatpush3.msra.mxu0 %v1114_v61  ;;  %v1113_v63 = vld [vmem:[%s9389_s13 + $0x20] sm:$0xff] }
 0x113   :  { %7492 = vmatpush3.msk.msra.mxu1 %vm422_vm6, %v392_v0  ;;  %7503 = vmatprep.mubr.msk.f32.mxu1 %vm8172_vm2, %v8171_v2  ;;  %v1019_v0 = vld [vmem:[%s9391_s25] sm:$0x1]  ;;  %s9405_s25 = sld [smem:[#allocation28_spill]] }
 0x114   :  { %7493 = vmatprep.subr.mxu1 %v8171_v2  ;;  %7569 = vmatprep.subr.mxu0 %v1113_v63  ;;  %1021 = vst.msk [vmem:[#allocation2] sm:$0x1] %vm1020_vm8, %v1019_v0  ;;  %1022 = vst.msk [vmem:[#allocation2 + $0x8] sm:$0x1] %vm1020_vm8, %v1019_v0 }
 0x115   :  { %7494 = vmatpush3.msra.mxu1 %v391_v1  ;;  %v1209_v1 = vld [vmem:[%s9390_s17 + $0x20] sm:$0xff]  ;;  %7570 = vmatpush3.msra.mxu0 %v1113_v63 }
 0x116   :  { %7495 = vmatprep.subr.mxu1 %v8171_v2 }
 0x117   :  { %7496 = vmatpush3.msra.mxu1 %v390_v3  ;;  %v1112_v3 = vld [vmem:[%s9389_s13 + $0x18] sm:$0xff] }
 0x118   :  { %7497 = vmatprep.subr.mxu1 %v8171_v2  ;;  %7571 = vmatprep.subr.mxu0 %v1112_v3 }
 0x119   :  { %7498 = vmatpush3.msra.mxu1 %v389_v4  ;;  %v1208_v4 = vld [vmem:[%s9390_s17 + $0x18] sm:$0xff]  ;;  %7572 = vmatpush3.msra.mxu0 %v1112_v3 }
 0x11a   :  { %7499 = vmatprep.subr.mxu1 %v8171_v2 }
 0x11b   :  { %7500 = vmatpush3.msra.mxu1 %v388_v5  ;;  %v1111_v5 = vld [vmem:[%s9389_s13 + $0x10] sm:$0xff] }
 0x11c   :  { %7501 = vmatprep.subr.mxu1 %v8171_v2  ;;  %7573 = vmatprep.subr.mxu0 %v1111_v5 }
 0x11d   :  { %7502 = vmatpush3.msra.mxu1 %v387_v6  ;;  %v1207_v6 = vld [vmem:[%s9390_s17 + $0x10] sm:$0xff]  ;;  %7574 = vmatpush3.msra.mxu0 %v1111_v5 }
 0x11e   :  { %7504 = vmatmul.mubr.msk.f32.vlgmr.msra.gmra.mxu1 %vm419_vm7, %v415_v50  ;;  %7506 = vmatprep.subr.mxu1 %v8171_v2 }
 0x11f   :  { %7522 = vmatprep.mubr.msk.f32.mxu1 %vm8172_vm2, %v8171_v2  ;;  %7507 = vmatpush3.msra.mxu1 %v574_v7  ;;  %v1110_v7 = vld [vmem:[%s9389_s13 + $0x8] sm:$0xff] }
 0x120   :  { %7508 = vmatprep.subr.mxu1 %v8171_v2  ;;  %7575 = vmatprep.subr.mxu0 %v1110_v7 }
 0x121   :  { %7509 = vmatpush3.msra.mxu1 %v573_v8  ;;  %v1206_v8 = vld [vmem:[%s9390_s17 + $0x8] sm:$0xff]  ;;  %7576 = vmatpush3.msra.mxu0 %v1110_v7 }
 0x122   :  { %7510 = vmatprep.subr.mxu1 %v8171_v2 }
 0x123   :  { %7511 = vmatpush3.msra.mxu1 %v572_v10  ;;  %v1205_v10 = vld [vmem:[%s9390_s17] sm:$0xff]  ;;  %s9404_s17 = sld [smem:[#allocation29_spill]] }
 0x124   :  { %7512 = vmatprep.subr.mxu1 %v8171_v2 }
 0x125   :  { %7513 = vmatpush3.msra.mxu1 %v571_v12  ;;  %v6815_v12 = vld [vmem:[%s9393_s3] ss:$0 sm:$0xff]  ;;  %s9407_s3 = sld [smem:[#allocation7_spill]] }
 0x126   :  { %7514 = vmatprep.subr.mxu1 %v8171_v2 }
 0x127   :  { %7515 = vmatpush3.msra.mxu1 %v570_v14 }
 0x128   :  { %7516 = vmatprep.subr.mxu1 %v8171_v2 }
 0x129   :  { %7517 = vmatpush3.msra.mxu1 %v569_v15 }
 0x12a   :  { %7518 = vmatprep.subr.mxu1 %v8171_v2 }
 0x12b   :  { %7519 = vmatpush3.msra.mxu1 %v568_v16 }
 0x12c   :  { %7520 = vmatprep.subr.mxu1 %v8171_v2 }
 0x12d   :  { %v7141_v9 = vpop.f32.mrf.mxu0  ;;  %7521 = vmatpush3.msra.mxu1 %v567_v17 }
 0x12e   :  { %7536 = vmatprep.subr.mxu1 %v8171_v2 }
 0x12f   :  { %v7142_v11 = vpop.f32.mrf.mxu0 }
 0x130   :  { %v7143_v13 = vadd.f32 %v7142_v11, %v7141_v9  ;;  %v1109_v9 = vld [vmem:[%s9389_s13] sm:$0xff]  ;;  %v1302_v11 = vld [vmem:[%s9392_s29 + $0x38] sm:$0xff]  ;;  %s9403_s13 = sld [smem:[#allocation24_spill]] }
 0x131   :  { %7577 = vmatprep.subr.mxu0 %v1109_v9 }
 0x132   :  { %v493_v33 = vadd.f32 %v7143_v13, %v6812_v32  ;;  %7578 = vmatpush3.msra.mxu0 %v1109_v9 }
 0x133   :  { %7601 = vmatprep.subr.mxu0 %v1302_v11 }
 0x135   :  { %v742_v18 = vpop.f32.mrf.mxu0 }
 0x136   :  { %v743_v44 = vadd.f32 %v6817_v39, %v742_v18  ;;  %v1298_v39 = vld [vmem:[%s9392_s29 + $0x18] sm:$0xff] }
 0x137   :  { %v7535_v19 = vpop.f32.mrf.mxu0 }
 0x138   :  { %v746_v48 = vmax.f32 %v743_v44, 0.0  ;;  %v6820_v19 = vld [vmem:[%s9394_s8] ss:$0 sm:$0xff]  ;;  %s9408_s8 = sld [smem:[#allocation31_spill]] }
 0x139   :  { %v7551_v34 = vpop.f32.mrf.mxu0 }
 0x13a   :  { %v922_v54 = vadd.f32 %v7551_v34, %v6822_v42 }
 0x13b   :  { %v916_v43 = vpop.f32.mrf.mxu0 }
 0x13c   :  { %v917_v46 = vadd.f32 %v6822_v42, %v916_v43  ;;  %v926_v56 = vmax.f32 %v922_v54, 0.0  ;;  %v1295_v42 = vld [vmem:[%s9392_s29] sm:$0xff] }
 0x13d   :  { %v6832_v43 = vld [vmem:[%s9396_s19] ss:$0 sm:$0xff]  ;;  %s9410_s19 = sld [smem:[#allocation26_spill]] }
 0x13e   :  { %v925_v50 = vmax.f32 %v917_v46, 0.0  ;;  %v6829_v46 = vld [vmem:[%s9397_s24] ss:$0 sm:$0xff]  ;;  %s9411_s24 = sld [smem:[#allocation32_spill]] }
 0x1d2   :  { %v350_v25 = vpop.f32.mrf.mxu1 }
 0x1d3   :  { %v351_v26 = vadd.f32 %v6810_v23, %v350_v25 }
 0x1d4   :  { %v7490_v27 = vpop.f32.mrf.mxu1 }
 0x1d5   :  { %v1030_v28 = vrot.slane %v351_v26, %v8523_v24 }
 0x1d7   :  { %v1031_v29 = vcombine.high %v1030_v28, %v1030_v28  ;;  %v1038_v30 = vrot.slane %v1030_v28, %v8523_v24  ;;  %v6826_v28 = vld [vmem:[%s9395_s14] ss:$0 sm:$0xff]  ;;  %s9409_s14 = sld [smem:[#allocation25_spill]] }
 0x1d9   :  { %v1045_v31 = vrot.slane %v1031_v29, %v8523_v24  ;;  %1048 = vst.msk [vmem:[#allocation2 + $0x1] sm:$0x1] %vm1020_vm8, %v1038_v30 }
 0x1db   :  { %1049 = vst.msk [vmem:[#allocation2 + $0x9] sm:$0x1] %vm1020_vm8, %v1045_v31 }
 0x1de   :  { %v562_v35 = vpop.f32.mrf.mxu1 }
 0x1df   :  { %v563_v36 = vadd.f32 %v562_v35, %v493_v33  ;;  %v1301_v35 = vld [vmem:[%s9392_s29 + $0x30] sm:$0xff] }
 0x1e0   :  { %v7505_v38 = vpop.f32.mrf.mxu1 }
 0x1e1   :  { %v566_v40 = vmax.f32 %v563_v36, 0.0  ;;  %v1300_v36 = vld [vmem:[%s9392_s29 + $0x28] sm:$0xff]  ;;  %v1299_v38 = vld [vmem:[%s9392_s29 + $0x20] sm:$0xff] }
 0x1e3   :  { %7523 = vmatmul.mubr.msk.f32.vlgmr.msra.gmra.mxu1 %vm582_vm9, %v566_v40  ;;  %v1297_v40 = vld [vmem:[%s9392_s29 + $0x10] sm:$0xff] }
 0x1e4   :  { %7537 = vmatpush3.msra.mxu1 %v750_v41  ;;  %7544 = vmatprep.mubr.msk.f32.mxu1 %vm8172_vm2, %v8171_v2  ;;  %v1296_v41 = vld [vmem:[%s9392_s29 + $0x8] sm:$0xff]  ;;  %s9406_s29 = sld [smem:[#allocation30_spill]] }
 0x1e5   :  { %7538 = vmatprep.subr.mxu1 %v8171_v2 }
 0x1e6   :  { %7539 = vmatpush3.msra.mxu1 %v749_v45 }
 0x1e7   :  { %7540 = vmatprep.subr.mxu1 %v8171_v2 }
 0x1e8   :  { %7541 = vmatpush3.msra.mxu1 %v748_v47 }
 0x1e9   :  { %7542 = vmatprep.subr.mxu1 %v8171_v2 }
 0x1ea   :  { %7543 = vmatpush3.msra.mxu1 %v747_v49 }
 0x1eb   :  { %7545 = vmatmul.mubr.msk.f32.vlgmr.msra.gmra.mxu1 %vm280_vm5, %v746_v48  ;;  %7552 = vmatprep.subr.mxu1 %v930_v51 }
 0x1ec   :  { %7553 = vmatpush3.msra.mxu1 %v930_v51  ;;  %7560 = vmatprep.mubr.msk.f32.mxu1 %vm280_vm5, %v925_v50 }
 0x1ed   :  { %7554 = vmatprep.subr.mxu1 %v929_v52 }
 0x1ee   :  { %7555 = vmatpush3.msra.mxu1 %v929_v52 }
 0x1ef   :  { %7556 = vmatprep.subr.mxu1 %v928_v53 }
 0x1f0   :  { %7557 = vmatpush3.msra.mxu1 %v928_v53  ;;  %v6835_v53 = vld [vmem:[%s9398_s6] ss:$0 sm:$0xff] }
 0x1f1   :  { %7558 = vmatprep.subr.mxu1 %v927_v55 }
 0x1f2   :  { %7559 = vmatpush3.msra.mxu1 %v927_v55 }
 0x1f3   :  { %7561 = vmatmul.mubr.msk.f32.vlgmr.msra.gmra.mxu1 %vm280_vm5, %v926_v56  ;;  %7582 = vmatprep.subr.mxu1 %v1212_v58 }
 0x1f4   :  { %7583 = vmatpush3.msra.mxu1 %v1212_v58 }
 0x1f5   :  { %7584 = vmatprep.subr.mxu1 %v1211_v60 }
 0x1f6   :  { %7585 = vmatpush3.msra.mxu1 %v1211_v60 }
 0x1f7   :  { %7586 = vmatprep.subr.mxu1 %v1210_v62 }
 0x1f8   :  { %7587 = vmatpush3.msra.mxu1 %v1210_v62 }
 0x1f9   :  { %7588 = vmatprep.subr.mxu1 %v1209_v1 }
 0x1fa   :  { %7589 = vmatpush3.msra.mxu1 %v1209_v1 }
 0x1fb   :  { %7590 = vmatprep.subr.mxu1 %v1208_v4 }
 0x1fc   :  { %7591 = vmatpush3.msra.mxu1 %v1208_v4 }
 0x1fd   :  { %7592 = vmatprep.subr.mxu1 %v1207_v6 }
 0x1fe   :  { %7593 = vmatpush3.msra.mxu1 %v1207_v6 }
 0x1ff   :  { %7594 = vmatprep.subr.mxu1 %v1206_v8 }
 0x200   :  { %7595 = vmatpush3.msra.mxu1 %v1206_v8 }
 0x201   :  { %7596 = vmatprep.subr.mxu1 %v1205_v10 }
 0x202   :  { %7597 = vmatpush3.msra.mxu1 %v1205_v10 }
 0x203   :  { %7625 = vmatprep.subr.mxu1 %v8171_v2 }
 0x2a3   :  { %v652_v13 = vpop.f32.mrf.mxu1 }
 0x2a4   :  { %v653_v14 = vadd.f32 %v6815_v12, %v652_v13 }
 0x2a5   :  { %v7524_v15 = vpop.f32.mrf.mxu1 }
 0x2a6   :  { %v1057_v16 = vrot.slane %v653_v14, %v8523_v24 }
 0x2a8   :  { %v1058_v17 = vcombine.high %v1057_v16, %v1057_v16  ;;  %v1065_v18 = vrot.slane %v1057_v16, %v8523_v24 }
 0x2aa   :  { %v1072_v20 = vrot.slane %v1058_v17, %v8523_v24  ;;  %1075 = vst.msk [vmem:[#allocation2 + $0x2] sm:$0x1] %vm1020_vm8, %v1065_v18 }
 0x2ab   :  { %v827_v21 = vpop.f32.mrf.mxu1 }
 0x2ac   :  { %1076 = vst.msk [vmem:[#allocation2 + $0xa] sm:$0x1] %vm1020_vm8, %v1072_v20  ;;  %v828_v22 = vadd.f32 %v6820_v19, %v827_v21 }
 0x2ad   :  { %v7546_v23 = vpop.f32.mrf.mxu1 }
 0x2ae   :  { %v1084_v25 = vrot.slane %v828_v22, %v8523_v24 }
 0x2b0   :  { %v1085_v26 = vcombine.high %v1084_v25, %v1084_v25  ;;  %v1092_v27 = vrot.slane %v1084_v25, %v8523_v24 }
 0x2b2   :  { %v1099_v29 = vrot.slane %v1085_v26, %v8523_v24  ;;  %1102 = vst.msk [vmem:[#allocation2 + $0x3] sm:$0x1] %vm1020_vm8, %v1092_v27 }
 0x2b3   :  { %v7562_v30 = vpop.f32.mrf.mxu1 }
 0x2b4   :  { %1103 = vst.msk [vmem:[#allocation2 + $0xb] sm:$0x1] %vm1020_vm8, %v1099_v29  ;;  %v1016_v31 = vadd.f32 %v7562_v30, %v6826_v28 }
 0x2b5   :  { %v1010_v32 = vpop.f32.mrf.mxu1 }
 0x2b6   :  { %1106 = vst.msk [vmem:[#allocation2 + $0xc] sm:$0xf] %vm1104_vm10, %v1016_v31  ;;  %v1011_v33 = vadd.f32 %v6826_v28, %v1010_v32 }
 0x2b8   :  { %1105 = vst.msk [vmem:[#allocation2 + $0x4] sm:$0xf] %vm1104_vm10, %v1011_v33 }
 0x2bd   :  { %v1108_v24 = vld [vmem:[#allocation2 + $0x8] sm:$0xff] }
 0x2bf   :  { %v1107_v34 = vld [vmem:[#allocation2] sm:$0xff] }
 0x2c0   :  { %7579 = vmatprep.mubr.msk.f32.mxu0 %vm582_vm9, %v1107_v34  ;;  %7598 = vmatprep.mubr.msk.f32.mxu1 %vm582_vm9, %v1107_v34 }
 0x2c1   :  { %7580 = vmatmul.mubr.msk.f32.vlgmr.msra.gmra.mxu0 %vm582_vm9, %v1108_v24  ;;  %7599 = vmatmul.mubr.msk.f32.vlgmr.msra.gmra.mxu1 %vm582_vm9, %v1108_v24 }
 0x2c2   :  { %7602 = vmatpush3.msra.mxu0 %v1302_v11  ;;  %7617 = vmatprep.mubr.msk.f32.mxu0 %vm582_vm9, %v1107_v34 }
 0x2c3   :  { %7603 = vmatprep.subr.mxu0 %v1301_v35  ;;  %7627 = vmatprep.mubr.msk.f32.mxu1 %vm8172_vm2, %v8171_v2 }
 0x2c4   :  { %7604 = vmatpush3.msra.mxu0 %v1301_v35 }
 0x2c5   :  { %7605 = vmatprep.subr.mxu0 %v1300_v36 }
 0x2c6   :  { %7606 = vmatpush3.msra.mxu0 %v1300_v36 }
 0x2c7   :  { %7607 = vmatprep.subr.mxu0 %v1299_v38 }
 0x2c8   :  { %7608 = vmatpush3.msra.mxu0 %v1299_v38 }
 0x2c9   :  { %7609 = vmatprep.subr.mxu0 %v1298_v39 }
 0x2ca   :  { %7610 = vmatpush3.msra.mxu0 %v1298_v39 }
 0x2cb   :  { %7611 = vmatprep.subr.mxu0 %v1297_v40 }
 0x2cc   :  { %7612 = vmatpush3.msra.mxu0 %v1297_v40 }
 0x2cd   :  { %7613 = vmatprep.subr.mxu0 %v1296_v41 }
 0x2ce   :  { %7614 = vmatpush3.msra.mxu0 %v1296_v41 }
 0x2cf   :  { %7615 = vmatprep.subr.mxu0 %v1295_v42 }
 0x2d0   :  { %7616 = vmatpush3.msra.mxu0 %v1295_v42 }
 0x2d1   :  { %7618 = vmatmul.mubr.msk.f32.vlgmr.msra.gmra.mxu0 %vm582_vm9, %v1108_v24  ;;  %7620 = vmatprep.subr.mxu0 %v8171_v2 }
 0x2d2   :  { %7622 = vmatprep.mubr.msk.f32.mxu0 %vm8172_vm2, %v8171_v2 }
 0x381   :  { %v7581_v44 = vpop.f32.mrf.mxu0  ;;  %v7600_v45 = vpop.f32.mrf.mxu1 }
 0x382   :  { %v8604_v47 = vadd.f32 %v7600_v45, %v6832_v43  ;;  %v8612_v51 = vadd.f32 %v7581_v44, %v6829_v46 }
 0x383   :  { %v1196_v48 = vpop.f32.mrf.mxu0  ;;  %v1286_v49 = vpop.f32.mrf.mxu1 }
 0x384   :  { %v8606_v50 = vadd.f32 %v6832_v43, %v1286_v49  ;;  %1788 = vrot.lane.b32.xlu1 %v8604_v47, %s8175_s12  ;;  %7626 = vmatpush3.xpose.msk.msra.mxu1 %vm1385_vm11, %v8604_v47  ;;  %v8615_v52 = vadd.f32 %v6829_v46, %v1196_v48 }
 0x385   :  { %7630 = vmatprep.subr.mxu1 %v8171_v2 }
 0x386   :  { %7621 = vmatpush3.xpose.msk.msra.mxu0 %vm1385_vm11, %v8606_v50 }
 0x387   :  { %7628 = vmatmul.mubr.msk.f32.vlgmr.msra.gmra.mxu1 %vm1385_vm11, %v8612_v51  ;;  %7635 = vmatprep.subr.mxu0 %v8171_v2 }
 0x388   :  { %1708 = vrot.lane.b32.xlu1 %v8615_v52, %s8175_s12  ;;  %7632 = vmatprep.mubr.msk.f32.mxu1 %vm8172_vm2, %v8171_v2 }
 0x389   :  { %7623 = vmatmul.mubr.msk.f32.vlgmr.msra.gmra.mxu0 %vm1385_vm11, %v8615_v52 }
 0x38a   :  { %7637 = vmatprep.mubr.msk.f32.mxu0 %vm8172_vm2, %v8171_v2 }
 0x391   :  { %v7619_v54 = vpop.f32.mrf.mxu0 }
 0x392   :  { %v8631_v55 = vadd.f32 %v7619_v54, %v6835_v53 }
 0x393   :  { %v1376_v56 = vpop.f32.mrf.mxu0 }
 0x394   :  { %v8633_v57 = vadd.f32 %v6835_v53, %v1376_v56  ;;  %7636 = vmatpush3.msra.mxu0 %v8631_v55 }
 0x395   :  { %7645 = vmatprep.subr.mxu0 %v8171_v2 }
 0x396   :  { %7631 = vmatpush3.msra.mxu1 %v8633_v57 }
 0x397   :  { %7640 = vmatprep.subr.mxu1 %v8171_v2 }
 0x3f6   :  { %v1789_v11 = vpop.permute.xlu1 %1788 }
 0x3fa   :  { %v1709_v12 = vpop.permute.xlu1 %1708 }
 0x447   :  { %v1534_v58 = vpop.f32.mrf.mxu1 }
 0x448   :  { %v1541_v63 = vsel %vm1385_vm11, %v1534_v58, -inf }
 0x449   :  { %v1458_v59 = vpop.f32.mrf.mxu0  ;;  %v7629_v60 = vpop.f32.mrf.mxu1 }
 0x44a   :  { %v1538_v61 = vsel %vm1385_vm11, %v1458_v59, -inf }
 0x44b   :  { %1539 = vmax.xlane.f32.xlu0 %v1538_v61  ;;  %v7624_v62 = vpop.f32.mrf.mxu0 }
 0x44f   :  { %1542 = vmax.xlane.f32.xlu0 %v1541_v63 }
 0x465   :  { %1710 = vrot.lane.b32.xlu0 %v8606_v50, %s8175_s12 }
 0x4d4   :  { %v1540_v0 = vpop.xlane.xlu0 %1539 }
 0x4d5   :  { %v1544_v1 = vsub.f32 %v1458_v59, %v1540_v0 }
 0x4d7   :  { %v1546_v5 = vmul.f32 1.442695, %v1544_v1 }
 0x4d8   :  { %v1543_v3 = vpop.xlane.xlu0 %1542 }
 0x4d9   :  { %v1545_v4 = vsub.f32 %v1534_v58, %v1543_v3 }
 0x4db   :  { %v1548_v6 = vmul.f32 1.442695, %v1545_v4 }
 0x4dc   :  { %v1711_v20 = vpop.permute.xlu0 %1710 }
 0x4dd   :  { %8024 = vpow2.f32 %v1548_v6 }
 0x4de   :  { %8026 = vpow2.f32 %v1546_v5 }
 0x4ea   :  { %v8025_v7 = vpop.eup %8024 }
 0x4eb   :  { %v1553_v8 = vsel %vm1385_vm11, %v8025_v7, 0.0  ;;  %v8027_v9 = vpop.eup %8026 }
 0x4ec   :  { %1554 = vadd.xlane.f32.xlu1 %v1553_v8  ;;  %v1550_v10 = vsel %vm1385_vm11, %v8027_v9, 0.0 }
 0x4f0   :  { %1551 = vadd.xlane.f32.xlu1 %v1550_v10 }
 0x501   :  { %1786 = vrot.lane.b32.xlu1 %v8612_v51, %s8175_s12 }
 0x575   :  { %v1555_v13 = vpop.xlane.xlu1 %1554 }
 0x576   :  { %8028 = vrcp.f32 %v1555_v13 }
 0x579   :  { %v1552_v14 = vpop.xlane.xlu1 %1551 }
 0x57a   :  { %8030 = vrcp.f32 %v1552_v14 }
 0x57d   :  { %v1787_v19 = vpop.permute.xlu1 %1786 }
 0x583   :  { %v8029_v15 = vpop.eup %8028 }
 0x584   :  { %v8647_v16 = vmul.f32 %v8029_v15, %v8025_v7 }
 0x586   :  { %7638 = vmatmul.mubr.msk.f32.vlgmr.msra.gmra.mxu0 %vm1385_vm11, %v8647_v16 }
 0x587   :  { %v8031_v17 = vpop.eup %8030  ;;  %7646 = vmatpush3.xpose.msk.msra.mxu0 %vm1385_vm11, %v1789_v11  ;;  %7647 = vmatprep.mubr.msk.f32.mxu0 %vm8172_vm2, %v8171_v2 }
 0x588   :  { %v8654_v18 = vmul.f32 %v8031_v17, %v8027_v9  ;;  %7655 = vmatprep.subr.mxu0 %v8171_v2 }
 0x58a   :  { %7633 = vmatmul.mubr.msk.f32.vlgmr.msra.gmra.mxu1 %vm1385_vm11, %v8654_v18  ;;  %7648 = vmatmul.mubr.msk.f32.vlgmr.msra.gmra.mxu0 %vm1385_vm11, %v1787_v19 }
 0x58b   :  { %7641 = vmatpush3.xpose.msk.msra.mxu1 %vm1385_vm11, %v1711_v20  ;;  %7642 = vmatprep.mubr.msk.f32.mxu1 %vm8172_vm2, %v8171_v2 }
 0x58c   :  { %7650 = vmatprep.subr.mxu1 %v8171_v2  ;;  %7657 = vmatprep.mubr.msk.f32.mxu0 %vm8172_vm2, %v8171_v2 }
 0x58e   :  { %7643 = vmatmul.mubr.msk.f32.vlgmr.msra.gmra.mxu1 %vm1385_vm11, %v1709_v12 }
 0x58f   :  { %7652 = vmatprep.mubr.msk.f32.mxu1 %vm8172_vm2, %v8171_v2 }
 0x646   :  { %v8669_v21 = vpop.f32.mrf.mxu0 }
 0x648   :  { %v7639_v22 = vpop.f32.mrf.mxu0 }
 0x64a   :  { %v8671_v23 = vpop.f32.mrf.mxu1  ;;  %v1860_v25 = vpop.f32.mrf.mxu0 }
 0x64b   :  { %v1867_v26 = vsel %vm1385_vm11, %v1860_v25, -inf }
 0x64c   :  { %v7634_v27 = vpop.f32.mrf.mxu1  ;;  %1868 = vmax.xlane.f32.xlu1 %v1867_v26  ;;  %v7649_v28 = vpop.f32.mrf.mxu0 }
 0x64e   :  { %v1782_v29 = vpop.f32.mrf.mxu1 }
 0x64f   :  { %v1864_v30 = vsel %vm1385_vm11, %v1782_v29, -inf }
 0x650   :  { %1865 = vmax.xlane.f32.xlu0 %v1864_v30  ;;  %v7644_v31 = vpop.f32.mrf.mxu1 }
 0x65d   :  { %1966 = vrot.lane.b32.xlu1 %v8631_v55, %s8175_s12 }
 0x661   :  { %2044 = vrot.lane.b32.xlu1 %v8606_v50, %s8176_s20 }
 0x665   :  { %2122 = vrot.lane.b32.xlu1 %v8604_v47, %s8176_s20 }
 0x669   :  { %2120 = vrot.lane.b32.xlu1 %v8612_v51, %s8176_s20 }
 0x6d5   :  { %v1869_v32 = vpop.xlane.xlu1 %1868 }
 0x6d6   :  { %v1871_v33 = vsub.f32 %v1860_v25, %v1869_v32 }
 0x6d8   :  { %v1874_v34 = vmul.f32 1.442695, %v1871_v33 }
 0x6d9   :  { %v1866_v24 = vpop.xlane.xlu0 %1865  ;;  %v1967_v35 = vpop.permute.xlu1 %1966 }
 0x6da   :  { %8032 = vpow2.f32 %v1874_v34  ;;  %v1870_v36 = vsub.f32 %v1782_v29, %v1866_v24  ;;  %7656 = vmatpush3.msra.mxu0 %v1967_v35 }
 0x6db   :  { %7665 = vmatprep.subr.mxu0 %v8171_v2 }
 0x6dc   :  { %v1872_v38 = vmul.f32 1.442695, %v1870_v36 }
 0x6dd   :  { %v2045_v45 = vpop.permute.xlu1 %2044 }
 0x6de   :  { %8034 = vpow2.f32 %v1872_v38 }
 0x6e1   :  { %v2123_v49 = vpop.permute.xlu1 %2122 }
 0x6e5   :  { %v2121_v58 = vpop.permute.xlu1 %2120 }
 0x6e7   :  { %v8033_v39 = vpop.eup %8032 }
 0x6e8   :  { %v1879_v40 = vsel %vm1385_vm11, %v8033_v39, 0.0 }
 0x6e9   :  { %1880 = vadd.xlane.f32.xlu0 %v1879_v40 }
 0x6eb   :  { %v8035_v41 = vpop.eup %8034 }
 0x6ec   :  { %v1876_v42 = vsel %vm1385_vm11, %v8035_v41, 0.0 }
 0x6ed   :  { %1877 = vadd.xlane.f32.xlu0 %v1876_v42 }
 0x703   :  { %1889 = vrot.lane.b32.xlu0 %v8633_v57, %s8175_s12 }
 0x707   :  { %2042 = vrot.lane.b32.xlu0 %v8615_v52, %s8176_s20 }
 0x772   :  { %v1881_v43 = vpop.xlane.xlu0 %1880 }
 0x773   :  { %8036 = vrcp.f32 %v1881_v43 }
 0x776   :  { %v1878_v44 = vpop.xlane.xlu0 %1877 }
 0x777   :  { %8038 = vrcp.f32 %v1878_v44 }
 0x77a   :  { %v1890_v46 = vpop.permute.xlu0 %1889 }
 0x77b   :  { %7651 = vmatpush3.msra.mxu1 %v1890_v46 }
 0x77c   :  { %7660 = vmatprep.subr.mxu1 %v8171_v2 }
 0x77e   :  { %v2043_v59 = vpop.permute.xlu0 %2042 }
 0x780   :  { %v8037_v48 = vpop.eup %8036 }
 0x781   :  { %v8691_v53 = vmul.f32 %v8037_v48, %v8033_v39 }
 0x783   :  { %7658 = vmatmul.mubr.msk.f32.vlgmr.msra.gmra.mxu0 %vm1385_vm11, %v8691_v53  ;;  %v1887_v29 = vadd.f32 %v8691_v53, %v8647_v16 }
 0x784   :  { %v8039_v54 = vpop.eup %8038  ;;  %7666 = vmatpush3.xpose.msk.msra.mxu0 %vm1385_vm11, %v2123_v49  ;;  %7667 = vmatprep.mubr.msk.f32.mxu0 %vm8172_vm2, %v8171_v2 }
 0x785   :  { %v8698_v56 = vmul.f32 %v8039_v54, %v8035_v41  ;;  %7675 = vmatprep.subr.mxu0 %v8171_v2 }
 0x787   :  { %7653 = vmatmul.mubr.msk.f32.vlgmr.msra.gmra.mxu1 %vm1385_vm11, %v8698_v56  ;;  %7668 = vmatmul.mubr.msk.f32.vlgmr.msra.gmra.mxu0 %vm1385_vm11, %v2121_v58  ;;  %v1886_v33 = vadd.f32 %v8698_v56, %v8654_v18 }
 0x788   :  { %7661 = vmatpush3.xpose.msk.msra.mxu1 %vm1385_vm11, %v2045_v45  ;;  %7662 = vmatprep.mubr.msk.f32.mxu1 %vm8172_vm2, %v8171_v2 }
 0x789   :  { %7670 = vmatprep.subr.mxu1 %v8171_v2  ;;  %7677 = vmatprep.mubr.msk.f32.mxu0 %vm8172_vm2, %v8171_v2 }
 0x78b   :  { %7663 = vmatmul.mubr.msk.f32.vlgmr.msra.gmra.mxu1 %vm1385_vm11, %v2043_v59 }
 0x78c   :  { %7672 = vmatprep.mubr.msk.f32.mxu1 %vm8172_vm2, %v8171_v2 }
 0x843   :  { %v8713_v60 = vpop.f32.mrf.mxu0 }
 0x845   :  { %v7659_v61 = vpop.f32.mrf.mxu0 }
 0x847   :  { %v8715_v62 = vpop.f32.mrf.mxu1  ;;  %v2194_v63 = vpop.f32.mrf.mxu0 }
 0x848   :  { %v2201_v0 = vsel %vm1385_vm11, %v2194_v63, -inf }
 0x849   :  { %v7654_v1 = vpop.f32.mrf.mxu1  ;;  %2202 = vmax.xlane.f32.xlu1 %v2201_v0  ;;  %v7669_v3 = vpop.f32.mrf.mxu0 }
 0x84b   :  { %v2116_v4 = vpop.f32.mrf.mxu1 }
 0x84c   :  { %v2198_v5 = vsel %vm1385_vm11, %v2116_v4, -inf }
 0x84d   :  { %2199 = vmax.xlane.f32.xlu0 %v2198_v5  ;;  %v7664_v6 = vpop.f32.mrf.mxu1 }
 0x85a   :  { %2298 = vrot.lane.b32.xlu1 %v8631_v55, %s8176_s20 }
 0x85e   :  { %2376 = vrot.lane.b32.xlu1 %v8606_v50, %s8177_s4 }
 0x862   :  { %2454 = vrot.lane.b32.xlu1 %v8604_v47, %s8177_s4 }
 0x866   :  { %2452 = vrot.lane.b32.xlu1 %v8612_v51, %s8177_s4 }
 0x8d2   :  { %v2203_v7 = vpop.xlane.xlu1 %2202 }
 0x8d3   :  { %v2205_v8 = vsub.f32 %v2194_v63, %v2203_v7 }
 0x8d5   :  { %v2208_v9 = vmul.f32 1.442695, %v2205_v8 }
 0x8d6   :  { %v2200_v10 = vpop.xlane.xlu0 %2199  ;;  %v2299_v11 = vpop.permute.xlu1 %2298 }
 0x8d7   :  { %8040 = vpow2.f32 %v2208_v9  ;;  %v2204_v12 = vsub.f32 %v2116_v4, %v2200_v10  ;;  %7676 = vmatpush3.msra.mxu0 %v2299_v11 }
 0x8d8   :  { %7685 = vmatprep.subr.mxu0 %v8171_v2 }
 0x8d9   :  { %v2206_v13 = vmul.f32 1.442695, %v2204_v12 }
 0x8da   :  { %v2377_v25 = vpop.permute.xlu1 %2376 }
 0x8db   :  { %8042 = vpow2.f32 %v2206_v13 }
 0x8de   :  { %v2455_v28 = vpop.permute.xlu1 %2454 }
 0x8e2   :  { %v2453_v24 = vpop.permute.xlu1 %2452 }
 0x8e4   :  { %v8041_v14 = vpop.eup %8040 }
 0x8e5   :  { %v2213_v15 = vsel %vm1385_vm11, %v8041_v14, 0.0 }
 0x8e6   :  { %2214 = vadd.xlane.f32.xlu0 %v2213_v15 }
 0x8e8   :  { %v8043_v17 = vpop.eup %8042 }
 0x8e9   :  { %v2210_v19 = vsel %vm1385_vm11, %v8043_v17, 0.0 }
 0x8ea   :  { %2211 = vadd.xlane.f32.xlu0 %v2210_v19 }
 0x900   :  { %2222 = vrot.lane.b32.xlu0 %v8633_v57, %s8176_s20 }
 0x904   :  { %2374 = vrot.lane.b32.xlu0 %v8615_v52, %s8177_s4 }
 0x96f   :  { %v2215_v20 = vpop.xlane.xlu0 %2214 }
 0x970   :  { %8044 = vrcp.f32 %v2215_v20 }
 0x973   :  { %v2212_v22 = vpop.xlane.xlu0 %2211 }
 0x974   :  { %8046 = vrcp.f32 %v2212_v22 }
 0x977   :  { %v2223_v26 = vpop.permute.xlu0 %2222 }
 0x978   :  { %7671 = vmatpush3.msra.mxu1 %v2223_v26 }
 0x979   :  { %7680 = vmatprep.subr.mxu1 %v8171_v2 }
 0x97b   :  { %v2375_v16 = vpop.permute.xlu0 %2374 }
 0x97d   :  { %v8045_v27 = vpop.eup %8044 }
 0x97e   :  { %v2219_v30 = vmul.f32 %v8045_v27, %v8041_v14 }
 0x980   :  { %v8737_v31 = vadd.f32 %v2219_v30, %v1887_v29  ;;  %7678 = vmatmul.mubr.msk.f32.vlgmr.msra.gmra.mxu0 %vm1385_vm11, %v2219_v30 }
 0x981   :  { %v8047_v32 = vpop.eup %8046  ;;  %7686 = vmatpush3.xpose.msk.msra.mxu0 %vm1385_vm11, %v2455_v28  ;;  %7687 = vmatprep.mubr.msk.f32.mxu0 %vm8172_vm2, %v8171_v2 }
 0x982   :  { %v2217_v34 = vmul.f32 %v8047_v32, %v8043_v17  ;;  %7695 = vmatprep.subr.mxu0 %v8171_v2 }
 0x984   :  { %v8746_v35 = vadd.f32 %v2217_v34, %v1886_v33  ;;  %7673 = vmatmul.mubr.msk.f32.vlgmr.msra.gmra.mxu1 %vm1385_vm11, %v2217_v34  ;;  %7688 = vmatmul.mubr.msk.f32.vlgmr.msra.gmra.mxu0 %vm1385_vm11, %v2453_v24 }
 0x985   :  { %7681 = vmatpush3.xpose.msk.msra.mxu1 %vm1385_vm11, %v2377_v25  ;;  %7682 = vmatprep.mubr.msk.f32.mxu1 %vm8172_vm2, %v8171_v2 }
 0x986   :  { %7690 = vmatprep.subr.mxu1 %v8171_v2  ;;  %7697 = vmatprep.mubr.msk.f32.mxu0 %vm8172_vm2, %v8171_v2 }
 0x988   :  { %7683 = vmatmul.mubr.msk.f32.vlgmr.msra.gmra.mxu1 %vm1385_vm11, %v2375_v16 }
 0x989   :  { %7692 = vmatprep.mubr.msk.f32.mxu1 %vm8172_vm2, %v8171_v2 }
 0xa40   :  { %v8759_v18 = vpop.f32.mrf.mxu0 }
 0xa42   :  { %v7679_v36 = vpop.f32.mrf.mxu0 }
 0xa44   :  { %v8761_v38 = vpop.f32.mrf.mxu1  ;;  %v2526_v39 = vpop.f32.mrf.mxu0 }
 0xa45   :  { %v2533_v40 = vsel %vm1385_vm11, %v2526_v39, -inf }
 0xa46   :  { %v7674_v41 = vpop.f32.mrf.mxu1  ;;  %2534 = vmax.xlane.f32.xlu1 %v2533_v40  ;;  %v7689_v42 = vpop.f32.mrf.mxu0 }
 0xa48   :  { %v2448_v43 = vpop.f32.mrf.mxu1 }
 0xa49   :  { %v2530_v44 = vsel %vm1385_vm11, %v2448_v43, -inf }
 0xa4a   :  { %2531 = vmax.xlane.f32.xlu0 %v2530_v44  ;;  %v7684_v45 = vpop.f32.mrf.mxu1 }
 0xa57   :  { %2630 = vrot.lane.b32.xlu1 %v8631_v55, %s8177_s4 }
 0xa5b   :  { %2708 = vrot.lane.b32.xlu1 %v8606_v50, %s8178_s22 }
 0xa5f   :  { %2786 = vrot.lane.b32.xlu1 %v8604_v47, %s8178_s22 }
 0xa63   :  { %2784 = vrot.lane.b32.xlu1 %v8612_v51, %s8178_s22 }
 0xacf   :  { %v2535_v46 = vpop.xlane.xlu1 %2534 }
 0xad0   :  { %v2537_v48 = vsub.f32 %v2526_v39, %v2535_v46 }
 0xad2   :  { %v2540_v49 = vmul.f32 1.442695, %v2537_v48 }
 0xad3   :  { %v2532_v53 = vpop.xlane.xlu0 %2531  ;;  %v2631_v54 = vpop.permute.xlu1 %2630 }
 0xad4   :  { %8048 = vpow2.f32 %v2540_v49  ;;  %v2536_v56 = vsub.f32 %v2448_v43, %v2532_v53  ;;  %7696 = vmatpush3.msra.mxu0 %v2631_v54 }
 0xad5   :  { %7705 = vmatprep.subr.mxu0 %v8171_v2 }
 0xad6   :  { %v2538_v58 = vmul.f32 1.442695, %v2536_v56 }
 0xad7   :  { %v2709_v4 = vpop.permute.xlu1 %2708 }
 0xad8   :  { %8050 = vpow2.f32 %v2538_v58 }
 0xadb   :  { %v2787_v7 = vpop.permute.xlu1 %2786 }
 0xadf   :  { %v2785_v12 = vpop.permute.xlu1 %2784 }
 0xae1   :  { %v8049_v59 = vpop.eup %8048 }
 0xae2   :  { %v2545_v61 = vsel %vm1385_vm11, %v8049_v59, 0.0 }
 0xae3   :  { %2546 = vadd.xlane.f32.xlu0 %v2545_v61 }
 0xae5   :  { %v8051_v63 = vpop.eup %8050 }
 0xae6   :  { %v2542_v0 = vsel %vm1385_vm11, %v8051_v63, 0.0 }
 0xae7   :  { %2543 = vadd.xlane.f32.xlu0 %v2542_v0 }
 0xafd   :  { %2554 = vrot.lane.b32.xlu0 %v8633_v57, %s8177_s4 }
 0xb01   :  { %2706 = vrot.lane.b32.xlu0 %v8615_v52, %s8178_s22 }
 0xb6c   :  { %v2547_v1 = vpop.xlane.xlu0 %2546 }
 0xb6d   :  { %8052 = vrcp.f32 %v2547_v1 }
 0xb70   :  { %v2544_v3 = vpop.xlane.xlu0 %2543 }
 0xb71   :  { %8054 = vrcp.f32 %v2544_v3 }
 0xb74   :  { %v2555_v5 = vpop.permute.xlu0 %2554 }
 0xb75   :  { %7691 = vmatpush3.msra.mxu1 %v2555_v5 }
 0xb76   :  { %7700 = vmatprep.subr.mxu1 %v8171_v2 }
 0xb78   :  { %v2707_v14 = vpop.permute.xlu0 %2706 }
 0xb7a   :  { %v8053_v6 = vpop.eup %8052 }
 0xb7b   :  { %v2551_v8 = vmul.f32 %v8053_v6, %v8049_v59 }
 0xb7d   :  { %v8782_v9 = vadd.f32 %v2551_v8, %v8737_v31  ;;  %7698 = vmatmul.mubr.msk.f32.vlgmr.msra.gmra.mxu0 %vm1385_vm11, %v2551_v8 }
 0xb7e   :  { %v8055_v10 = vpop.eup %8054  ;;  %7706 = vmatpush3.xpose.msk.msra.mxu0 %vm1385_vm11, %v2787_v7  ;;  %7707 = vmatprep.mubr.msk.f32.mxu0 %vm8172_vm2, %v8171_v2 }
 0xb7f   :  { %v2549_v11 = vmul.f32 %v8055_v10, %v8051_v63  ;;  %7715 = vmatprep.subr.mxu0 %v8171_v2 }
 0xb81   :  { %v8790_v13 = vadd.f32 %v2549_v11, %v8746_v35  ;;  %7693 = vmatmul.mubr.msk.f32.vlgmr.msra.gmra.mxu1 %vm1385_vm11, %v2549_v11  ;;  %7708 = vmatmul.mubr.msk.f32.vlgmr.msra.gmra.mxu0 %vm1385_vm11, %v2785_v12 }
 0xb82   :  { %7701 = vmatpush3.xpose.msk.msra.mxu1 %vm1385_vm11, %v2709_v4  ;;  %7702 = vmatprep.mubr.msk.f32.mxu1 %vm8172_vm2, %v8171_v2 }
 0xb83   :  { %7710 = vmatprep.subr.mxu1 %v8171_v2  ;;  %7717 = vmatprep.mubr.msk.f32.mxu0 %vm8172_vm2, %v8171_v2 }
 0xb85   :  { %7703 = vmatmul.mubr.msk.f32.vlgmr.msra.gmra.mxu1 %vm1385_vm11, %v2707_v14 }
 0xb86   :  { %7712 = vmatprep.mubr.msk.f32.mxu1 %vm8172_vm2, %v8171_v2 }
 0xc3d   :  { %v8803_v15 = vpop.f32.mrf.mxu0 }
 0xc3f   :  { %v7699_v17 = vpop.f32.mrf.mxu0 }
 0xc41   :  { %v8805_v19 = vpop.f32.mrf.mxu1  ;;  %v2858_v20 = vpop.f32.mrf.mxu0 }
 0xc42   :  { %v2865_v22 = vsel %vm1385_vm11, %v2858_v20, -inf }
 0xc43   :  { %v7694_v25 = vpop.f32.mrf.mxu1  ;;  %2866 = vmax.xlane.f32.xlu1 %v2865_v22  ;;  %v7709_v26 = vpop.f32.mrf.mxu0 }
 0xc45   :  { %v2780_v27 = vpop.f32.mrf.mxu1 }
 0xc46   :  { %v2862_v28 = vsel %vm1385_vm11, %v2780_v27, -inf }
 0xc47   :  { %2863 = vmax.xlane.f32.xlu0 %v2862_v28  ;;  %v7704_v29 = vpop.f32.mrf.mxu1 }
 0xc54   :  { %2962 = vrot.lane.b32.xlu1 %v8631_v55, %s8178_s22 }
 0xc58   :  { %3040 = vrot.lane.b32.xlu1 %v8606_v50, %s8179_s23 }
 0xc5c   :  { %3118 = vrot.lane.b32.xlu1 %v8604_v47, %s8179_s23 }
 0xc60   :  { %3116 = vrot.lane.b32.xlu1 %v8612_v51, %s8179_s23 }
 0xccc   :  { %v2867_v30 = vpop.xlane.xlu1 %2866 }
 0xccd   :  { %v2869_v31 = vsub.f32 %v2858_v20, %v2867_v30 }
 0xccf   :  { %v2872_v32 = vmul.f32 1.442695, %v2869_v31 }
 0xcd0   :  { %v2864_v33 = vpop.xlane.xlu0 %2863  ;;  %v2963_v34 = vpop.permute.xlu1 %2962 }
 0xcd1   :  { %8056 = vpow2.f32 %v2872_v32  ;;  %v2868_v24 = vsub.f32 %v2780_v27, %v2864_v33  ;;  %7716 = vmatpush3.msra.mxu0 %v2963_v34 }
 0xcd2   :  { %7725 = vmatprep.subr.mxu0 %v8171_v2 }
 0xcd3   :  { %v2870_v35 = vmul.f32 1.442695, %v2868_v24 }
 0xcd4   :  { %v3041_v43 = vpop.permute.xlu1 %3040 }
 0xcd5   :  { %8058 = vpow2.f32 %v2870_v35 }
 0xcd8   :  { %v3119_v46 = vpop.permute.xlu1 %3118 }
 0xcdc   :  { %v3117_v56 = vpop.permute.xlu1 %3116 }
 0xcde   :  { %v8057_v16 = vpop.eup %8056 }
 0xcdf   :  { %v2877_v36 = vsel %vm1385_vm11, %v8057_v16, 0.0 }
 0xce0   :  { %2878 = vadd.xlane.f32.xlu0 %v2877_v36 }
 0xce2   :  { %v8059_v39 = vpop.eup %8058 }
 0xce3   :  { %v2874_v40 = vsel %vm1385_vm11, %v8059_v39, 0.0 }
 0xce4   :  { %2875 = vadd.xlane.f32.xlu0 %v2874_v40 }
 0xcfa   :  { %2886 = vrot.lane.b32.xlu0 %v8633_v57, %s8178_s22 }
 0xcfe   :  { %3038 = vrot.lane.b32.xlu0 %v8615_v52, %s8179_s23 }
 0xd69   :  { %v2879_v41 = vpop.xlane.xlu0 %2878 }
 0xd6a   :  { %8060 = vrcp.f32 %v2879_v41 }
 0xd6d   :  { %v2876_v42 = vpop.xlane.xlu0 %2875 }
 0xd6e   :  { %8062 = vrcp.f32 %v2876_v42 }
 0xd71   :  { %v2887_v44 = vpop.permute.xlu0 %2886 }
 0xd72   :  { %7711 = vmatpush3.msra.mxu1 %v2887_v44 }
 0xd73   :  { %7720 = vmatprep.subr.mxu1 %v8171_v2 }
 0xd75   :  { %v3039_v59 = vpop.permute.xlu0 %3038 }
 0xd77   :  { %v8061_v45 = vpop.eup %8060 }
 0xd78   :  { %v2883_v48 = vmul.f32 %v8061_v45, %v8057_v16 }
 0xd7a   :  { %v8826_v49 = vadd.f32 %v2883_v48, %v8782_v9  ;;  %7718 = vmatmul.mubr.msk.f32.vlgmr.msra.gmra.mxu0 %vm1385_vm11, %v2883_v48 }
 0xd7b   :  { %v8063_v53 = vpop.eup %8062  ;;  %7726 = vmatpush3.xpose.msk.msra.mxu0 %vm1385_vm11, %v3119_v46  ;;  %7727 = vmatprep.mubr.msk.f32.mxu0 %vm8172_vm2, %v8171_v2 }
 0xd7c   :  { %v2881_v54 = vmul.f32 %v8063_v53, %v8059_v39  ;;  %7735 = vmatprep.subr.mxu0 %v8171_v2 }
 0xd7e   :  { %v8834_v58 = vadd.f32 %v2881_v54, %v8790_v13  ;;  %7713 = vmatmul.mubr.msk.f32.vlgmr.msra.gmra.mxu1 %vm1385_vm11, %v2881_v54  ;;  %7728 = vmatmul.mubr.msk.f32.vlgmr.msra.gmra.mxu0 %vm1385_vm11, %v3117_v56 }
 0xd7f   :  { %7721 = vmatpush3.xpose.msk.msra.mxu1 %vm1385_vm11, %v3041_v43  ;;  %7722 = vmatprep.mubr.msk.f32.mxu1 %vm8172_vm2, %v8171_v2 }
 0xd80   :  { %7730 = vmatprep.subr.mxu1 %v8171_v2  ;;  %7737 = vmatprep.mubr.msk.f32.mxu0 %vm8172_vm2, %v8171_v2 }
 0xd82   :  { %7723 = vmatmul.mubr.msk.f32.vlgmr.msra.gmra.mxu1 %vm1385_vm11, %v3039_v59 }
 0xd83   :  { %7732 = vmatprep.mubr.msk.f32.mxu1 %vm8172_vm2, %v8171_v2 }
 0xe3a   :  { %v8847_v61 = vpop.f32.mrf.mxu0 }
 0xe3c   :  { %v7719_v63 = vpop.f32.mrf.mxu0 }
 0xe3e   :  { %v8849_v0 = vpop.f32.mrf.mxu1  ;;  %v3190_v1 = vpop.f32.mrf.mxu0 }
 0xe3f   :  { %v3197_v3 = vsel %vm1385_vm11, %v3190_v1, -inf }
 0xe40   :  { %v7714_v4 = vpop.f32.mrf.mxu1  ;;  %3198 = vmax.xlane.f32.xlu1 %v3197_v3  ;;  %v7729_v5 = vpop.f32.mrf.mxu0 }
 0xe42   :  { %v3112_v6 = vpop.f32.mrf.mxu1 }
 0xe43   :  { %v3194_v7 = vsel %vm1385_vm11, %v3112_v6, -inf }
 0xe44   :  { %3195 = vmax.xlane.f32.xlu0 %v3194_v7  ;;  %v7724_v8 = vpop.f32.mrf.mxu1 }
 0xe51   :  { %3294 = vrot.lane.b32.xlu1 %v8631_v55, %s8179_s23 }
 0xe55   :  { %3372 = vrot.lane.b32.xlu1 %v8606_v50, %s8180_s26 }
 0xe59   :  { %3450 = vrot.lane.b32.xlu1 %v8604_v47, %s8180_s26 }
 0xe5d   :  { %3448 = vrot.lane.b32.xlu1 %v8612_v51, %s8180_s26 }
 0xec9   :  { %v3199_v9 = vpop.xlane.xlu1 %3198 }
 0xeca   :  { %v3201_v10 = vsub.f32 %v3190_v1, %v3199_v9 }
 0xecc   :  { %v3204_v11 = vmul.f32 1.442695, %v3201_v10 }
 0xecd   :  { %v3196_v12 = vpop.xlane.xlu0 %3195  ;;  %v3295_v13 = vpop.permute.xlu1 %3294 }
 0xece   :  { %8064 = vpow2.f32 %v3204_v11  ;;  %v3200_v14 = vsub.f32 %v3112_v6, %v3196_v12  ;;  %7736 = vmatpush3.msra.mxu0 %v3295_v13 }
 0xecf   :  { %7745 = vmatprep.subr.mxu0 %v8171_v2 }
 0xed0   :  { %v3202_v17 = vmul.f32 1.442695, %v3200_v14 }
 0xed1   :  { %v3373_v29 = vpop.permute.xlu1 %3372 }
 0xed2   :  { %8066 = vpow2.f32 %v3202_v17 }
 0xed5   :  { %v3451_v32 = vpop.permute.xlu1 %3450 }
 0xed9   :  { %v3449_v16 = vpop.permute.xlu1 %3448 }
 0xedb   :  { %v8065_v20 = vpop.eup %8064 }
 0xedc   :  { %v3209_v22 = vsel %vm1385_vm11, %v8065_v20, 0.0 }
 0xedd   :  { %3210 = vadd.xlane.f32.xlu0 %v3209_v22 }
 0xedf   :  { %v8067_v25 = vpop.eup %8066 }
 0xee0   :  { %v3206_v26 = vsel %vm1385_vm11, %v8067_v25, 0.0 }
 0xee1   :  { %3207 = vadd.xlane.f32.xlu0 %v3206_v26 }
 0xef7   :  { %3218 = vrot.lane.b32.xlu0 %v8633_v57, %s8179_s23 }
 0xefb   :  { %3370 = vrot.lane.b32.xlu0 %v8615_v52, %s8180_s26 }
 0xf66   :  { %v3211_v27 = vpop.xlane.xlu0 %3210 }
 0xf67   :  { %8068 = vrcp.f32 %v3211_v27 }
 0xf6a   :  { %v3208_v28 = vpop.xlane.xlu0 %3207 }
 0xf6b   :  { %8070 = vrcp.f32 %v3208_v28 }
 0xf6e   :  { %v3219_v30 = vpop.permute.xlu0 %3218 }
 0xf6f   :  { %7731 = vmatpush3.msra.mxu1 %v3219_v30 }
 0xf70   :  { %7740 = vmatprep.subr.mxu1 %v8171_v2 }
 0xf72   :  { %v3371_v39 = vpop.permute.xlu0 %3370 }
 0xf74   :  { %v8069_v31 = vpop.eup %8068 }
 0xf75   :  { %v3215_v33 = vmul.f32 %v8069_v31, %v8065_v20 }
 0xf77   :  { %v8870_v34 = vadd.f32 %v3215_v33, %v8826_v49  ;;  %7738 = vmatmul.mubr.msk.f32.vlgmr.msra.gmra.mxu0 %vm1385_vm11, %v3215_v33 }
 0xf78   :  { %v8071_v24 = vpop.eup %8070  ;;  %7746 = vmatpush3.xpose.msk.msra.mxu0 %vm1385_vm11, %v3451_v32  ;;  %7747 = vmatprep.mubr.msk.f32.mxu0 %vm8172_vm2, %v8171_v2 }
 0xf79   :  { %v3213_v35 = vmul.f32 %v8071_v24, %v8067_v25  ;;  %7755 = vmatprep.subr.mxu0 %v8171_v2 }
 0xf7b   :  { %v8878_v36 = vadd.f32 %v3213_v35, %v8834_v58  ;;  %7733 = vmatmul.mubr.msk.f32.vlgmr.msra.gmra.mxu1 %vm1385_vm11, %v3213_v35  ;;  %7748 = vmatmul.mubr.msk.f32.vlgmr.msra.gmra.mxu0 %vm1385_vm11, %v3449_v16 }
 0xf7c   :  { %7741 = vmatpush3.xpose.msk.msra.mxu1 %vm1385_vm11, %v3373_v29  ;;  %7742 = vmatprep.mubr.msk.f32.mxu1 %vm8172_vm2, %v8171_v2 }
 0xf7d   :  { %7750 = vmatprep.subr.mxu1 %v8171_v2  ;;  %7757 = vmatprep.mubr.msk.f32.mxu0 %vm8172_vm2, %v8171_v2 }
 0xf7f   :  { %7743 = vmatmul.mubr.msk.f32.vlgmr.msra.gmra.mxu1 %vm1385_vm11, %v3371_v39 }
 0xf80   :  { %7752 = vmatprep.mubr.msk.f32.mxu1 %vm8172_vm2, %v8171_v2 }
0x1037   :  { %v8891_v40 = vpop.f32.mrf.mxu0 }
0x1039   :  { %v7739_v41 = vpop.f32.mrf.mxu0 }
0x103b   :  { %v8893_v42 = vpop.f32.mrf.mxu1  ;;  %v3522_v43 = vpop.f32.mrf.mxu0 }
0x103c   :  { %v3529_v44 = vsel %vm1385_vm11, %v3522_v43, -inf }
0x103d   :  { %v7734_v45 = vpop.f32.mrf.mxu1  ;;  %3530 = vmax.xlane.f32.xlu1 %v3529_v44  ;;  %v7749_v46 = vpop.f32.mrf.mxu0 }
0x103e   :  { %v4120_v45 = vld [vmem:[%s9399_s15 + $0x38] sm:$0xff]  ;;  %v4119_v46 = vld [vmem:[%s9399_s15 + $0x30] sm:$0xff] }
0x103f   :  { %v3444_v48 = vpop.f32.mrf.mxu1 }
0x1040   :  { %v3526_v49 = vsel %vm1385_vm11, %v3444_v48, -inf }
0x1041   :  { %3527 = vmax.xlane.f32.xlu0 %v3526_v49  ;;  %v7744_v53 = vpop.f32.mrf.mxu1  ;;  %v4117_v49 = vld [vmem:[%s9399_s15 + $0x20] sm:$0xff] }
0x1042   :  { %v4116_v53 = vld [vmem:[%s9399_s15 + $0x18] sm:$0xff] }
0x104e   :  { %3626 = vrot.lane.b32.xlu1 %v8631_v55, %s8180_s26 }
0x1052   :  { %3704 = vrot.lane.b32.xlu1 %v8606_v50, %s8181_s28 }
0x1056   :  { %3782 = vrot.lane.b32.xlu1 %v8604_v47, %s8181_s28 }
0x105a   :  { %3780 = vrot.lane.b32.xlu1 %v8612_v51, %s8181_s28 }
0x10c6   :  { %v3531_v54 = vpop.xlane.xlu1 %3530 }
0x10c7   :  { %v3533_v56 = vsub.f32 %v3522_v43, %v3531_v54  ;;  %v4115_v54 = vld [vmem:[%s9399_s15 + $0x10] sm:$0xff] }
0x10c9   :  { %v3536_v58 = vmul.f32 1.442695, %v3533_v56  ;;  %v4114_v56 = vld [vmem:[%s9399_s15 + $0x8] sm:$0xff] }
0x10ca   :  { %v3528_v59 = vpop.xlane.xlu0 %3527  ;;  %v3627_v63 = vpop.permute.xlu1 %3626 }
0x10cb   :  { %8072 = vpow2.f32 %v3536_v58  ;;  %v3532_v1 = vsub.f32 %v3444_v48, %v3528_v59  ;;  %7756 = vmatpush3.msra.mxu0 %v3627_v63  ;;  %v4118_v48 = vld [vmem:[%s9399_s15 + $0x28] sm:$0xff]  ;;  %v4113_v58 = vld [vmem:[%s9399_s15] sm:$0xff] }
0x10cc   :  { %7765 = vmatprep.subr.mxu0 %v8171_v2 }
0x10cd   :  { %v3534_v3 = vmul.f32 1.442695, %v3532_v1 }
0x10ce   :  { %v3705_v7 = vpop.permute.xlu1 %3704 }
0x10cf   :  { %8074 = vpow2.f32 %v3534_v3 }
0x10d2   :  { %v3783_v10 = vpop.permute.xlu1 %3782 }
0x10d6   :  { %v3781_v14 = vpop.permute.xlu1 %3780 }
0x10d8   :  { %v8073_v4 = vpop.eup %8072 }
0x10d9   :  { %v3541_v50 = vsel %vm1385_vm11, %v8073_v4, 0.0 }
0x10da   :  { %3542 = vadd.xlane.f32.xlu0 %v3541_v50 }
0x10dc   :  { %v8075_v47 = vpop.eup %8074 }
0x10dd   :  { %v3538_v5 = vsel %vm1385_vm11, %v8075_v47, 0.0 }
0x10de   :  { %3539 = vadd.xlane.f32.xlu0 %v3538_v5 }
0x10f4   :  { %3550 = vrot.lane.b32.xlu0 %v8633_v57, %s8180_s26 }
0x10f8   :  { %3702 = vrot.lane.b32.xlu0 %v8615_v52, %s8181_s28 }
0x1163   :  { %v3543_v51 = vpop.xlane.xlu0 %3542 }
0x1164   :  { %8076 = vrcp.f32 %v3543_v51 }
0x1167   :  { %v3540_v6 = vpop.xlane.xlu0 %3539 }
0x1168   :  { %8078 = vrcp.f32 %v3540_v6 }
0x116b   :  { %v3551_v8 = vpop.permute.xlu0 %3550 }
0x116c   :  { %7751 = vmatpush3.msra.mxu1 %v3551_v8 }
0x116d   :  { %7760 = vmatprep.subr.mxu1 %v8171_v2 }
0x116f   :  { %v3703_v20 = vpop.permute.xlu0 %3702 }
0x1171   :  { %v8077_v9 = vpop.eup %8076 }
0x1172   :  { %v3547_v11 = vmul.f32 %v8077_v9, %v8073_v4 }
0x1174   :  { %7758 = vmatmul.mubr.msk.f32.vlgmr.msra.gmra.mxu0 %vm1385_vm11, %v3547_v11  ;;  %v8915_v12 = vadd.f32 %v3547_v11, %v8870_v34 }
0x1175   :  { %v8079_v13 = vpop.eup %8078  ;;  %7766 = vmatpush3.xpose.msk.msra.mxu0 %vm1385_vm11, %v3783_v10  ;;  %7767 = vmatprep.mubr.msk.f32.mxu0 %vm8172_vm2, %v8171_v2 }
0x1176   :  { %v3545_v52 = vmul.f32 %v8079_v13, %v8075_v47  ;;  %7775 = vmatprep.subr.mxu0 %v8171_v2 }
0x1178   :  { %7753 = vmatmul.mubr.msk.f32.vlgmr.msra.gmra.mxu1 %vm1385_vm11, %v3545_v52  ;;  %7768 = vmatmul.mubr.msk.f32.vlgmr.msra.gmra.mxu0 %vm1385_vm11, %v3781_v14  ;;  %v8924_v17 = vadd.f32 %v3545_v52, %v8878_v36 }
0x1179   :  { %7761 = vmatpush3.xpose.msk.msra.mxu1 %vm1385_vm11, %v3705_v7  ;;  %7762 = vmatprep.mubr.msk.f32.mxu1 %vm8172_vm2, %v8171_v2 }
0x117a   :  { %7770 = vmatprep.subr.mxu1 %v8171_v2  ;;  %7777 = vmatprep.mubr.msk.f32.mxu0 %vm8172_vm2, %v8171_v2 }
0x117c   :  { %7763 = vmatmul.mubr.msk.f32.vlgmr.msra.gmra.mxu1 %vm1385_vm11, %v3703_v20 }
0x117d   :  { %7772 = vmatprep.mubr.msk.f32.mxu1 %vm8172_vm2, %v8171_v2 }
0x1234   :  { %v3698_v22 = vpop.f32.mrf.mxu0 }
0x1236   :  { %v7759_v25 = vpop.f32.mrf.mxu0 }
0x1238   :  { %v3622_v26 = vpop.f32.mrf.mxu1  ;;  %v3854_v27 = vpop.f32.mrf.mxu0 }
0x1239   :  { %v3861_v28 = vsel %vm1385_vm11, %v3854_v27, -inf }
0x123a   :  { %v7754_v29 = vpop.f32.mrf.mxu1  ;;  %3862 = vmax.xlane.f32.xlu1 %v3861_v28  ;;  %v7769_v30 = vpop.f32.mrf.mxu0 }
0x123c   :  { %v3776_v31 = vpop.f32.mrf.mxu1 }
0x123d   :  { %v3858_v32 = vsel %vm1385_vm11, %v3776_v31, -inf }
0x123e   :  { %3859 = vmax.xlane.f32.xlu0 %v3858_v32  ;;  %v7764_v33 = vpop.f32.mrf.mxu1 }
0x123f   :  { %v6886_v33 = vld [vmem:[%s9400_s0] ss:$0 sm:$0xff] }
0x124b   :  { %3958 = vrot.lane.b32.xlu1 %v8631_v55, %s8181_s28 }
0x124f   :  { %4040 = vrot.lane.b32.xlu1 %v8715_v62, %s8182_s1 }
0x1253   :  { %4042 = vrot.lane.b32.xlu1 %v8713_v60, %s8182_s1 }
0x1257   :  { %4050 = vrot.lane.b32.xlu1 %v8759_v18, %s8183_s2 }
0x125b   :  { %4058 = vrot.lane.b32.xlu1 %v8803_v15, %s8184_s10 }
0x125f   :  { %4066 = vrot.lane.b32.xlu1 %v8847_v61, %s8185_s7 }
0x1263   :  { %4074 = vrot.lane.b32.xlu1 %v8891_v40, %s8186_s11 }
0x1267   :  { %4082 = vrot.lane.b32.xlu1 %v3698_v22, %s8187_s16 }
0x12c3   :  { %v3863_v2 = vpop.xlane.xlu1 %3862 }
0x12c4   :  { %v3865_v55 = vsub.f32 %v3854_v27, %v3863_v2 }
0x12c6   :  { %v3868_v62 = vmul.f32 1.442695, %v3865_v55 }
0x12c7   :  { %v3860_v34 = vpop.xlane.xlu0 %3859  ;;  %v3959_v24 = vpop.permute.xlu1 %3958 }
0x12c8   :  { %8080 = vpow2.f32 %v3868_v62  ;;  %v3864_v60 = vsub.f32 %v3776_v31, %v3860_v34  ;;  %7776 = vmatpush3.msra.mxu0 %v3959_v24  ;;  %v8104_v24 = vld [vmem:[#allocation2 + $0x8] sm:$0xff] }
0x12ca   :  { %v3866_v18 = vmul.f32 1.442695, %v3864_v60 }
0x12cb   :  { %v4041_v4 = vpop.permute.xlu1 %4040 }
0x12cc   :  { %8082 = vpow2.f32 %v3866_v18  ;;  %v4094_v11 = vsel %vm1385_vm11, %v8671_v23, %v4041_v4 }
0x12cf   :  { %v4043_v50 = vpop.permute.xlu1 %4042 }
0x12d0   :  { %v4095_v13 = vsel %vm1385_vm11, %v8669_v21, %v4043_v50 }
0x12d3   :  { %v4051_v47 = vpop.permute.xlu1 %4050 }
0x12d5   :  { %v8081_v35 = vpop.eup %8080 }
0x12d6   :  { %v3873_v15 = vsel %vm1385_vm11, %v8081_v35, 0.0 }
0x12d7   :  { %3874 = vadd.xlane.f32.xlu0 %v3873_v15  ;;  %v4059_v51 = vpop.permute.xlu1 %4058 }
0x12d9   :  { %v8083_v61 = vpop.eup %8082 }
0x12da   :  { %v3870_v16 = vsel %vm1385_vm11, %v8083_v61, 0.0 }
0x12db   :  { %3871 = vadd.xlane.f32.xlu0 %v3870_v16  ;;  %v4067_v7 = vpop.permute.xlu1 %4066 }
0x12df   :  { %v4075_v9 = vpop.permute.xlu1 %4074 }
0x12f1   :  { %3882 = vrot.lane.b32.xlu0 %v8633_v57, %s8181_s28 }
0x12f5   :  { %4048 = vrot.lane.b32.xlu0 %v8761_v38, %s8183_s2 }
0x12f9   :  { %4056 = vrot.lane.b32.xlu0 %v8805_v19, %s8184_s10 }
0x12fd   :  { %4064 = vrot.lane.b32.xlu0 %v8849_v0, %s8185_s7 }
0x1301   :  { %4072 = vrot.lane.b32.xlu0 %v8893_v42, %s8186_s11 }
0x1305   :  { %4080 = vrot.lane.b32.xlu0 %v3622_v26, %s8187_s16 }
0x1360   :  { %v3875_v36 = vpop.xlane.xlu0 %3874 }
0x1361   :  { %8084 = vrcp.f32 %v3875_v36 }
0x1364   :  { %v3872_v39 = vpop.xlane.xlu0 %3871 }
0x1365   :  { %8086 = vrcp.f32 %v3872_v39 }
0x1368   :  { %v3883_v40 = vpop.permute.xlu0 %3882 }
0x1369   :  { %7771 = vmatpush3.msra.mxu1 %v3883_v40 }
0x136a   :  { %7780 = vmatprep.subr.mxu1 %v4120_v45 }
0x136c   :  { %v4049_v5 = vpop.permute.xlu0 %4048 }
0x136d   :  { %v4097_v52 = vsel %vm4096_vm12, %v4094_v11, %v4049_v5  ;;  %v4281_v5 = vld [vmem:[%s9401_s5 + $0xc0] sm:$0xff] }
0x136e   :  { %v8085_v41 = vpop.eup %8084  ;;  %v4257_v11 = vld [vmem:[%s9401_s5] sm:$0xff] }
0x136f   :  { %v3879_v57 = vmul.f32 %v8085_v41, %v8081_v35  ;;  %v8105_v35 = vld [vmem:[#allocation2] sm:$0xff] }
0x1370   :  { %v4057_v6 = vpop.permute.xlu0 %4056 }
0x1371   :  { %7778 = vmatmul.mubr.msk.f32.vlgmr.msra.gmra.mxu0 %vm1385_vm11, %v3879_v57  ;;  %v3881_v38 = vadd.f32 %v3879_v57, %v8915_v12  ;;  %v4083_v12 = vpop.permute.xlu1 %4082  ;;  %v4100_v20 = vsel %vm4099_vm13, %v4097_v52, %v4057_v6 }
0x1372   :  { %v8087_v19 = vpop.eup %8086 }
0x1373   :  { %v3877_v0 = vmul.f32 %v8087_v19, %v8083_v61  ;;  %v4035_v42 = vmul.f32 0.125, %v3881_v38 }
0x1374   :  { %v4065_v8 = vpop.permute.xlu0 %4064 }
0x1375   :  { %7773 = vmatmul.mubr.msk.f32.vlgmr.msra.gmra.mxu1 %vm1385_vm11, %v3877_v0  ;;  %v3880_v43 = vadd.f32 %v3877_v0, %v8924_v17  ;;  %4037 = vst.msk [vmem:[#allocation4 + $0x8] sm:$0xff] %vm1385_vm11, %v4035_v42  ;;  %v4098_v17 = vsel %vm4096_vm12, %v4095_v13, %v4051_v47  ;;  %v4102_v25 = vsel %vm280_vm5, %v4100_v20, %v4065_v8  ;;  %v4273_v47 = vld [vmem:[%s9401_s5 + $0x80] sm:$0xff]  ;;  %v4258_v13 = vld [vmem:[%s9401_s5 + $0x8] sm:$0xff] }
0x1376   :  { %7781 = vmatpush3.msra.mxu1 %v4120_v45  ;;  %v4101_v22 = vsel %vm4099_vm13, %v4098_v17, %v4059_v51  ;;  %v4306_v45 = vld [vmem:[%s9401_s5 + $0x188] sm:$0xff]  ;;  %v6908_v6 = vcombine.high %v4273_v47, %v4281_v5  ;;  %v6907_v8 = vcombine.low %v4273_v47, %v4281_v5  ;;  %v4309_v5 = vld [vmem:[%s9401_s5 + $0x1a0] sm:$0xff] }
0x1377   :  { %v4034_v44 = vmul.f32 0.125, %v3880_v43  ;;  %7782 = vmatprep.subr.mxu1 %v4119_v46  ;;  %v4103_v26 = vsel %vm280_vm5, %v4101_v22, %v4067_v7  ;;  %v4305_v43 = vld [vmem:[%s9401_s5 + $0x180] sm:$0xff]  ;;  %v4274_v51 = vld [vmem:[%s9401_s5 + $0x88] sm:$0xff] }
0x1378   :  { %7783 = vmatpush3.msra.mxu1 %v4119_v46  ;;  %v4073_v10 = vpop.permute.xlu0 %4072  ;;  %v4106_v28 = vsel %vm4104_vm14, %v4103_v26, %v4075_v9  ;;  %v4282_v7 = vld [vmem:[%s9401_s5 + $0xc8] sm:$0xff]  ;;  %v4315_v26 = vld [vmem:[%s9401_s5 + $0x1d0] sm:$0xff] }
0x1379   :  { %4036 = vst.msk [vmem:[#allocation4] sm:$0xff] %vm1385_vm11, %v4034_v44  ;;  %7784 = vmatprep.subr.mxu1 %v4118_v48  ;;  %v4105_v27 = vsel %vm4104_vm14, %v4102_v25, %v4073_v10  ;;  %v4109_v31 = vsel %vm4107_vm15, %v4106_v28, %v4083_v12  ;;  %v4313_v44 = vld [vmem:[%s9401_s5 + $0x1c0] sm:$0xff]  ;;  %v6909_v9 = vcombine.low %v4274_v51, %v4282_v7  ;;  %v4307_v25 = vld [vmem:[%s9401_s5 + $0x190] sm:$0xff] }
0x137a   :  { %7785 = vmatpush3.msra.mxu1 %v4118_v48  ;;  %v6940_v46 = vcombine.high %v4305_v43, %v4313_v44  ;;  %v4314_v48 = vld [vmem:[%s9401_s5 + $0x1c8] sm:$0xff]  ;;  %v6910_v10 = vcombine.high %v4274_v51, %v4282_v7  ;;  %v4265_v12 = vld [vmem:[%s9401_s5 + $0x40] sm:$0xff]  ;;  %v6944_v28 = vcombine.high %v4307_v25, %v4315_v26 }
0x137b   :  { %7786 = vmatprep.subr.mxu1 %v4117_v49  ;;  %v6892_v52 = vcombine.high %v4257_v11, %v4265_v12  ;;  %v6891_v17 = vcombine.low %v4257_v11, %v4265_v12  ;;  %v4317_v51 = vld [vmem:[%s9401_s5 + $0x1e0] sm:$0xff]  ;;  %v4318_v7 = vld [vmem:[%s9401_s5 + $0x1e8] sm:$0xff] }
0x137c   :  { %7787 = vmatpush3.msra.mxu1 %v4117_v49  ;;  %v4081_v14 = vpop.permute.xlu0 %4080  ;;  %v6939_v49 = vcombine.low %v4305_v43, %v4313_v44  ;;  %4736 = vmatprep.subr.bf16.mxu0 %v6940_v46  ;;  %v4276_v46 = vld [vmem:[%s9401_s5 + $0x98] sm:$0xff]  ;;  %v4293_v12 = vld [vmem:[%s9401_s5 + $0x120] sm:$0xff] }
0x137d   :  { %7788 = vmatprep.subr.mxu1 %v4116_v53  ;;  %v4108_v29 = vsel %vm4107_vm15, %v4105_v27, %v4081_v14  ;;  %v4266_v14 = vld [vmem:[%s9401_s5 + $0x48] sm:$0xff]  ;;  %v4308_v27 = vld [vmem:[%s9401_s5 + $0x198] sm:$0xff] }
0x137e   :  { %7789 = vmatpush3.msra.mxu1 %v4116_v53  ;;  %v6941_v53 = vcombine.low %v4306_v45, %v4314_v48  ;;  %4737 = vmatpush1.bf16.msra.mxu0 %v6939_v49  ;;  %v6893_v20 = vcombine.low %v4258_v13, %v4266_v14  ;;  %v6894_v22 = vcombine.high %v4258_v13, %v4266_v14  ;;  %v4301_v13 = vld [vmem:[%s9401_s5 + $0x160] sm:$0xff]  ;;  %v4302_v14 = vld [vmem:[%s9401_s5 + $0x168] sm:$0xff] }
0x137f   :  { %7790 = vmatprep.subr.mxu1 %v4115_v54 }
0x1380   :  { %7791 = vmatpush3.msra.mxu1 %v4115_v54  ;;  %v6942_v54 = vcombine.high %v4306_v45, %v4314_v48  ;;  %v4275_v45 = vld [vmem:[%s9401_s5 + $0x90] sm:$0xff]  ;;  %v4284_v48 = vld [vmem:[%s9401_s5 + $0xd8] sm:$0xff] }
0x1381   :  { %7792 = vmatprep.subr.mxu1 %v4114_v56 }
0x1382   :  { %7793 = vmatpush3.msra.mxu1 %v4114_v56  ;;  %v4289_v56 = vld [vmem:[%s9401_s5 + $0x100] sm:$0xff] }
0x1383   :  { %7794 = vmatprep.subr.mxu1 %v4113_v58 }
0x1384   :  { %7795 = vmatpush3.msra.mxu1 %v4113_v58  ;;  %v4297_v58 = vld [vmem:[%s9401_s5 + $0x140] sm:$0xff] }
0x1385   :  { %4779 = vmatprep.subr.bf16.mxu1 %v6942_v54 }
0x1431   :  { %v4030_v59 = vpop.f32.mrf.mxu0 }
0x1432   :  { %4090 = vrot.lane.b32.xlu1 %v4030_v59, %s8188_s18  ;;  %v4290_v59 = vld [vmem:[%s9401_s5 + $0x108] sm:$0xff] }
0x1433   :  { %v7779_v63 = vpop.f32.mrf.mxu0 }
0x1434   :  { %v6924_v63 = vcombine.high %v4289_v56, %v4297_v58 }
0x1435   :  { %v3954_v1 = vpop.f32.mrf.mxu1 }
0x1436   :  { %4088 = vrot.lane.b32.xlu0 %v3954_v1, %s8188_s18  ;;  %v4298_v1 = vld [vmem:[%s9401_s5 + $0x148] sm:$0xff]  ;;  %4738 = vmatprep.subr.bf16.mxu0 %v6924_v63  ;;  %v4260_v63 = vld [vmem:[%s9401_s5 + $0x18] sm:$0xff] }
0x1437   :  { %v7774_v3 = vpop.f32.mrf.mxu1  ;;  %v6925_v4 = vcombine.low %v4290_v59, %v4298_v1  ;;  %v6926_v50 = vcombine.high %v4290_v59, %v4298_v1  ;;  %v4267_v59 = vld [vmem:[%s9401_s5 + $0x50] sm:$0xff]  ;;  %v4268_v1 = vld [vmem:[%s9401_s5 + $0x58] sm:$0xff] }
0x1438   :  { %v6923_v3 = vcombine.low %v4289_v56, %v4297_v58  ;;  %v6914_v56 = vcombine.high %v4276_v46, %v4284_v48  ;;  %v4259_v58 = vld [vmem:[%s9401_s5 + $0x10] sm:$0xff]  ;;  %v6898_v47 = vcombine.high %v4260_v63, %v4268_v1 }
0x143a   :  { %4739 = vmatpush1.bf16.msra.mxu0 %v6923_v3 }
0x143b   :  { %4740 = vmatprep.subr.bf16.mxu0 %v6908_v6  ;;  %v4310_v6 = vld [vmem:[%s9401_s5 + $0x1a8] sm:$0xff] }
0x143c   :  { %v6950_v11 = vcombine.high %v4310_v6, %v4318_v7 }
0x143e   :  { %4741 = vmatpush1.bf16.msra.mxu0 %v6907_v8  ;;  %v6895_v8 = vcombine.low %v4259_v58, %v4267_v59 }
0x143f   :  { %4742 = vmatprep.subr.bf16.mxu0 %v6892_v52  ;;  %v4294_v52 = vld [vmem:[%s9401_s5 + $0x128] sm:$0xff] }
0x1442   :  { %4743 = vmatpush1.bf16.msra.mxu0 %v6891_v17  ;;  %v6947_v17 = vcombine.low %v4309_v5, %v4317_v51 }
0x1443   :  { %4822 = vmatprep.subr.bf16.mxu0 %v6944_v28  ;;  %v4286_v28 = vld [vmem:[%s9401_s5 + $0xe8] sm:$0xff] }
0x14a4   :  { %v4091_v23 = vpop.permute.xlu1 %4090 }
0x14a5   :  { %v4112_v32 = vsel %vm4110_vm0, %v4109_v31, %v4091_v23  ;;  %v6943_v23 = vcombine.low %v4307_v25, %v4315_v26  ;;  %v6934_v25 = vcombine.high %v4294_v52, %v4302_v14  ;;  %v4277_v26 = vld [vmem:[%s9401_s5 + $0xa0] sm:$0xff] }
0x14a8   :  { %v4089_v30 = vpop.permute.xlu0 %4088 }
0x14a9   :  { %v4111_v21 = vsel %vm4110_vm0, %v4108_v29, %v4089_v30  ;;  %v4316_v29 = vld [vmem:[%s9401_s5 + $0x1d8] sm:$0xff]  ;;  %v8189_v30 = vmov 0  }
0x14aa   :  { %7796 = vmatprep.mubr.msk.f32.mxu1 %vm582_vm9, %v4111_v21  ;;  %4760 = vmatprep.mubr.bf16.mxu0 %v8189_v30  ;;  %v6945_v31 = vcombine.low %v4308_v27, %v4316_v29  ;;  %v6946_v21 = vcombine.high %v4308_v27, %v4316_v29  ;;  %v4285_v27 = vld [vmem:[%s9401_s5 + $0xe0] sm:$0xff]  ;;  %v6931_v29 = vcombine.low %v4293_v12, %v4301_v13 }
0x14ab   :  { %7797 = vmatmul.mubr.msk.f32.vlgmr.msra.gmra.mxu1 %vm582_vm9, %v4112_v32  ;;  %7893 = vset.pattern.permute.xlu0 %v8189_v30 }
0x14ac   :  { %4780 = vmatpush1.bf16.msra.mxu1 %v6941_v53  ;;  %4803 = vmatprep.mubr.bf16.mxu1 %v8189_v30 }
0x14ad   :  { %4781 = vmatprep.subr.bf16.mxu1 %v6926_v50  ;;  %7894 = vset.pattern.permute.xlu1 %v8189_v30  ;;  %v6896_v50 = vcombine.high %v4259_v58, %v4267_v59  ;;  %v4288_v58 = vld [vmem:[%s9401_s5 + $0xf8] sm:$0xff] }
0x14b0   :  { %4782 = vmatpush1.bf16.msra.mxu1 %v6925_v4  ;;  %v6913_v4 = vcombine.low %v4276_v46, %v4284_v48 }
0x14b1   :  { %4783 = vmatprep.subr.bf16.mxu1 %v6910_v10  ;;  %v6948_v10 = vcombine.high %v4309_v5, %v4317_v51  ;;  %v4272_v5 = vld [vmem:[%s9401_s5 + $0x78] sm:$0xff] }
0x14b4   :  { %4784 = vmatpush1.bf16.msra.mxu1 %v6909_v9  ;;  %v6897_v9 = vcombine.low %v4260_v63, %v4268_v1 }
0x14b5   :  { %4785 = vmatprep.subr.bf16.mxu1 %v6894_v22  ;;  %v6932_v22 = vcombine.high %v4293_v12, %v4301_v13  ;;  %v7898_v12 = vld [vmem:[%s9404_s17 + $0x38] sm:$0xff]  }
0x14b6   :  { %v7899_v13 = vld [vmem:[%s9404_s17 + $0xb8] sm:$0xff]  }
0x14b8   :  { %4786 = vmatpush1.bf16.msra.mxu1 %v6893_v20  ;;  %v6949_v20 = vcombine.low %v4310_v6, %v4318_v7 }
0x14b9   :  { %4865 = vmatprep.subr.bf16.mxu1 %v6946_v21  ;;  %v6916_v21 = vcombine.high %v4277_v26, %v4285_v27 }
0x156b   :  { %v7798_v2 = vpop.f32.mrf.mxu1 }
0x156c   :  { %v4206_v55 = vadd.f32 %v7798_v2, %v6886_v33 }
0x156d   :  { %v4200_v62 = vpop.f32.mrf.mxu1 }
0x156e   :  { %v4201_v34 = vadd.f32 %v6886_v33, %v4200_v62  ;;  %v4210_v60 = vadd.f32 %v8104_v24, %v4206_v55 }
0x1570   :  { %v4214_v18 = vsel %vm582_vm9, %v4210_v60, 0.0  ;;  %v4209_v15 = vadd.f32 %v8105_v35, %v4201_v34 }
0x1571   :  { %4215 = vadd.xlane.f32.xlu1 %v4214_v18  ;;  %v6889_v18 = vld [vmem:[%s9402_s9] ss:$0 sm:$0xff] }
0x1572   :  { %v4211_v61 = vsel %vm582_vm9, %v4209_v15, 0.0 }
0x1573   :  { %4212 = vadd.xlane.f32.xlu0 %v4211_v61 }
0x15fa   :  { %v4216_v16 = vpop.xlane.xlu1 %4215 }
0x15fb   :  { %v4219_v36 = vmul.f32 0.015625, %v4216_v16  ;;  %v6890_v16 = vld [vmem:[%s9403_s13] ss:$0 sm:$0xff] }
0x15fc   :  { %v4213_v39 = vpop.xlane.xlu0 %4212 }
0x15fd   :  { %v4218_v40 = vmul.f32 0.015625, %v4213_v39  ;;  %v8980_v41 = vsub.f32 %v4210_v60, %v4219_v36  ;;  %v4291_v39 = vld [vmem:[%s9401_s5 + $0x110] sm:$0xff] }
0x15ff   :  { %v8982_v57 = vsub.f32 %v4209_v15, %v4218_v40  ;;  %v4223_v0 = vmul.f32 %v8980_v41, %v8980_v41  ;;  %v4299_v40 = vld [vmem:[%s9401_s5 + $0x150] sm:$0xff] }
0x1600   :  { %v6928_v43 = vcombine.high %v4291_v39, %v4299_v40  ;;  %v6927_v49 = vcombine.low %v4291_v39, %v4299_v40 }
0x1601   :  { %v4222_v38 = vmul.f32 %v8982_v57, %v8982_v57  ;;  %v4227_v42 = vsel %vm582_vm9, %v4223_v0, 0.0 }
0x1603   :  { %v4224_v19 = vsel %vm582_vm9, %v4222_v38, 0.0  ;;  %v4292_v38 = vld [vmem:[%s9401_s5 + $0x118] sm:$0xff] }
0x1604   :  { %4225 = vadd.xlane.f32.xlu0 %v4224_v19  ;;  %v4300_v19 = vld [vmem:[%s9401_s5 + $0x158] sm:$0xff] }
0x1605   :  { %v6930_v44 = vcombine.high %v4292_v38, %v4300_v19  ;;  %v6929_v53 = vcombine.low %v4292_v38, %v4300_v19  ;;  %v4295_v19 = vld [vmem:[%s9401_s5 + $0x130] sm:$0xff] }
0x1608   :  { %4228 = vadd.xlane.f32.xlu0 %v4227_v42 }
0x168d   :  { %v4226_v32 = vpop.xlane.xlu0 %4225 }
0x168e   :  { %v4230_v33 = vmul.f32 0.015625, %v4226_v32 }
0x1690   :  { %v4232_v2 = vadd.f32 1e-05, %v4230_v33  ;;  %v4261_v33 = vld [vmem:[%s9401_s5 + $0x20] sm:$0xff] }
0x1691   :  { %v4229_v55 = vpop.xlane.xlu0 %4228 }
0x1692   :  { %8088 = vrsqrt.f32 %v4232_v2  ;;  %v4231_v62 = vmul.f32 0.015625, %v4229_v55  ;;  %v4269_v2 = vld [vmem:[%s9401_s5 + $0x60] sm:$0xff]  ;;  %v4262_v55 = vld [vmem:[%s9401_s5 + $0x28] sm:$0xff] }
0x1694   :  { %v4233_v34 = vadd.f32 1e-05, %v4231_v62  ;;  %v4270_v62 = vld [vmem:[%s9401_s5 + $0x68] sm:$0xff] }
0x1695   :  { %v6901_v39 = vcombine.low %v4262_v55, %v4270_v62 }
0x1696   :  { %8090 = vrsqrt.f32 %v4233_v34  ;;  %v6915_v34 = vcombine.low %v4277_v26, %v4285_v27  ;;  %v7906_v26 = vld [vmem:[%s9404_s17 + $0x28] sm:$0xff]  }
0x1697   :  { %v7907_v27 = vld [vmem:[%s9404_s17 + $0xa8] sm:$0xff]  }
0x169f   :  { %v8089_v24 = vpop.eup %8088 }
0x16a0   :  { %v4236_v60 = vmul.f32 %v8089_v24, %v8982_v57 }
0x16a2   :  { %v4245_v15 = vmul.f32 %v6889_v18, %v4236_v60  ;;  %v6900_v60 = vcombine.high %v4261_v33, %v4269_v2 }
0x16a3   :  { %v8091_v35 = vpop.eup %8090 }
0x16a4   :  { %v4237_v61 = vmul.f32 %v8091_v35, %v8980_v41  ;;  %v9022_v0 = vadd.f32 %v6890_v16, %v4245_v15  ;;  %v4283_v41 = vld [vmem:[%s9401_s5 + $0xd0] sm:$0xff] }
0x16a5   :  { %v6912_v54 = vcombine.high %v4275_v45, %v4283_v41  ;;  %v6911_v3 = vcombine.low %v4275_v45, %v4283_v41  ;;  %v4311_v35 = vld [vmem:[%s9401_s5 + $0x1b0] sm:$0xff]  ;;  %v4304_v45 = vld [vmem:[%s9401_s5 + $0x178] sm:$0xff] }
0x16a6   :  { %v4246_v36 = vmul.f32 %v6889_v18, %v4237_v61  ;;  %v6902_v18 = vcombine.high %v4262_v55, %v4270_v62  ;;  %v4319_v15 = vld [vmem:[%s9401_s5 + $0x1f0] sm:$0xff]  ;;  %v4312_v61 = vld [vmem:[%s9401_s5 + $0x1b8] sm:$0xff] }
0x16a7   :  { %v6952_v40 = vcombine.high %v4311_v35, %v4319_v15  ;;  %v6951_v41 = vcombine.low %v4311_v35, %v4319_v15  ;;  %v7917_v55 = vld [vmem:[%s9404_s17 + $0xd0] sm:$0xff]   ;;  %v7923_v35 = vld [vmem:[%s9404_s17 + $0x88] sm:$0xff]   ;;  %v7924_v15 = vld [vmem:[%s9404_s17 + $0x40] sm:$0xff]  }
0x16a8   :  { %v9024_v42 = vadd.f32 %v6890_v16, %v4246_v36  ;;  %v4320_v16 = vld [vmem:[%s9401_s5 + $0x1f8] sm:$0xff]  ;;  %v6899_v36 = vcombine.low %v4261_v33, %v4269_v2  ;;  %v7916_v2 = vld [vmem:[%s9404_s17 + $0x50] sm:$0xff]  }
0x16a9   :  { %v6954_v38 = vcombine.high %v4312_v61, %v4320_v16  ;;  %v6953_v46 = vcombine.low %v4312_v61, %v4320_v16  ;;  %v7915_v33 = vld [vmem:[%s9404_s17 + $0x98] sm:$0xff]   ;;  %v7918_v62 = vld [vmem:[%s9404_s17 + $0x10] sm:$0xff]   ;;  %v7925_v61 = vld [vmem:[%s9404_s17 + $0xc0] sm:$0xff]  }
0x16aa   :  { %v9028_v57 = vpack.c.bf16 %v9024_v42, %v9022_v0  ;;  %v7926_v16 = vld [vmem:[%s9404_s17] sm:$0xff]  }
0x16ac   :  { %6955 = vmatmul.mubr.msk.bf16.vlgmr.msra.gmra.mxu0 %vm582_vm9, %v9028_v57  ;;  %6956 = vmatmul.mubr.msk.bf16.vlgmr.msra.gmra.mxu1 %vm582_vm9, %v9028_v57 }
0x16ad   :  { %4823 = vmatpush1.bf16.msra.mxu0 %v6943_v23  ;;  %4866 = vmatpush1.bf16.msra.mxu1 %v6945_v31  ;;  %v4278_v23 = vld [vmem:[%s9401_s5 + $0xa8] sm:$0xff]  ;;  %v6933_v31 = vcombine.low %v4294_v52, %v4302_v14  ;;  %v7900_v52 = vld [vmem:[%s9404_s17 + $0x70] sm:$0xff]  }
0x16ae   :  { %4824 = vmatprep.subr.bf16.mxu0 %v6928_v43  ;;  %4867 = vmatprep.subr.bf16.mxu1 %v6930_v44  ;;  %v6918_v32 = vcombine.high %v4278_v23, %v4286_v28  ;;  %v6917_v24 = vcombine.low %v4278_v23, %v4286_v28  ;;  %v4303_v43 = vld [vmem:[%s9401_s5 + $0x170] sm:$0xff]  ;;  %v4296_v44 = vld [vmem:[%s9401_s5 + $0x138] sm:$0xff]  ;;  %v7909_v23 = vld [vmem:[%s9404_s17 + $0xe0] sm:$0xff]  }
0x16af   :  { %4846 = vmatprep.mubr.bf16.mxu0 %v8189_v30  ;;  %4889 = vmatprep.mubr.bf16.mxu1 %v8189_v30  ;;  %v6936_v48 = vcombine.high %v4295_v19, %v4303_v43  ;;  %v6935_v59 = vcombine.low %v4295_v19, %v4303_v43  ;;  %v6937_v63 = vcombine.low %v4296_v44, %v4304_v45  ;;  %v7901_v14 = vld [vmem:[%s9404_s17 + $0xf0] sm:$0xff]   ;;  %v7910_v28 = vld [vmem:[%s9404_s17 + $0x20] sm:$0xff]   ;;  %v9128_v19 = vld [vmem:[%s9405_s25 + $0x8] sm:$0xff] }
0x16b1   :  { %4825 = vmatpush1.bf16.msra.mxu0 %v6927_v49  ;;  %4868 = vmatpush1.bf16.msra.mxu1 %v6929_v53  ;;  %v6938_v49 = vcombine.high %v4296_v44, %v4304_v45  ;;  %v4279_v53 = vld [vmem:[%s9401_s5 + $0xb0] sm:$0xff]  ;;  %v4331_v44 = vsub.s32 1, %v8456_v37  ;;  %v4339_v45 = vsub.s32 3, %v8456_v37 }
0x16b2   :  { %4826 = vmatprep.subr.bf16.mxu0 %v6912_v54  ;;  %4869 = vmatprep.subr.bf16.mxu1 %v6914_v56  ;;  %v4287_v54 = vld [vmem:[%s9401_s5 + $0xf0] sm:$0xff]  ;;  %v4280_v56 = vld [vmem:[%s9401_s5 + $0xb8] sm:$0xff] }
0x16b3   :  { %v6920_v1 = vcombine.high %v4279_v53, %v4287_v54  ;;  %v6919_v51 = vcombine.low %v4279_v53, %v4287_v54  ;;  %v6921_v6 = vcombine.low %v4280_v56, %v4288_v58 }
0x16b5   :  { %4827 = vmatpush1.bf16.msra.mxu0 %v6911_v3  ;;  %4870 = vmatpush1.bf16.msra.mxu1 %v6913_v4  ;;  %v6922_v3 = vcombine.high %v4280_v56, %v4288_v58  ;;  %v4263_v4 = vld [vmem:[%s9401_s5 + $0x30] sm:$0xff] }
0x16b6   :  { %4828 = vmatprep.subr.bf16.mxu0 %v6896_v50  ;;  %4871 = vmatprep.subr.bf16.mxu1 %v6898_v47  ;;  %v4271_v50 = vld [vmem:[%s9401_s5 + $0x70] sm:$0xff]  ;;  %v4264_v47 = vld [vmem:[%s9401_s5 + $0x38] sm:$0xff] }
0x16b7   :  { %v6904_v7 = vcombine.high %v4263_v4, %v4271_v50 }
0x16b9   :  { %4829 = vmatpush1.bf16.msra.mxu0 %v6895_v8  ;;  %4872 = vmatpush1.bf16.msra.mxu1 %v6897_v9  ;;  %v6906_v8 = vcombine.high %v4264_v47, %v4272_v5  ;;  %v6903_v9 = vcombine.low %v4263_v4, %v4271_v50 }
0x16ba   :  { %4908 = vmatprep.subr.bf16.mxu0 %v6948_v10  ;;  %4951 = vmatprep.subr.bf16.mxu1 %v6950_v11  ;;  %v6905_v10 = vcombine.low %v4264_v47, %v4272_v5  ;;  %v7897_v11 = vld [vmem:[%s9404_s17 + $0xf8] sm:$0xff]  }
0x16bc   :  { %6957 = vmatmul.mubr.msk.bf16.vlgmr.msra.gmra.mxu0 %vm582_vm9, %v9028_v57  ;;  %6958 = vmatmul.mubr.msk.bf16.vlgmr.msra.gmra.mxu1 %vm582_vm9, %v9028_v57 }
0x16bd   :  { %4909 = vmatpush1.bf16.msra.mxu0 %v6947_v17  ;;  %4952 = vmatpush1.bf16.msra.mxu1 %v6949_v20  ;;  %v7902_v17 = vld [vmem:[%s9404_s17 + $0x30] sm:$0xff]  }
0x16be   :  { %4910 = vmatprep.subr.bf16.mxu0 %v6932_v22  ;;  %4953 = vmatprep.subr.bf16.mxu1 %v6934_v25  ;;  %v7903_v20 = vld [vmem:[%s9404_s17 + $0xb0] sm:$0xff]   ;;  %v7904_v22 = vld [vmem:[%s9404_s17 + $0x68] sm:$0xff]  }
0x16bf   :  { %4932 = vmatprep.mubr.bf16.mxu0 %v8189_v30  ;;  %4975 = vmatprep.mubr.bf16.mxu1 %v8189_v30  ;;  %v7905_v25 = vld [vmem:[%s9404_s17 + $0xe8] sm:$0xff]  }
0x16c1   :  { %4911 = vmatpush1.bf16.msra.mxu0 %v6931_v29  ;;  %4954 = vmatpush1.bf16.msra.mxu1 %v6933_v31  ;;  %v7911_v29 = vld [vmem:[%s9404_s17 + $0xa0] sm:$0xff]   ;;  %v7912_v31 = vld [vmem:[%s9404_s17 + $0x58] sm:$0xff]  }
0x16c2   :  { %4912 = vmatprep.subr.bf16.mxu0 %v6916_v21  ;;  %4955 = vmatprep.subr.bf16.mxu1 %v6918_v32  ;;  %v7913_v21 = vld [vmem:[%s9404_s17 + $0xd8] sm:$0xff]  }
0x16c3   :  { %v7914_v32 = vld [vmem:[%s9404_s17 + $0x18] sm:$0xff]  }
0x16c5   :  { %4913 = vmatpush1.bf16.msra.mxu0 %v6915_v34  ;;  %4956 = vmatpush1.bf16.msra.mxu1 %v6917_v24  ;;  %v7919_v34 = vld [vmem:[%s9404_s17 + $0x90] sm:$0xff]   ;;  %v7920_v24 = vld [vmem:[%s9404_s17 + $0x48] sm:$0xff]  }
0x16c6   :  { %4914 = vmatprep.subr.bf16.mxu0 %v6900_v60  ;;  %4957 = vmatprep.subr.bf16.mxu1 %v6902_v18  ;;  %v7921_v60 = vld [vmem:[%s9404_s17 + $0xc8] sm:$0xff]  }
0x16c7   :  { %v7922_v18 = vld [vmem:[%s9404_s17 + $0x8] sm:$0xff]  }
0x16c9   :  { %4915 = vmatpush1.bf16.msra.mxu0 %v6899_v36  ;;  %4958 = vmatpush1.bf16.msra.mxu1 %v6901_v39  ;;  %v7927_v36 = vld [vmem:[%s9404_s17 + $0x80] sm:$0xff]   ;;  %v7928_v39 = vld [vmem:[%s9404_s17 + $0x178] sm:$0xff]  }
0x16ca   :  { %4994 = vmatprep.subr.bf16.mxu0 %v6952_v40  ;;  %5037 = vmatprep.subr.bf16.mxu1 %v6954_v38  ;;  %v7929_v40 = vld [vmem:[%s9404_s17 + $0x1f8] sm:$0xff]   ;;  %v4351_v38 = vsub.s32 6, %v8456_v37 }
0x16cc   :  { %6959 = vmatmul.mubr.msk.bf16.vlgmr.msra.gmra.mxu0 %vm582_vm9, %v9028_v57  ;;  %6960 = vmatmul.mubr.msk.bf16.vlgmr.msra.gmra.mxu1 %vm582_vm9, %v9028_v57  ;;  %v9133_v43 = vrot.slane %v9128_v19, %v4351_v38 }
0x16cd   :  { %4995 = vmatpush1.bf16.msra.mxu0 %v6951_v41  ;;  %5038 = vmatpush1.bf16.msra.mxu1 %v6953_v46  ;;  %v4327_v41 = vsub.s32 0, %v8456_v37  ;;  %v4335_v46 = vsub.s32 2, %v8456_v37 }
0x16ce   :  { %4996 = vmatprep.subr.bf16.mxu0 %v6936_v48  ;;  %5039 = vmatprep.subr.bf16.mxu1 %v6938_v49  ;;  %v9140_v48 = vld [vmem:[%s9405_s25] sm:$0xff] }
0x16cf   :  { %5018 = vmatprep.mubr.bf16.mxu0 %v8189_v30  ;;  %5061 = vmatprep.mubr.bf16.mxu1 %v8189_v30  ;;  %v7896_v30 = vld [vmem:[%s9404_s17 + $0x78] sm:$0xff]   ;;  %v4332_v54 = vrot.slane %v9140_v48, %v4331_v44  ;;  %v4340_v56 = vrot.slane %v9140_v48, %v4339_v45  ;;  %v4328_v58 = vrot.slane %v9140_v48, %v4327_v41 }
0x16d1   :  { %4997 = vmatpush1.bf16.msra.mxu0 %v6935_v59  ;;  %5040 = vmatpush1.bf16.msra.mxu1 %v6937_v63  ;;  %v4336_v59 = vrot.slane %v9140_v48, %v4335_v46 }
0x16d2   :  { %4998 = vmatprep.subr.bf16.mxu0 %v6920_v1  ;;  %5041 = vmatprep.subr.bf16.mxu1 %v6922_v3 }
0x16d5   :  { %4999 = vmatpush1.bf16.msra.mxu0 %v6919_v51  ;;  %5042 = vmatpush1.bf16.msra.mxu1 %v6921_v6 }
0x16d6   :  { %5000 = vmatprep.subr.bf16.mxu0 %v6904_v7  ;;  %5043 = vmatprep.subr.bf16.mxu1 %v6906_v8 }
0x16d9   :  { %5001 = vmatpush1.bf16.msra.mxu0 %v6903_v9  ;;  %5044 = vmatpush1.bf16.msra.mxu1 %v6905_v10 }
0x16da   :  { %7283 = vmatprep.subr.bf16.mxu0 %v7896_v30  ;;  %7305 = vmatprep.subr.bf16.mxu1 %v7897_v11 }
0x16dc   :  { %6961 = vmatmul.mubr.msk.bf16.vlgmr.msra.gmra.mxu0 %vm582_vm9, %v9028_v57  ;;  %6962 = vmatmul.mubr.msk.bf16.vlgmr.msra.gmra.mxu1 %vm582_vm9, %v9028_v57  ;;  %v7908_v57 = vld [vmem:[%s9404_s17 + $0x60] sm:$0xff]  }
0x16dd   :  { %7284 = vmatpush3.bf16.msra.mxu0 %v7898_v12  ;;  %7306 = vmatpush3.bf16.msra.mxu1 %v7899_v13 }
0x16de   :  { %7285 = vmatprep.subr.bf16.mxu0 %v7900_v52  ;;  %7307 = vmatprep.subr.bf16.mxu1 %v7901_v14 }
0x16e1   :  { %7286 = vmatpush3.bf16.msra.mxu0 %v7902_v17  ;;  %7308 = vmatpush3.bf16.msra.mxu1 %v7903_v20 }
0x16e2   :  { %7287 = vmatprep.subr.bf16.mxu0 %v7904_v22  ;;  %7309 = vmatprep.subr.bf16.mxu1 %v7905_v25 }
0x16e5   :  { %7288 = vmatpush3.bf16.msra.mxu0 %v7906_v26  ;;  %7310 = vmatpush3.bf16.msra.mxu1 %v7907_v27  ;;  %v7930_v27 = vld [vmem:[%s9404_s17 + $0x138] sm:$0xff]  }
0x16e6   :  { %7289 = vmatprep.subr.bf16.mxu0 %v7908_v57  ;;  %7311 = vmatprep.subr.bf16.mxu1 %v7909_v23  ;;  %v7931_v57 = vld [vmem:[%s9404_s17 + $0x1b8] sm:$0xff]  }
0x16e9   :  { %7290 = vmatpush3.bf16.msra.mxu0 %v7910_v28  ;;  %7312 = vmatpush3.bf16.msra.mxu1 %v7911_v29  ;;  %v7932_v29 = vld [vmem:[%s9404_s17 + $0x170] sm:$0xff]  }
0x16ea   :  { %7291 = vmatprep.subr.bf16.mxu0 %v7912_v31  ;;  %7313 = vmatprep.subr.bf16.mxu1 %v7913_v21  ;;  %v7933_v31 = vld [vmem:[%s9404_s17 + $0x1f0] sm:$0xff]   ;;  %v4347_v21 = vsub.s32 5, %v8456_v37 }
0x16ed   :  { %7292 = vmatpush3.bf16.msra.mxu0 %v7914_v32  ;;  %7314 = vmatpush3.bf16.msra.mxu1 %v7915_v33  ;;  %v4355_v32 = vsub.s32 7, %v8456_v37  ;;  %v7934_v33 = vld [vmem:[%s9404_s17 + $0x130] sm:$0xff]  }
0x16ee   :  { %7293 = vmatprep.subr.bf16.mxu0 %v7916_v2  ;;  %7315 = vmatprep.subr.bf16.mxu1 %v7917_v55  ;;  %v7935_v2 = vld [vmem:[%s9404_s17 + $0x1b0] sm:$0xff]  }
0x16f1   :  { %7294 = vmatpush3.bf16.msra.mxu0 %v7918_v62  ;;  %7316 = vmatpush3.bf16.msra.mxu1 %v7919_v34  ;;  %v7936_v34 = vld [vmem:[%s9404_s17 + $0x168] sm:$0xff]  }
0x16f2   :  { %7295 = vmatprep.subr.bf16.mxu0 %v7920_v24  ;;  %7317 = vmatprep.subr.bf16.mxu1 %v7921_v60  ;;  %v7937_v24 = vld [vmem:[%s9404_s17 + $0x1e8] sm:$0xff]   ;;  %v4348_v60 = vrot.slane %v9140_v48, %v4347_v21 }
0x16f5   :  { %7296 = vmatpush3.bf16.msra.mxu0 %v7922_v18  ;;  %7318 = vmatpush3.bf16.msra.mxu1 %v7923_v35  ;;  %v4356_v18 = vrot.slane %v9140_v48, %v4355_v32 }
0x16f6   :  { %7297 = vmatprep.subr.bf16.mxu0 %v7924_v15  ;;  %7319 = vmatprep.subr.bf16.mxu1 %v7925_v61  ;;  %v7938_v61 = vld [vmem:[%s9404_s17 + $0x128] sm:$0xff]  }
0x16f9   :  { %7298 = vmatpush3.bf16.msra.mxu0 %v7926_v16  ;;  %7320 = vmatpush3.bf16.msra.mxu1 %v7927_v36  ;;  %v7939_v16 = vld [vmem:[%s9404_s17 + $0x1a8] sm:$0xff]  }
0x16fa   :  { %7327 = vmatprep.subr.bf16.mxu0 %v7928_v39  ;;  %7349 = vmatprep.subr.bf16.mxu1 %v7929_v40  ;;  %v7940_v40 = vld [vmem:[%s9404_s17 + $0x160] sm:$0xff]  }
0x176c   :  { %v4762_v49 = vpop.f32.mrf.mxu0  ;;  %v4805_v53 = vpop.f32.mrf.mxu1 }
0x176d   :  { %v4763_v6 = vadd.f32 %v4762_v49, %v4328_v58  ;;  %v4806_v7 = vadd.f32 %v4805_v53, %v4336_v59  ;;  %v7941_v49 = vld [vmem:[%s9404_s17 + $0x1e0] sm:$0xff]  }
0x176e   :  { %v4764_v63 = vpop.f32.mrf.mxu0  ;;  %v4807_v1 = vpop.f32.mrf.mxu1 }
0x176f   :  { %v4765_v50 = vadd.f32 %v4764_v63, %v4332_v54  ;;  %v4808_v47 = vadd.f32 %v4807_v1, %v4340_v56  ;;  %v5072_v20 = vmax.f32 %v4763_v6, 0.0  ;;  %v5074_v22 = vmax.f32 %v4806_v7, 0.0  ;;  %v7942_v1 = vld [vmem:[%s9404_s17 + $0x120] sm:$0xff]  }
0x1770   :  { %v4766_v3 = vpop.f32.mrf.mxu0  ;;  %v4809_v4 = vpop.f32.mrf.mxu1 }
0x1771   :  { %v4767_v5 = vadd.f32 %v4766_v3, %v4328_v58  ;;  %v4810_v51 = vadd.f32 %v4809_v4, %v4336_v59  ;;  %v5073_v13 = vmax.f32 %v4765_v50, 0.0  ;;  %v5075_v52 = vmax.f32 %v4808_v47, 0.0  ;;  %v7943_v3 = vld [vmem:[%s9404_s17 + $0x1a0] sm:$0xff]   ;;  %v7944_v4 = vld [vmem:[%s9404_s17 + $0x158] sm:$0xff]  }
0x1772   :  { %v4768_v8 = vpop.f32.mrf.mxu0  ;;  %v4811_v9 = vpop.f32.mrf.mxu1  ;;  %v7945_v50 = vld [vmem:[%s9404_s17 + $0x1d8] sm:$0xff]  }
0x1773   :  { %v4769_v10 = vadd.f32 %v4768_v8, %v4332_v54  ;;  %v4812_v30 = vadd.f32 %v4811_v9, %v4340_v56  ;;  %v5088_v11 = vmax.f32 %v4767_v5, 0.0  ;;  %v5090_v12 = vmax.f32 %v4810_v51, 0.0  ;;  %v7946_v9 = vld [vmem:[%s9404_s17 + $0x118] sm:$0xff]  }
0x1775   :  { %v5089_v14 = vmax.f32 %v4769_v10, 0.0  ;;  %v5091_v17 = vmax.f32 %v4812_v30, 0.0  ;;  %v5104_v23 = vpack.c.bf16 %v5088_v11, %v5072_v20  ;;  %v5106_v28 = vpack.c.bf16 %v5090_v12, %v5074_v22  ;;  %v7947_v10 = vld [vmem:[%s9404_s17 + $0x198] sm:$0xff]   ;;  %v7948_v30 = vld [vmem:[%s9404_s17 + $0x150] sm:$0xff]   ;;  %v7952_v20 = vld [vmem:[%s9404_s17 + $0x148] sm:$0xff]  }
0x1776   :  { %v7949_v11 = vld [vmem:[%s9404_s17 + $0x1d0] sm:$0xff]   ;;  %v4343_v12 = vsub.s32 4, %v8456_v37  ;;  %v7953_v22 = vld [vmem:[%s9404_s17 + $0x1c8] sm:$0xff]  }
0x1777   :  { %v5105_v25 = vpack.c.bf16 %v5089_v14, %v5073_v13  ;;  %v5107_v26 = vpack.c.bf16 %v5091_v17, %v5075_v52  ;;  %v7950_v13 = vld [vmem:[%s9404_s17 + $0x110] sm:$0xff]  }
0x1778   :  { %v7951_v52 = vld [vmem:[%s9404_s17 + $0x190] sm:$0xff]  }
0x1779   :  { %6183 = vmatprep.mubr.bf16.mxu0 %v5105_v25  ;;  %6224 = vmatprep.mubr.bf16.mxu1 %v5107_v26  ;;  %v4344_v25 = vrot.slane %v9140_v48, %v4343_v12  ;;  %v4352_v26 = vrot.slane %v9140_v48, %v4351_v38  ;;  %v7956_v48 = vld [vmem:[%s9404_s17 + $0x140] sm:$0xff]  }
0x177a   :  { %6184 = vmatmul.mubr.bf16.vlgmr.msra.gmra.mxu0 %v5104_v23  ;;  %6225 = vmatmul.mubr.bf16.vlgmr.msra.gmra.mxu1 %v5106_v28  ;;  %v4364_v23 = vrot.slane %v9128_v19, %v4331_v44  ;;  %v7954_v28 = vld [vmem:[%s9404_s17 + $0x108] sm:$0xff]   ;;  %v7957_v44 = vld [vmem:[%s9404_s17 + $0x1c0] sm:$0xff]  }
0x177b   :  { %7328 = vmatpush3.bf16.msra.mxu0 %v7930_v27  ;;  %7350 = vmatpush3.bf16.msra.mxu1 %v7931_v57 }
0x177c   :  { %v9162_v55 = vpop.f32.mrf.mxu0  ;;  %v9164_v62 = vpop.f32.mrf.mxu1  ;;  %7329 = vmatprep.subr.bf16.mxu0 %v7932_v29  ;;  %7351 = vmatprep.subr.bf16.mxu1 %v7933_v31  ;;  %v7955_v29 = vld [vmem:[%s9404_s17 + $0x188] sm:$0xff]  }
0x177e   :  { %v4850_v35 = vpop.f32.mrf.mxu0  ;;  %v4893_v15 = vpop.f32.mrf.mxu1 }
0x177f   :  { %7330 = vmatpush3.bf16.msra.mxu0 %v7934_v33  ;;  %7352 = vmatpush3.bf16.msra.mxu1 %v7935_v2  ;;  %v4851_v53 = vadd.f32 %v4850_v35, %v4348_v60  ;;  %v4894_v54 = vadd.f32 %v4893_v15, %v4356_v18  ;;  %v4372_v2 = vrot.slane %v9128_v19, %v4339_v45 }
0x1780   :  { %v4852_v36 = vpop.f32.mrf.mxu0  ;;  %v4895_v39 = vpop.f32.mrf.mxu1  ;;  %7331 = vmatprep.subr.bf16.mxu0 %v7936_v34  ;;  %7353 = vmatprep.subr.bf16.mxu1 %v7937_v24  ;;  %v4849_v24 = vadd.f32 %v9162_v55, %v4344_v25  ;;  %v7960_v55 = vld [vmem:[%s9404_s17 + $0x278] sm:$0xff]  }
0x1781   :  { %v5077_v47 = vmax.f32 %v4851_v53, 0.0  ;;  %v5079_v5 = vmax.f32 %v4894_v54, 0.0  ;;  %v4853_v31 = vadd.f32 %v4852_v36, %v4344_v25  ;;  %v4896_v33 = vadd.f32 %v4895_v39, %v4352_v26  ;;  %v7959_v36 = vld [vmem:[%s9404_s17 + $0x180] sm:$0xff]   ;;  %v7961_v53 = vld [vmem:[%s9404_s17 + $0x2f8] sm:$0xff]  }
0x1782   :  { %v4854_v56 = vpop.f32.mrf.mxu0  ;;  %v4897_v58 = vpop.f32.mrf.mxu1  ;;  %v5076_v54 = vmax.f32 %v4849_v24, 0.0 }
0x1783   :  { %v4855_v59 = vadd.f32 %v4854_v56, %v4348_v60  ;;  %v4898_v63 = vadd.f32 %v4897_v58, %v4356_v18  ;;  %7332 = vmatpush3.bf16.msra.mxu0 %v7938_v61  ;;  %7354 = vmatpush3.bf16.msra.mxu1 %v7939_v16  ;;  %v4892_v60 = vadd.f32 %v9164_v62, %v4352_v26  ;;  %v7958_v16 = vld [vmem:[%s9404_s17 + $0x100] sm:$0xff]   ;;  %v5092_v39 = vmax.f32 %v4853_v31, 0.0  ;;  %v7979_v31 = vld [vmem:[%s9404_s17 + $0x298] sm:$0xff]  }
0x1784   :  { %7333 = vmatprep.subr.bf16.mxu0 %v7940_v40  ;;  %7355 = vmatprep.subr.bf16.mxu1 %v7941_v49  ;;  %v5094_v40 = vmax.f32 %v4896_v33, 0.0  ;;  %v7975_v26 = vld [vmem:[%s9404_s17 + $0x2a0] sm:$0xff]   ;;  %v7980_v33 = vld [vmem:[%s9404_s17 + $0x250] sm:$0xff]  }
0x1785   :  { %v5093_v51 = vmax.f32 %v4855_v59, 0.0  ;;  %v5095_v6 = vmax.f32 %v4898_v63, 0.0  ;;  %v5078_v56 = vmax.f32 %v4892_v60, 0.0  ;;  %v7962_v63 = vld [vmem:[%s9404_s17 + $0x238] sm:$0xff]   ;;  %v7983_v60 = vld [vmem:[%s9404_s17 + $0x290] sm:$0xff]  }
0x1787   :  { %v5109_v7 = vpack.c.bf16 %v5093_v51, %v5077_v47  ;;  %v5111_v8 = vpack.c.bf16 %v5095_v6, %v5079_v5  ;;  %7334 = vmatpush3.bf16.msra.mxu0 %v7942_v1  ;;  %7356 = vmatpush3.bf16.msra.mxu1 %v7943_v3  ;;  %v5108_v1 = vpack.c.bf16 %v5092_v39, %v5076_v54  ;;  %v7964_v5 = vld [vmem:[%s9404_s17 + $0x270] sm:$0xff]  }
0x1788   :  { %7335 = vmatprep.subr.bf16.mxu0 %v7944_v4  ;;  %7357 = vmatprep.subr.bf16.mxu1 %v7945_v50  ;;  %v5110_v3 = vpack.c.bf16 %v5094_v40, %v5078_v56  ;;  %v7963_v50 = vld [vmem:[%s9404_s17 + $0x2b8] sm:$0xff]   ;;  %v7965_v51 = vld [vmem:[%s9404_s17 + $0x2f0] sm:$0xff]   ;;  %v4380_v39 = vrot.slane %v9128_v19, %v4347_v21  ;;  %v7990_v56 = vld [vmem:[%s9404_s17 + $0x200] sm:$0xff]  }
0x1789   :  { %6265 = vmatprep.mubr.bf16.mxu0 %v5109_v7  ;;  %6306 = vmatprep.mubr.bf16.mxu1 %v5111_v8  ;;  %v7966_v7 = vld [vmem:[%s9404_s17 + $0x230] sm:$0xff]  }
0x178a   :  { %v7967_v8 = vld [vmem:[%s9404_s17 + $0x2b0] sm:$0xff]  }
0x178b   :  { %7336 = vmatpush3.bf16.msra.mxu0 %v7946_v9  ;;  %7358 = vmatpush3.bf16.msra.mxu1 %v7947_v10  ;;  %v7968_v9 = vld [vmem:[%s9404_s17 + $0x268] sm:$0xff]  }
0x178c   :  { %v9189_v14 = vpop.f32.mrf.mxu0  ;;  %v9191_v17 = vpop.f32.mrf.mxu1  ;;  %7337 = vmatprep.subr.bf16.mxu0 %v7948_v30  ;;  %7359 = vmatprep.subr.bf16.mxu1 %v7949_v11  ;;  %v7969_v10 = vld [vmem:[%s9404_s17 + $0x2e8] sm:$0xff]  }
0x178d   :  { %v7970_v30 = vld [vmem:[%s9404_s17 + $0x228] sm:$0xff]  }
0x178e   :  { %v4936_v27 = vpop.f32.mrf.mxu0  ;;  %v4979_v57 = vpop.f32.mrf.mxu1  ;;  %v7971_v11 = vld [vmem:[%s9404_s17 + $0x2a8] sm:$0xff]  }
0x178f   :  { %7338 = vmatpush3.bf16.msra.mxu0 %v7950_v13  ;;  %7360 = vmatpush3.bf16.msra.mxu1 %v7951_v52  ;;  %v4937_v15 = vadd.f32 %v4936_v27, %v4364_v23  ;;  %v4980_v49 = vadd.f32 %v4979_v57, %v4372_v2  ;;  %v7972_v13 = vld [vmem:[%s9404_s17 + $0x260] sm:$0xff]   ;;  %v7976_v27 = vld [vmem:[%s9404_s17 + $0x258] sm:$0xff]  }
0x1790   :  { %v9209_v34 = vpop.f32.mrf.mxu0  ;;  %v9211_v38 = vpop.f32.mrf.mxu1  ;;  %7339 = vmatprep.subr.bf16.mxu0 %v7952_v20  ;;  %7361 = vmatprep.subr.bf16.mxu1 %v7953_v22  ;;  %v7973_v52 = vld [vmem:[%s9404_s17 + $0x2e0] sm:$0xff]   ;;  %v7977_v57 = vld [vmem:[%s9404_s17 + $0x2d8] sm:$0xff]  }
0x1791   :  { %v5081_v59 = vmax.f32 %v4937_v15, 0.0  ;;  %v5083_v4 = vmax.f32 %v4980_v49, 0.0  ;;  %v7974_v22 = vld [vmem:[%s9404_s17 + $0x220] sm:$0xff]   ;;  %v4360_v15 = vrot.slane %v9128_v19, %v4327_v41  ;;  %v7987_v49 = vld [vmem:[%s9404_s17 + $0x288] sm:$0xff]  }
0x1792   :  { %v4940_v18 = vpop.f32.mrf.mxu0  ;;  %v4983_v35 = vpop.f32.mrf.mxu1  ;;  %v7988_v41 = vld [vmem:[%s9404_s17 + $0x240] sm:$0xff]  }
0x1793   :  { %v4941_v45 = vadd.f32 %v4940_v18, %v4364_v23  ;;  %v4984_v61 = vadd.f32 %v4983_v35, %v4372_v2  ;;  %7340 = vmatpush3.bf16.msra.mxu0 %v7954_v28  ;;  %7362 = vmatpush3.bf16.msra.mxu1 %v7955_v29  ;;  %v7978_v28 = vld [vmem:[%s9404_s17 + $0x218] sm:$0xff]   ;;  %v7981_v2 = vld [vmem:[%s9404_s17 + $0x2d0] sm:$0xff]   ;;  %v7984_v18 = vld [vmem:[%s9404_s17 + $0x248] sm:$0xff]  }
0x1794   :  { %7341 = vmatprep.subr.bf16.mxu0 %v7956_v48  ;;  %7363 = vmatprep.subr.bf16.mxu1 %v7957_v44  ;;  %v7982_v44 = vld [vmem:[%s9404_s17 + $0x210] sm:$0xff]   ;;  %v7985_v35 = vld [vmem:[%s9404_s17 + $0x2c8] sm:$0xff]  }
0x1795   :  { %v5097_v62 = vmax.f32 %v4941_v45, 0.0  ;;  %v5099_v58 = vmax.f32 %v4984_v61, 0.0  ;;  %v4368_v45 = vrot.slane %v9128_v19, %v4335_v46  ;;  %v4388_v46 = vrot.slane %v9128_v19, %v4355_v32 }
0x1797   :  { %7342 = vmatpush3.bf16.msra.mxu0 %v7958_v16  ;;  %7364 = vmatpush3.bf16.msra.mxu1 %v7959_v36  ;;  %v5113_v47 = vpack.c.bf16 %v5097_v62, %v5081_v59  ;;  %v5115_v6 = vpack.c.bf16 %v5099_v58, %v5083_v4  ;;  %v7986_v16 = vld [vmem:[%s9404_s17 + $0x208] sm:$0xff]   ;;  %v4939_v36 = vadd.f32 %v9209_v34, %v4360_v15  ;;  %v7989_v34 = vld [vmem:[%s9404_s17 + $0x2c0] sm:$0xff]  }
0x1798   :  { %7371 = vmatprep.subr.bf16.mxu0 %v7960_v55  ;;  %7393 = vmatprep.subr.bf16.mxu1 %v7961_v53  ;;  %v4982_v55 = vadd.f32 %v9211_v38, %v4368_v45  ;;  %v4935_v53 = vadd.f32 %v9189_v14, %v4360_v15  ;;  %v4978_v21 = vadd.f32 %v9191_v17, %v4368_v45  ;;  %v7991_v38 = vld [vmem:[%s9404_s17 + $0x280] sm:$0xff]   ;;  %v8014_v15 = vld [vmem:[%s9404_s17 + $0x310] sm:$0xff]  }
0x1799   :  { %v5096_v58 = vmax.f32 %v4939_v36, 0.0  ;;  %v8015_v45 = vld [vmem:[%s9404_s17 + $0x390] sm:$0xff]   ;;  %v4376_v36 = vrot.slane %v9128_v19, %v4343_v12  ;;  %v8022_v19 = vld [vmem:[%s9404_s17 + $0x300] sm:$0xff]  }
0x179a   :  { %6266 = vmatmul.mubr.bf16.vlgmr.msra.gmra.mxu0 %v5108_v1  ;;  %6307 = vmatmul.mubr.bf16.vlgmr.msra.gmra.mxu1 %v5110_v3  ;;  %v5098_v32 = vmax.f32 %v4982_v55, 0.0  ;;  %v7993_v3 = vld [vmem:[%s9404_s17 + $0x3f8] sm:$0xff]   ;;  %v5080_v14 = vmax.f32 %v4935_v53, 0.0  ;;  %v5082_v17 = vmax.f32 %v4978_v21, 0.0 }
0x179b   :  { %7372 = vmatpush3.bf16.msra.mxu0 %v7962_v63  ;;  %6347 = vmatprep.mubr.bf16.mxu0 %v5113_v47  ;;  %v7992_v63 = vld [vmem:[%s9404_s17 + $0x378] sm:$0xff]  }
0x179c   :  { %7394 = vmatpush3.bf16.msra.mxu1 %v7963_v50  ;;  %6388 = vmatprep.mubr.bf16.mxu1 %v5115_v6  ;;  %v9233_v20 = vpop.f32.mrf.mxu0  ;;  %v9236_v25 = vpop.f32.mrf.mxu1  ;;  %v7994_v47 = vld [vmem:[%s9404_s17 + $0x338] sm:$0xff]  }
0x179d   :  { %7373 = vmatprep.subr.bf16.mxu0 %v7964_v5  ;;  %7395 = vmatprep.subr.bf16.mxu1 %v7965_v51  ;;  %v5112_v5 = vpack.c.bf16 %v5096_v58, %v5080_v14  ;;  %v7995_v6 = vld [vmem:[%s9404_s17 + $0x3b8] sm:$0xff]   ;;  %v5064_v37 = vadd.f32 %v9236_v25, %v9133_v43 }
0x179e   :  { %v5022_v23 = vpop.f32.mrf.mxu0  ;;  %v5065_v29 = vpop.f32.mrf.mxu1 }
0x179f   :  { %7374 = vmatpush3.bf16.msra.mxu0 %v7966_v7  ;;  %v5023_v59 = vadd.f32 %v5022_v23, %v4380_v39  ;;  %v5066_v1 = vadd.f32 %v5065_v29, %v4388_v46  ;;  %v5114_v7 = vpack.c.bf16 %v5098_v32, %v5082_v17  ;;  %v8004_v23 = vld [vmem:[%s9404_s17 + $0x360] sm:$0xff]   ;;  %v5086_v21 = vmax.f32 %v5064_v37, 0.0 }
0x17a0   :  { %7396 = vmatpush3.bf16.msra.mxu1 %v7967_v8  ;;  %7375 = vmatprep.subr.bf16.mxu0 %v7968_v9  ;;  %v9245_v48 = vpop.f32.mrf.mxu0  ;;  %v9248_v24 = vpop.f32.mrf.mxu1  ;;  %v7996_v9 = vld [vmem:[%s9404_s17 + $0x370] sm:$0xff]   ;;  %v8006_v29 = vld [vmem:[%s9404_s17 + $0x320] sm:$0xff]  }
0x17a1   :  { %7397 = vmatprep.subr.bf16.mxu1 %v7969_v10  ;;  %v5085_v51 = vmax.f32 %v5023_v59, 0.0  ;;  %v5087_v8 = vmax.f32 %v5066_v1, 0.0  ;;  %v5068_v55 = vadd.f32 %v9248_v24, %v9133_v43 }
0x17a2   :  { %v5026_v61 = vpop.f32.mrf.mxu0  ;;  %v5069_v40 = vpop.f32.mrf.mxu1 }
0x17a3   :  { %7376 = vmatpush3.bf16.msra.mxu0 %v7970_v30  ;;  %v5027_v62 = vadd.f32 %v5026_v61, %v4380_v39  ;;  %v5070_v54 = vadd.f32 %v5069_v40, %v4388_v46  ;;  %v7997_v30 = vld [vmem:[%s9404_s17 + $0x3f0] sm:$0xff]   ;;  %v8016_v61 = vld [vmem:[%s9404_s17 + $0x348] sm:$0xff]   ;;  %v5025_v40 = vadd.f32 %v9245_v48, %v4376_v36  ;;  %v8021_v46 = vld [vmem:[%s9404_s17 + $0x3c0] sm:$0xff]   ;;  %v5102_v53 = vmax.f32 %v5068_v55, 0.0 }
0x17a4   :  { %7398 = vmatpush3.bf16.msra.mxu1 %v7971_v11  ;;  %7377 = vmatprep.subr.bf16.mxu0 %v7972_v13  ;;  %v7998_v13 = vld [vmem:[%s9404_s17 + $0x330] sm:$0xff]   ;;  %v8018_v39 = vld [vmem:[%s9404_s17 + $0x308] sm:$0xff]   ;;  %v8023_v48 = vld [vmem:[%s9404_s17 + $0x380] sm:$0xff]  }
0x17a5   :  { %7399 = vmatprep.subr.bf16.mxu1 %v7973_v52  ;;  %v5101_v4 = vmax.f32 %v5027_v62, 0.0  ;;  %v5103_v50 = vmax.f32 %v5070_v54, 0.0  ;;  %v7999_v52 = vld [vmem:[%s9404_s17 + $0x3b0] sm:$0xff]   ;;  %v5100_v12 = vmax.f32 %v5025_v40, 0.0  ;;  %v5118_v24 = vpack.c.bf16 %v5102_v53, %v5086_v21 }
0x17a7   :  { %7378 = vmatpush3.bf16.msra.mxu0 %v7974_v22  ;;  %v5117_v10 = vpack.c.bf16 %v5101_v4, %v5085_v51  ;;  %v5119_v11 = vpack.c.bf16 %v5103_v50, %v5087_v8  ;;  %v8000_v22 = vld [vmem:[%s9404_s17 + $0x368] sm:$0xff]  }
0x17a8   :  { %7400 = vmatpush3.bf16.msra.mxu1 %v7975_v26  ;;  %7379 = vmatprep.subr.bf16.mxu0 %v7976_v27  ;;  %v8001_v26 = vld [vmem:[%s9404_s17 + $0x3e8] sm:$0xff]  }
0x17a9   :  { %7401 = vmatprep.subr.bf16.mxu1 %v7977_v57  ;;  %v8002_v27 = vld [vmem:[%s9404_s17 + $0x328] sm:$0xff]  }
0x17aa   :  { %v8003_v57 = vld [vmem:[%s9404_s17 + $0x3a8] sm:$0xff]  }
0x17ab   :  { %7380 = vmatpush3.bf16.msra.mxu0 %v7978_v28  ;;  %v8005_v28 = vld [vmem:[%s9404_s17 + $0x3e0] sm:$0xff]  }
0x17ac   :  { %7402 = vmatpush3.bf16.msra.mxu1 %v7979_v31  ;;  %7381 = vmatprep.subr.bf16.mxu0 %v7980_v33  ;;  %v8007_v31 = vld [vmem:[%s9404_s17 + $0x3a0] sm:$0xff]   ;;  %v8008_v33 = vld [vmem:[%s9404_s17 + $0x358] sm:$0xff]  }
0x17ad   :  { %7403 = vmatprep.subr.bf16.mxu1 %v7981_v2  ;;  %v8009_v2 = vld [vmem:[%s9404_s17 + $0x3d8] sm:$0xff]  }
0x17af   :  { %7382 = vmatpush3.bf16.msra.mxu0 %v7982_v44  ;;  %v8010_v44 = vld [vmem:[%s9404_s17 + $0x318] sm:$0xff]  }
0x17b0   :  { %7404 = vmatpush3.bf16.msra.mxu1 %v7983_v60  ;;  %7383 = vmatprep.subr.bf16.mxu0 %v7984_v18  ;;  %v8011_v60 = vld [vmem:[%s9404_s17 + $0x398] sm:$0xff]   ;;  %v8012_v18 = vld [vmem:[%s9404_s17 + $0x350] sm:$0xff]  }
0x17b1   :  { %7405 = vmatprep.subr.bf16.mxu1 %v7985_v35  ;;  %v8013_v35 = vld [vmem:[%s9404_s17 + $0x3d0] sm:$0xff]  }
0x17b3   :  { %7384 = vmatpush3.bf16.msra.mxu0 %v7986_v16  ;;  %v8017_v16 = vld [vmem:[%s9404_s17 + $0x3c8] sm:$0xff]  }
0x17b4   :  { %7406 = vmatpush3.bf16.msra.mxu1 %v7987_v49  ;;  %7385 = vmatprep.subr.bf16.mxu0 %v7988_v41  ;;  %v8019_v49 = vld [vmem:[%s9404_s17 + $0x388] sm:$0xff]   ;;  %v8020_v41 = vld [vmem:[%s9404_s17 + $0x340] sm:$0xff]  }
0x17b5   :  { %7407 = vmatprep.subr.bf16.mxu1 %v7989_v34  ;;  %v5021_v34 = vadd.f32 %v9233_v20, %v4376_v36 }
0x17b7   :  { %7386 = vmatpush3.bf16.msra.mxu0 %v7990_v56  ;;  %v5084_v62 = vmax.f32 %v5021_v34, 0.0 }
0x17b8   :  { %7408 = vmatpush3.bf16.msra.mxu1 %v7991_v38  ;;  %7415 = vmatprep.subr.bf16.mxu0 %v7992_v63 }
0x17b9   :  { %7437 = vmatprep.subr.bf16.mxu1 %v7993_v3  ;;  %v5116_v54 = vpack.c.bf16 %v5100_v12, %v5084_v62 }
0x17ba   :  { %6348 = vmatmul.mubr.bf16.vlgmr.msra.gmra.mxu0 %v5112_v5  ;;  %v6963_v5 = vld [vmem:[%s9406_s29] ss:$0 sm:$0xff] }
0x17bb   :  { %6389 = vmatmul.mubr.bf16.vlgmr.msra.gmra.mxu1 %v5114_v7  ;;  %7416 = vmatpush3.bf16.msra.mxu0 %v7994_v47 }
0x17bc   :  { %6429 = vmatprep.mubr.bf16.mxu0 %v5117_v10  ;;  %7438 = vmatpush3.bf16.msra.mxu1 %v7995_v6 }
0x17bd   :  { %6470 = vmatprep.mubr.bf16.mxu1 %v5119_v11  ;;  %7417 = vmatprep.subr.bf16.mxu0 %v7996_v9 }
0x17be   :  { %7439 = vmatprep.subr.bf16.mxu1 %v7997_v30 }
0x17bf   :  { %7418 = vmatpush3.bf16.msra.mxu0 %v7998_v13 }
0x17c0   :  { %7440 = vmatpush3.bf16.msra.mxu1 %v7999_v52  ;;  %7419 = vmatprep.subr.bf16.mxu0 %v8000_v22 }
0x17c1   :  { %7441 = vmatprep.subr.bf16.mxu1 %v8001_v26 }
0x17c3   :  { %7420 = vmatpush3.bf16.msra.mxu0 %v8002_v27 }
0x17c4   :  { %7442 = vmatpush3.bf16.msra.mxu1 %v8003_v57  ;;  %7421 = vmatprep.subr.bf16.mxu0 %v8004_v23 }
0x17c5   :  { %7443 = vmatprep.subr.bf16.mxu1 %v8005_v28 }
0x17c7   :  { %7422 = vmatpush3.bf16.msra.mxu0 %v8006_v29 }
0x17c8   :  { %7444 = vmatpush3.bf16.msra.mxu1 %v8007_v31  ;;  %7423 = vmatprep.subr.bf16.mxu0 %v8008_v33 }
0x17c9   :  { %7445 = vmatprep.subr.bf16.mxu1 %v8009_v2 }
0x17cb   :  { %7424 = vmatpush3.bf16.msra.mxu0 %v8010_v44 }
0x17cc   :  { %7446 = vmatpush3.bf16.msra.mxu1 %v8011_v60  ;;  %7425 = vmatprep.subr.bf16.mxu0 %v8012_v18 }
0x17cd   :  { %7447 = vmatprep.subr.bf16.mxu1 %v8013_v35 }
0x17cf   :  { %7426 = vmatpush3.bf16.msra.mxu0 %v8014_v15 }
0x17d0   :  { %7448 = vmatpush3.bf16.msra.mxu1 %v8015_v45  ;;  %7427 = vmatprep.subr.bf16.mxu0 %v8016_v61 }
0x17d1   :  { %7449 = vmatprep.subr.bf16.mxu1 %v8017_v16 }
0x17d3   :  { %7428 = vmatpush3.bf16.msra.mxu0 %v8018_v39 }
0x17d4   :  { %7450 = vmatpush3.bf16.msra.mxu1 %v8019_v49  ;;  %7429 = vmatprep.subr.bf16.mxu0 %v8020_v41 }
0x17d5   :  { %7451 = vmatprep.subr.bf16.mxu1 %v8021_v46 }
0x17d7   :  { %7430 = vmatpush3.bf16.msra.mxu0 %v8022_v19 }
0x17d8   :  { %7452 = vmatpush3.bf16.msra.mxu1 %v8023_v48 }
0x17da   :  { %6430 = vmatmul.mubr.bf16.vlgmr.msra.gmra.mxu0 %v5116_v54 }
0x17db   :  { %6471 = vmatmul.mubr.bf16.vlgmr.msra.gmra.mxu1 %v5118_v24 }
0x183a   :  { %v7299_v20 = vpop.f32.mrf.mxu0  ;;  %v7321_v56 = vpop.f32.mrf.mxu1 }
0x183c   :  { %v7300_v43 = vpop.f32.mrf.mxu0  ;;  %v7322_v25 = vpop.f32.mrf.mxu1 }
0x183d   :  { %v7301_v47 = vadd.f32 %v7300_v43, %v7299_v20  ;;  %v7323_v30 = vadd.f32 %v7322_v25, %v7321_v56 }
0x183e   :  { %v7302_v58 = vpop.f32.mrf.mxu0  ;;  %v7324_v59 = vpop.f32.mrf.mxu1 }
0x183f   :  { %v6186_v7 = vadd.f32 %v7301_v47, %v6963_v5  ;;  %v6526_v47 = vld [vmem:[%s9407_s3 + $0x8] sm:$0xff] }
0x1840   :  { %v7303_v38 = vpop.f32.mrf.mxu0  ;;  %v7325_v32 = vpop.f32.mrf.mxu1 }
0x1841   :  { %v7304_v8 = vadd.f32 %v7303_v38, %v7302_v58  ;;  %v6227_v13 = vadd.f32 %v7323_v30, %v6186_v7  ;;  %v7326_v27 = vadd.f32 %v7325_v32, %v7324_v59  ;;  %v6544_v7 = vld [vmem:[%s9408_s8 + $0x28] sm:$0xff] }
0x1842   :  { %v6540_v30 = vld [vmem:[%s9408_s8 + $0x8] sm:$0xff] }
0x1843   :  { %v6189_v52 = vadd.f32 %v7304_v8, %v6963_v5  ;;  %v6546_v5 = vld [vmem:[%s9408_s8 + $0x38] sm:$0xff]  ;;  %v6543_v8 = vld [vmem:[%s9408_s8 + $0x20] sm:$0xff] }
0x1844   :  { %7799 = vmatprep.subr.mxu0 %v6546_v5 }
0x1845   :  { %v6230_v28 = vadd.f32 %v7326_v27, %v6189_v52  ;;  %7800 = vmatpush3.msra.mxu0 %v6546_v5 }
0x185a   :  { %v7343_v63 = vpop.f32.mrf.mxu0  ;;  %v7365_v1 = vpop.f32.mrf.mxu1 }
0x185c   :  { %v7344_v3 = vpop.f32.mrf.mxu0  ;;  %v7366_v14 = vpop.f32.mrf.mxu1 }
0x185d   :  { %v7345_v11 = vadd.f32 %v7344_v3, %v7343_v63  ;;  %v7367_v29 = vadd.f32 %v7366_v14, %v7365_v1 }
0x185e   :  { %v7346_v4 = vpop.f32.mrf.mxu0  ;;  %v7368_v17 = vpop.f32.mrf.mxu1 }
0x185f   :  { %v6268_v57 = vadd.f32 %v7345_v11, %v6227_v13  ;;  %v6539_v11 = vld [vmem:[%s9408_s8] sm:$0xff] }
0x1860   :  { %v7347_v50 = vpop.f32.mrf.mxu0  ;;  %v7369_v6 = vpop.f32.mrf.mxu1 }
0x1861   :  { %v7348_v23 = vadd.f32 %v7347_v50, %v7346_v4  ;;  %v6309_v44 = vadd.f32 %v7367_v29, %v6268_v57  ;;  %v7370_v18 = vadd.f32 %v7369_v6, %v7368_v17  ;;  %v6525_v6 = vld [vmem:[%s9407_s3] sm:$0xff] }
0x1863   :  { %v6271_v60 = vadd.f32 %v7348_v23, %v6230_v28  ;;  %v7092_v28 = vld [vmem:[%s9409_s14] ss:$0 sm:$0xff] }
0x1865   :  { %v6312_v16 = vadd.f32 %v7370_v18, %v6271_v60 }
0x187a   :  { %v7387_v51 = vpop.f32.mrf.mxu0 }
0x187b   :  { %v7409_v9 = vpop.f32.mrf.mxu1 }
0x187c   :  { %v7388_v10 = vpop.f32.mrf.mxu0 }
0x187d   :  { %v7410_v22 = vpop.f32.mrf.mxu1  ;;  %v7389_v31 = vadd.f32 %v7388_v10, %v7387_v51  ;;  %v6545_v51 = vld [vmem:[%s9408_s8 + $0x30] sm:$0xff] }
0x187e   :  { %v7390_v26 = vpop.f32.mrf.mxu0  ;;  %v7411_v36 = vadd.f32 %v7410_v22, %v7409_v9  ;;  %7801 = vmatprep.subr.mxu0 %v6545_v51  ;;  %v6542_v9 = vld [vmem:[%s9408_s8 + $0x18] sm:$0xff]  ;;  %v6541_v10 = vld [vmem:[%s9408_s8 + $0x10] sm:$0xff] }
0x187f   :  { %v7412_v33 = vpop.f32.mrf.mxu1  ;;  %v6350_v35 = vadd.f32 %v7389_v31, %v6309_v44  ;;  %7802 = vmatpush3.msra.mxu0 %v6545_v51  ;;  %v7093_v31 = vld [vmem:[%s9410_s19] ss:$0 sm:$0xff] }
0x1880   :  { %v7391_v2 = vpop.f32.mrf.mxu0  ;;  %7803 = vmatprep.subr.mxu0 %v6544_v7 }
0x1881   :  { %v7392_v15 = vadd.f32 %v7391_v2, %v7390_v26  ;;  %v7413_v45 = vpop.f32.mrf.mxu1  ;;  %v6391_v49 = vadd.f32 %v7411_v36, %v6350_v35  ;;  %7804 = vmatpush3.msra.mxu0 %v6544_v7  ;;  %v6650_v36 = vld [vmem:[%s8400_s27 + $0x18] sm:$0xff] }
0x1882   :  { %v7414_v37 = vadd.f32 %v7413_v45, %v7412_v33  ;;  %7805 = vmatprep.subr.mxu0 %v6543_v8  ;;  %7818 = vmatprep.subr.mxu1 %v6650_v36 }
0x1883   :  { %v6353_v41 = vadd.f32 %v7392_v15, %v6312_v16  ;;  %7806 = vmatpush3.msra.mxu0 %v6543_v8  ;;  %7819 = vmatpush3.msra.mxu1 %v6650_v36 }
0x1884   :  { %7807 = vmatprep.subr.mxu0 %v6542_v9 }
0x1885   :  { %v6394_v62 = vadd.f32 %v7414_v37, %v6353_v41  ;;  %7808 = vmatpush3.msra.mxu0 %v6542_v9  ;;  %v7094_v41 = vld [vmem:[%s9411_s24] ss:$0 sm:$0xff] }
0x1886   :  { %7809 = vmatprep.subr.mxu0 %v6541_v10 }
0x1887   :  { %7810 = vmatpush3.msra.mxu0 %v6541_v10 }
0x1888   :  { %7811 = vmatprep.subr.mxu0 %v6540_v30 }
0x1889   :  { %7812 = vmatpush3.msra.mxu0 %v6540_v30 }
0x188a   :  { %7813 = vmatprep.subr.mxu0 %v6539_v11 }
0x188b   :  { %7814 = vmatpush3.msra.mxu0 %v6539_v11 }
0x189a   :  { %v7431_v61 = vpop.f32.mrf.mxu0 }
0x189b   :  { %v7453_v39 = vpop.f32.mrf.mxu1 }
0x189c   :  { %v7432_v40 = vpop.f32.mrf.mxu0 }
0x189d   :  { %v7433_v55 = vadd.f32 %v7432_v40, %v7431_v61  ;;  %v7454_v46 = vpop.f32.mrf.mxu1  ;;  %v6648_v40 = vld [vmem:[%s8400_s27 + $0x8] sm:$0xff] }
0x189e   :  { %v7434_v34 = vpop.f32.mrf.mxu0  ;;  %v7455_v12 = vadd.f32 %v7454_v46, %v7453_v39  ;;  %v6649_v39 = vld [vmem:[%s8400_s27 + $0x10] sm:$0xff] }
0x189f   :  { %v6432_v19 = vadd.f32 %v7433_v55, %v6391_v49  ;;  %v7456_v48 = vpop.f32.mrf.mxu1  ;;  %7820 = vmatprep.subr.mxu1 %v6649_v39  ;;  %v6647_v49 = vld [vmem:[%s8400_s27] sm:$0xff]  ;;  %s8190_s27 = smov [#allocation4]  }
0x18a0   :  { %v7435_v53 = vpop.f32.mrf.mxu0  ;;  %7821 = vmatpush3.msra.mxu1 %v6649_v39  ;;  %s6751_s6 = sshll.u32 %s8190_s27, 4  ;;  %s6752_s6 = int_to_ptr.vmem [resolvable:$true] %s6751_s6 }
0x18a1   :  { %v6473_v21 = vadd.f32 %v7455_v12, %v6432_v19  ;;  %v7436_v54 = vadd.f32 %v7435_v53, %v7434_v34  ;;  %v7457_v24 = vpop.f32.mrf.mxu1  ;;  %7822 = vmatprep.subr.mxu1 %v6648_v40  ;;  %s8106_s12 = scalar_lea.vmem %s6752_s6, 256  ;;  %p8111_p1 = scmp.lt.s32.totalorder %s6752_s6, %s6752_s6 }
0x18a2   :  { %v7458_v56 = vadd.f32 %v7457_v24, %v7456_v48  ;;  %7823 = vmatpush3.msra.mxu1 %v6648_v40  ;;  %p8107_p0 = scmp.ne.s32.totalorder %s6752_s6, %s8106_s12  ;;  %p8112_p2 = scmp.lt.s32.totalorder %s8106_s12, %s8106_s12 }
0x18a3   :  { %v6435_v20 = vadd.f32 %v7436_v54, %v6394_v62  ;;  %v6479_v43 = vadd.f32 %v6473_v21, %v9022_v0  ;;  %7824 = vmatprep.subr.mxu1 %v6647_v49 }
0x18a4   :  { %7825 = vmatpush3.msra.mxu1 %v6647_v49  ;;  %p8113_p3 = por %p8112_p2, %p8111_p1 }
0x18a5   :  { %v6476_v25 = vadd.f32 %v7458_v56, %v6435_v20  ;;  %v6481_v58 = vsel %vm582_vm9, %v6479_v43, 0.0 }
0x18a6   :  { %6482 = vadd.xlane.f32.xlu0 %v6481_v58  ;;  %p8114_p4 = pnand %p8113_p3, %p8107_p0 }
0x18a7   :  { %v6480_v59 = vadd.f32 %v6476_v25, %v9024_v42 }
0x18a9   :  { %v6484_v38 = vsel %vm582_vm9, %v6480_v59, 0.0 }
0x18aa   :  { %6485 = vadd.xlane.f32.xlu1 %v6484_v38 }
0x192f   :  { %v6483_v63 = vpop.xlane.xlu0 %6482 }
0x1930   :  { %v6487_v32 = vmul.f32 0.015625, %v6483_v63 }
0x1932   :  { %v6489_v1 = vsub.f32 %v6479_v43, %v6487_v32 }
0x1933   :  { %v6486_v3 = vpop.xlane.xlu1 %6485 }
0x1934   :  { %v6488_v14 = vmul.f32 0.015625, %v6486_v3  ;;  %v6491_v0 = vmul.f32 %v6489_v1, %v6489_v1 }
0x1936   :  { %v6490_v4 = vsub.f32 %v6480_v59, %v6488_v14  ;;  %v6493_v17 = vsel %vm582_vm9, %v6491_v0, 0.0 }
0x1937   :  { %6494 = vadd.xlane.f32.xlu0 %v6493_v17 }
0x1938   :  { %v6492_v50 = vmul.f32 %v6490_v4, %v6490_v4 }
0x193a   :  { %v6496_v42 = vsel %vm582_vm9, %v6492_v50, 0.0 }
0x193b   :  { %6497 = vadd.xlane.f32.xlu1 %v6496_v42 }
0x194c   :  { %6534 = vperm.xlu1 %7894, %v6526_v47  }
0x194d   :  { %6529 = vperm.xlu0 %7893, %v6525_v6  }
0x19c0   :  { %v6495_v13 = vpop.xlane.xlu0 %6494 }
0x19c1   :  { %v6499_v52 = vmul.f32 0.015625, %v6495_v13 }
0x19c3   :  { %v6501_v22 = vadd.f32 1e-05, %v6499_v52 }
0x19c4   :  { %v6498_v26 = vpop.xlane.xlu1 %6497 }
0x19c5   :  { %8092 = vrsqrt.f32 %v6501_v22  ;;  %v6500_v27 = vmul.f32 0.015625, %v6498_v26 }
0x19c7   :  { %v6502_v57 = vadd.f32 1e-05, %v6500_v27 }
0x19c8   :  { %v6530_v44 = vpop.permute.xlu0 %6529  ;;  %v6535_v45 = vpop.permute.xlu1 %6534 }
0x19c9   :  { %8094 = vrsqrt.f32 %v6502_v57 }
0x19d2   :  { %v8093_v23 = vpop.eup %8092 }
0x19d3   :  { %v6505_v29 = vmul.f32 %v8093_v23, %v6489_v1 }
0x19d5   :  { %v6514_v33 = vmul.f32 %v7092_v28, %v6505_v29 }
0x19d6   :  { %v8095_v2 = vpop.eup %8094 }
0x19d7   :  { %v6523_v60 = vadd.f32 %v7093_v31, %v6514_v33  ;;  %v6506_v18 = vmul.f32 %v8095_v2, %v6490_v4 }
0x19d9   :  { %v6537_v35 = vadd.f32 %v6530_v44, %v6523_v60  ;;  %v6515_v15 = vmul.f32 %v7092_v28, %v6506_v18 }
0x19db   :  { %7815 = vmatprep.mubr.msk.f32.mxu0 %vm582_vm9, %v6537_v35  ;;  %v6524_v61 = vadd.f32 %v7093_v31, %v6515_v15 }
0x19dd   :  { %v6538_v16 = vadd.f32 %v6535_v45, %v6524_v61 }
0x19df   :  { %7816 = vmatmul.mubr.msk.f32.vlgmr.msra.gmra.mxu0 %vm582_vm9, %v6538_v16 }
0x1a9f   :  { %v7817_v55 = vpop.f32.mrf.mxu0 }
0x1aa0   :  { %v6632_v46 = vadd.f32 %v7817_v55, %v7094_v41 }
0x1aa1   :  { %v6626_v34 = vpop.f32.mrf.mxu0 }
0x1aa2   :  { %v7098_v37 = vmul.f32 -1.442695, %v6632_v46  ;;  %v6627_v19 = vadd.f32 %v7094_v41, %v6626_v34 }
0x1aa4   :  { %8096 = vpow2.f32 %v7098_v37  ;;  %v7097_v12 = vmul.f32 -1.442695, %v6627_v19 }
0x1aa6   :  { %8098 = vpow2.f32 %v7097_v12 }
0x1ab1   :  { %v8097_v48 = vpop.eup %8096 }
0x1ab2   :  { %v6642_v62 = vadd.f32 1.0, %v8097_v48 }
0x1ab3   :  { %v8099_v53 = vpop.eup %8098 }
0x1ab4   :  { %v6641_v21 = vadd.f32 1.0, %v8099_v53 }
0x1ab6   :  { %8100 = vrcp.f32 %v6641_v21 }
0x1ab7   :  { %8102 = vrcp.f32 %v6642_v62 }
0x1ac3   :  { %v8101_v54 = vpop.eup %8100 }
0x1ac4   :  { %v8103_v24 = vpop.eup %8102  ;;  %7826 = vmatprep.mubr.msk.f32.mxu1 %vm280_vm5, %v8101_v54 }
0x1ac5   :  { %7827 = vmatmul.mubr.msk.f32.vlgmr.msra.gmra.mxu1 %vm280_vm5, %v8103_v24 }
0x1ac6   :  { %8117 = shalt.err (!%p8114_p4)
}
0x1ac7   :  { %s8191_s20 = smov 128   ;;  %v7099_v20 = vld [vmem:[#allocation3] ss:$0 sm:$0xff]  ;;  %vm6741_vm1 = vcmask 7168  }
0x1ac8   :  { %6757 = dma.vmem_to_hbm [thread:$0]  %s6752_s6, 256, %s8413_s30, [#allocation5], %s8191_s20, %s8191_s20, %s8182_s1  }
0x1b85   :  { %v7828_v56 = vpop.f32.mrf.mxu1 }
0x1b86   :  { %v6736_v43 = vadd.f32 %v7828_v56, %v7099_v20 }
0x1b87   :  { %v6730_v25 = vpop.f32.mrf.mxu1 }
0x1b88   :  { %v6740_v58 = vmin.f32 %v6736_v43, 80.0  ;;  %v6731_v59 = vadd.f32 %v7099_v20, %v6730_v25 }
0x1b8a   :  { %6743 = vst.msk [vmem:[%s8408_s21 + $0x8] sm:$0xff] %vm6741_vm1, %v6740_v58  ;;  %v6739_v38 = vmin.f32 %v6731_v59, 80.0 }
0x1b8c   :  { %6742 = vst.msk [vmem:[%s8408_s21] sm:$0xff] %vm6741_vm1, %v6739_v38 }
0x1b8d   :  { %8126 = dma.done.wait [#allocation5], 256  }
0x1b8e   :  { %8127 = vsyncadd [#allocation5], 4294967040 }
0x1b8f   :  { %6763 = vsyncpa [#allocation5], 1 }

</bundles_post_ra>
